<compile_context>
chip_gen: v6e
topology: v6e:2x2x1
jax: 0.10.0
libtpu: 0.0.40
codegen_flags: <defaults>
</compile_context>

<pallas_src>
import functools

import jax
import jax.numpy as jnp
from jax import lax
from jax.experimental import pallas as pl
from jax.experimental.pallas import tpu as pltpu

LN_EPS = 1e-12
_SQRT_HALF = 0.7071067811865476


def _erf(x):
    # Abramowitz & Stegun 7.1.26 rational approximation (max |err| ~1.5e-7).
    p = 0.3275911
    a1, a2, a3, a4, a5 = (0.254829592, -0.284496736, 1.421413741,
                          -1.453152027, 1.061405429)
    ax = jnp.abs(x)
    t = 1.0 / (1.0 + p * ax)
    poly = ((((a5 * t + a4) * t + a3) * t + a2) * t + a1) * t
    y = 1.0 - poly * jnp.exp(-(ax * ax))
    return jnp.where(x >= 0.0, y, -y)


def _gelu(x):
    # HuggingFace exact gelu: x * 0.5 * (1 + erf(x / sqrt(2)))
    return x * 0.5 * (1.0 + _erf(x * _SQRT_HALF))


def _layernorm(x, gamma, beta):
    # TF-style LayerNorm (epsilon inside the sqrt), as in the PyTorch module.
    u = jnp.mean(x, axis=-1, keepdims=True)
    d = x - u
    s = jnp.mean(d * d, axis=-1, keepdims=True)
    return gamma * (d * lax.rsqrt(s + LN_EPS)) + beta


def bert_stack_kernel(emb_ref, eg_ref, eb_ref,
                      wq_ref, bq_ref, wk_ref, bk_ref, wv_ref, bv_ref,
                      wo_ref, bo_ref, g1_ref, b1_ref,
                      w1_ref, c1_ref, w2_ref, c2_ref, g2_ref, b2_ref,
                      out_ref, h_state,
                      *, n_layers, n_top_layers, n_heads):
    """One grid step == one transformer Block.

    h_state (VMEM scratch, (B,S,D)) carries the hidden state across layers.
    out_ref ((B,D), resident accumulator) collects h[:, 0, :] of the top
    `n_top_layers` blocks, i.e. BertAverage's features[:, 0].
    """
    layer = pl.program_id(0)

    @pl.when(layer == 0)
    def _init():
        # Embedding LayerNorm (dropout == identity in eval mode).
        h_state[...] = _layernorm(emb_ref[...], eg_ref[...], eb_ref[...])
        out_ref[...] = jnp.zeros_like(out_ref)

    x = h_state[...]                         # (B, S, D)
    B, S, D = x.shape
    Wh = D // n_heads                        # head width
    scale = 1.0 / (Wh ** 0.5)
    x2 = x.reshape(B * S, D)

    # --- multi-headed self attention --------------------------------------
    q = jnp.dot(x2, wq_ref[...], preferred_element_type=jnp.float32) + bq_ref[...]
    k = jnp.dot(x2, wk_ref[...], preferred_element_type=jnp.float32) + bk_ref[...]
    v = jnp.dot(x2, wv_ref[...], preferred_element_type=jnp.float32) + bv_ref[...]
    q = q.reshape(B, S, D)
    k = k.reshape(B, S, D)
    v = v.reshape(B, S, D)

    heads = []
    for hh in range(n_heads):                # static unroll over heads
        lo, hi = hh * Wh, (hh + 1) * Wh
        qh, kh, vh = q[:, :, lo:hi], k[:, :, lo:hi], v[:, :, lo:hi]
        s = jnp.einsum('bqw,bkw->bqk', qh, kh,
                       preferred_element_type=jnp.float32) * scale
        s = s - jnp.max(s, axis=-1, keepdims=True)
        e = jnp.exp(s)
        p = e / jnp.sum(e, axis=-1, keepdims=True)          # softmax
        heads.append(jnp.einsum('bqk,bkw->bqw', p, vh,
                                preferred_element_type=jnp.float32))
    attn = jnp.concatenate(heads, axis=-1)                  # (B, S, D)

    proj = jnp.dot(attn.reshape(B * S, D), wo_ref[...],
                   preferred_element_type=jnp.float32) + bo_ref[...]
    h1 = _layernorm(x + proj.reshape(B, S, D), g1_ref[...], b1_ref[...])

    # --- position-wise feed forward ----------------------------------------
    f = jnp.dot(h1.reshape(B * S, D), w1_ref[...],
                preferred_element_type=jnp.float32) + c1_ref[...]
    f = _gelu(f)
    f = jnp.dot(f, w2_ref[...], preferred_element_type=jnp.float32) + c2_ref[...]
    h2 = _layernorm(h1 + f.reshape(B, S, D), g2_ref[...], b2_ref[...])

    h_state[...] = h2

    @pl.when(layer >= n_layers - n_top_layers)
    def _accumulate():
        out_ref[...] += h2[:, 0, :]          # CLS rows of the top layers


def bert_average_forward(tokens_ids, segment_ids, params, *, n_heads,
                         n_top_layers):
    """BertAverage.forward: embed -> n_layers blocks -> sum(top hiddens)[:,0]."""
    B, S = tokens_ids.shape
    D = params['tok_embed'].shape[1]
    L = params['wq'].shape[0]
    FF = params['w1'].shape[-1]

    # Embedding gathers stay in XLA (data-dependent lookup); the add + norm
    # and the whole transformer stack run in a single fused Pallas kernel.
    tok = jnp.take(params['tok_embed'], tokens_ids, axis=0)     # (B, S, D)
    seg = jnp.take(params['seg_embed'], segment_ids, axis=0)    # (B, S, D)
    pos = params['pos_embed'][:S]                               # (S, D)
    emb = tok + pos[None, :, :] + seg

    def full_spec(shape):
        n = len(shape)
        return pl.BlockSpec(tuple(shape), lambda layer: (0,) * n)

    def layer_spec(shape):
        n = len(shape)
        return pl.BlockSpec((None,) + tuple(shape),
                            lambda layer: (layer,) + (0,) * n)

    per_layer = [
        ('wq', (D, D)), ('bq', (1, D)), ('wk', (D, D)), ('bk', (1, D)),
        ('wv', (D, D)), ('bv', (1, D)), ('wo', (D, D)), ('bo', (1, D)),
        ('g1', (1, D)), ('b1', (1, D)),
        ('w1', (D, FF)), ('c1', (1, FF)), ('w2', (FF, D)), ('c2', (1, D)),
        ('g2', (1, D)), ('b2', (1, D)),
    ]

    in_specs = ([full_spec((B, S, D)), full_spec((1, D)), full_spec((1, D))]
                + [layer_spec(s) for _, s in per_layer])
    args = ([emb, params['emb_gamma'], params['emb_beta']]
            + [params[name] for name, _ in per_layer])

    kernel = functools.partial(bert_stack_kernel, n_layers=L,
                               n_top_layers=n_top_layers, n_heads=n_heads)

    return pl.pallas_call(
        kernel,
        out_shape=jax.ShapeDtypeStruct((B, D), jnp.float32),
        grid_spec=pltpu.PrefetchScalarGridSpec(
            num_scalar_prefetch=0,
            grid=(L,),
            in_specs=in_specs,
            out_specs=pl.BlockSpec((B, D), lambda layer: (0, 0)),
            scratch_shapes=[pltpu.VMEM((B, S, D), jnp.float32)],
        ),
        compiler_params=pltpu.CompilerParams(
            dimension_semantics=("arbitrary",),   # sequential layer carry
        ),
    )(*args)


if __name__ == "__main__":
    # Small shapes consistent with the module (D = n_heads * head_width).
    B, S = 2, 16
    D, N_HEADS = 128, 4
    FF = 4 * D
    VOCAB, MAX_LEN = 64, 64
    N_LAYERS, N_TOP = 4, 2

    key = jax.random.PRNGKey(0)
    keys = iter(jax.random.split(key, 40))

    def rnd(shape, scale=0.02):
        return jax.random.normal(next(keys), shape, jnp.float32) * scale

    params = {
        'tok_embed': rnd((VOCAB, D)).at[0].set(0.0),   # padding_idx=0 row
        'pos_embed': rnd((MAX_LEN, D)),
        'seg_embed': rnd((2, D)),
        'emb_gamma': 1.0 + rnd((1, D), 0.05),
        'emb_beta': rnd((1, D), 0.05),
        # Per-layer weights stacked along a leading layer axis; Linear weights
        # are stored in (in, out) matmul form.
        'wq': rnd((N_LAYERS, D, D)), 'bq': rnd((N_LAYERS, 1, D)),
        'wk': rnd((N_LAYERS, D, D)), 'bk': rnd((N_LAYERS, 1, D)),
        'wv': rnd((N_LAYERS, D, D)), 'bv': rnd((N_LAYERS, 1, D)),
        'wo': rnd((N_LAYERS, D, D)), 'bo': rnd((N_LAYERS, 1, D)),
        'g1': 1.0 + rnd((N_LAYERS, 1, D), 0.05), 'b1': rnd((N_LAYERS, 1, D), 0.05),
        'w1': rnd((N_LAYERS, D, FF)), 'c1': rnd((N_LAYERS, 1, FF)),
        'w2': rnd((N_LAYERS, FF, D)), 'c2': rnd((N_LAYERS, 1, D)),
        'g2': 1.0 + rnd((N_LAYERS, 1, D), 0.05), 'b2': rnd((N_LAYERS, 1, D), 0.05),
    }

    tokens_ids = jax.random.randint(next(keys), (B, S), 0, VOCAB)
    segment_ids = jax.random.randint(next(keys), (B, S), 0, 2)

    cls_sum = bert_average_forward(tokens_ids, segment_ids, params,
                                   n_heads=N_HEADS, n_top_layers=N_TOP)
    jax.block_until_ready(cls_sum)
    assert cls_sum.shape == (B, D), cls_sum.shape
    assert bool(jnp.all(jnp.isfinite(cls_sum))), "non-finite output"
    print("KERNEL_OK")
</pallas_src>

<mosaic_0001>
module attributes {stable_mosaic.version = 11 : i64} {
  func.func @bert_stack_kernel(%arg0: i32, %arg1: memref<2x16x128xf32, #tpu.memory_space<vmem>>, %arg2: memref<1x128xf32, #tpu.memory_space<vmem>>, %arg3: memref<1x128xf32, #tpu.memory_space<vmem>>, %arg4: memref<1x128x128xf32, #tpu.memory_space<vmem>>, %arg5: memref<1x1x128xf32, #tpu.memory_space<vmem>>, %arg6: memref<1x128x128xf32, #tpu.memory_space<vmem>>, %arg7: memref<1x1x128xf32, #tpu.memory_space<vmem>>, %arg8: memref<1x128x128xf32, #tpu.memory_space<vmem>>, %arg9: memref<1x1x128xf32, #tpu.memory_space<vmem>>, %arg10: memref<1x128x128xf32, #tpu.memory_space<vmem>>, %arg11: memref<1x1x128xf32, #tpu.memory_space<vmem>>, %arg12: memref<1x1x128xf32, #tpu.memory_space<vmem>>, %arg13: memref<1x1x128xf32, #tpu.memory_space<vmem>>, %arg14: memref<1x128x512xf32, #tpu.memory_space<vmem>>, %arg15: memref<1x1x512xf32, #tpu.memory_space<vmem>>, %arg16: memref<1x512x128xf32, #tpu.memory_space<vmem>>, %arg17: memref<1x1x128xf32, #tpu.memory_space<vmem>>, %arg18: memref<1x1x128xf32, #tpu.memory_space<vmem>>, %arg19: memref<1x1x128xf32, #tpu.memory_space<vmem>>, %arg20: memref<2x128xf32, #tpu.memory_space<vmem>>, %arg21: memref<2x16x128xf32, #tpu.memory_space<vmem>>) attributes {dimension_semantics = [#tpu.dimension_semantics<arbitrary>], iteration_bounds = array<i64: 4>, scalar_prefetch = 0 : i64, scratch_operands = 1 : i64, tpu.core_type = #tpu.core_type<tc>, window_params = [{pipeline_mode = #tpu.pipeline_mode<synchronous>, transform_indices = @transform_0, window_bounds = array<i64: 2, 16, 128>}, {pipeline_mode = #tpu.pipeline_mode<synchronous>, transform_indices = @transform_1, window_bounds = array<i64: 1, 128>}, {pipeline_mode = #tpu.pipeline_mode<synchronous>, transform_indices = @transform_2, window_bounds = array<i64: 1, 128>}, {transform_indices = @transform_3, window_bounds = array<i64: 1, 128, 128>}, {transform_indices = @transform_4, window_bounds = array<i64: 1, 1, 128>}, {transform_indices = @transform_5, window_bounds = array<i64: 1, 128, 128>}, {transform_indices = @transform_6, window_bounds = array<i64: 1, 1, 128>}, {transform_indices = @transform_7, window_bounds = array<i64: 1, 128, 128>}, {transform_indices = @transform_8, window_bounds = array<i64: 1, 1, 128>}, {transform_indices = @transform_9, window_bounds = array<i64: 1, 128, 128>}, {transform_indices = @transform_10, window_bounds = array<i64: 1, 1, 128>}, {transform_indices = @transform_11, window_bounds = array<i64: 1, 1, 128>}, {transform_indices = @transform_12, window_bounds = array<i64: 1, 1, 128>}, {transform_indices = @transform_13, window_bounds = array<i64: 1, 128, 512>}, {transform_indices = @transform_14, window_bounds = array<i64: 1, 1, 512>}, {transform_indices = @transform_15, window_bounds = array<i64: 1, 512, 128>}, {transform_indices = @transform_16, window_bounds = array<i64: 1, 1, 128>}, {transform_indices = @transform_17, window_bounds = array<i64: 1, 1, 128>}, {transform_indices = @transform_18, window_bounds = array<i64: 1, 1, 128>}, {pipeline_mode = #tpu.pipeline_mode<synchronous>, transform_indices = @transform_19, window_bounds = array<i64: 2, 128>}]} {
    %c0_i32 = arith.constant 0 : i32
    %0 = arith.cmpi eq, %arg0, %c0_i32 : i32
    %1 = arith.extui %0 : i1 to i32
    %c0_i32_0 = arith.constant 0 : i32
    %2 = arith.cmpi ne, %1, %c0_i32_0 : i32
    scf.if %2 {
      %c0_105 = arith.constant 0 : index
      %c0_106 = arith.constant 0 : index
      %c0_107 = arith.constant 0 : index
      %217 = vector.load %arg1[%c0_105, %c0_106, %c0_107] : memref<2x16x128xf32, #tpu.memory_space<vmem>>, vector<2x16x128xf32>
      %c0_108 = arith.constant 0 : index
      %c0_109 = arith.constant 0 : index
      %218 = vector.load %arg2[%c0_108, %c0_109] : memref<1x128xf32, #tpu.memory_space<vmem>>, vector<1x128xf32>
      %c0_110 = arith.constant 0 : index
      %c0_111 = arith.constant 0 : index
      %219 = vector.load %arg3[%c0_110, %c0_111] : memref<1x128xf32, #tpu.memory_space<vmem>>, vector<1x128xf32>
      %cst_112 = arith.constant dense<0.000000e+00> : vector<2x16xf32>
      %220 = vector.multi_reduction <add>, %217, %cst_112 [2] : vector<2x16x128xf32> to vector<2x16xf32>
      %221 = vector.shape_cast %220 : vector<2x16xf32> to vector<2x16x1xf32>
      %cst_113 = arith.constant 1.280000e+02 : f32
      %222 = vector.broadcast %cst_113 : f32 to vector<2x16x1xf32>
      %223 = arith.divf %221, %222 : vector<2x16x1xf32>
      %224 = vector.broadcast %223 : vector<2x16x1xf32> to vector<2x16x128xf32>
      %225 = arith.subf %217, %224 : vector<2x16x128xf32>
      %226 = arith.mulf %225, %225 : vector<2x16x128xf32>
      %cst_114 = arith.constant dense<0.000000e+00> : vector<2x16xf32>
      %227 = vector.multi_reduction <add>, %226, %cst_114 [2] : vector<2x16x128xf32> to vector<2x16xf32>
      %228 = vector.shape_cast %227 : vector<2x16xf32> to vector<2x16x1xf32>
      %cst_115 = arith.constant 1.280000e+02 : f32
      %229 = vector.broadcast %cst_115 : f32 to vector<2x16x1xf32>
      %230 = arith.divf %228, %229 : vector<2x16x1xf32>
      %cst_116 = arith.constant 9.99999996E-13 : f32
      %231 = vector.broadcast %cst_116 : f32 to vector<2x16x1xf32>
      %232 = arith.addf %230, %231 : vector<2x16x1xf32>
      %233 = math.rsqrt %232 : vector<2x16x1xf32>
      %234 = vector.broadcast %233 : vector<2x16x1xf32> to vector<2x16x128xf32>
      %235 = arith.mulf %225, %234 : vector<2x16x128xf32>
      %236 = vector.shape_cast %218 : vector<1x128xf32> to vector<1x1x128xf32>
      %237 = vector.broadcast %236 : vector<1x1x128xf32> to vector<2x16x128xf32>
      %238 = arith.mulf %237, %235 : vector<2x16x128xf32>
      %239 = vector.shape_cast %219 : vector<1x128xf32> to vector<1x1x128xf32>
      %240 = vector.broadcast %239 : vector<1x1x128xf32> to vector<2x16x128xf32>
      %241 = arith.addf %238, %240 : vector<2x16x128xf32>
      %c0_117 = arith.constant 0 : index
      %c0_118 = arith.constant 0 : index
      %c0_119 = arith.constant 0 : index
      %242 = vector.load %arg21[%c0_117, %c0_118, %c0_119] : memref<2x16x128xf32, #tpu.memory_space<vmem>>, vector<2x16x128xf32>
      tpu.vector_store %arg21[%c0_117, %c0_118, %c0_119], %241 {strides = array<i32>} : memref<2x16x128xf32, #tpu.memory_space<vmem>>, vector<2x16x128xf32>,
      %cst_120 = arith.constant 0.000000e+00 : f32
      %243 = vector.broadcast %cst_120 : f32 to vector<2x128xf32>
      %c0_121 = arith.constant 0 : index
      %c0_122 = arith.constant 0 : index
      %244 = vector.load %arg20[%c0_121, %c0_122] : memref<2x128xf32, #tpu.memory_space<vmem>>, vector<2x128xf32>
      tpu.vector_store %arg20[%c0_121, %c0_122], %243 {strides = array<i32>} : memref<2x128xf32, #tpu.memory_space<vmem>>, vector<2x128xf32>,
    } else {
    }
    %c0 = arith.constant 0 : index
    %c0_1 = arith.constant 0 : index
    %c0_2 = arith.constant 0 : index
    %3 = vector.load %arg21[%c0, %c0_1, %c0_2] : memref<2x16x128xf32, #tpu.memory_space<vmem>>, vector<2x16x128xf32>
    %4 = vector.shape_cast %3 : vector<2x16x128xf32> to vector<32x128xf32>
    %c0_3 = arith.constant 0 : index
    %c0_4 = arith.constant 0 : index
    %c0_5 = arith.constant 0 : index
    %5 = vector.load %arg4[%c0_3, %c0_4, %c0_5] : memref<1x128x128xf32, #tpu.memory_space<vmem>>, vector<1x128x128xf32>
    %6 = vector.shape_cast %5 : vector<1x128x128xf32> to vector<128x128xf32>
    %cst = arith.constant dense<0.000000e+00> : vector<32x128xf32>
    %7 = tpu.matmul %4, %6, %cst {dimension_numbers = #tpu.dot_dimension_numbers<[1], [0], [0], [1], [0, 0, 1, 1], [], []>} : vector<32x128xf32>, vector<128x128xf32>, vector<32x128xf32> -> vector<32x128xf32>
    %c0_6 = arith.constant 0 : index
    %c0_7 = arith.constant 0 : index
    %c0_8 = arith.constant 0 : index
    %8 = vector.load %arg5[%c0_6, %c0_7, %c0_8] : memref<1x1x128xf32, #tpu.memory_space<vmem>>, vector<1x1x128xf32>
    %9 = vector.shape_cast %8 : vector<1x1x128xf32> to vector<1x128xf32>
    %10 = vector.broadcast %9 : vector<1x128xf32> to vector<32x128xf32>
    %11 = arith.addf %7, %10 : vector<32x128xf32>
    %c0_9 = arith.constant 0 : index
    %c0_10 = arith.constant 0 : index
    %c0_11 = arith.constant 0 : index
    %12 = vector.load %arg6[%c0_9, %c0_10, %c0_11] : memref<1x128x128xf32, #tpu.memory_space<vmem>>, vector<1x128x128xf32>
    %13 = vector.shape_cast %12 : vector<1x128x128xf32> to vector<128x128xf32>
    %cst_12 = arith.constant dense<0.000000e+00> : vector<32x128xf32>
    %14 = tpu.matmul %4, %13, %cst_12 {dimension_numbers = #tpu.dot_dimension_numbers<[1], [0], [0], [1], [0, 0, 1, 1], [], []>} : vector<32x128xf32>, vector<128x128xf32>, vector<32x128xf32> -> vector<32x128xf32>
    %c0_13 = arith.constant 0 : index
    %c0_14 = arith.constant 0 : index
    %c0_15 = arith.constant 0 : index
    %15 = vector.load %arg7[%c0_13, %c0_14, %c0_15] : memref<1x1x128xf32, #tpu.memory_space<vmem>>, vector<1x1x128xf32>
    %16 = vector.shape_cast %15 : vector<1x1x128xf32> to vector<1x128xf32>
    %17 = vector.broadcast %16 : vector<1x128xf32> to vector<32x128xf32>
    %18 = arith.addf %14, %17 : vector<32x128xf32>
    %c0_16 = arith.constant 0 : index
    %c0_17 = arith.constant 0 : index
    %c0_18 = arith.constant 0 : index
    %19 = vector.load %arg8[%c0_16, %c0_17, %c0_18] : memref<1x128x128xf32, #tpu.memory_space<vmem>>, vector<1x128x128xf32>
    %20 = vector.shape_cast %19 : vector<1x128x128xf32> to vector<128x128xf32>
    %cst_19 = arith.constant dense<0.000000e+00> : vector<32x128xf32>
    %21 = tpu.matmul %4, %20, %cst_19 {dimension_numbers = #tpu.dot_dimension_numbers<[1], [0], [0], [1], [0, 0, 1, 1], [], []>} : vector<32x128xf32>, vector<128x128xf32>, vector<32x128xf32> -> vector<32x128xf32>
    %c0_20 = arith.constant 0 : index
    %c0_21 = arith.constant 0 : index
    %c0_22 = arith.constant 0 : index
    %22 = vector.load %arg9[%c0_20, %c0_21, %c0_22] : memref<1x1x128xf32, #tpu.memory_space<vmem>>, vector<1x1x128xf32>
    %23 = vector.shape_cast %22 : vector<1x1x128xf32> to vector<1x128xf32>
    %24 = vector.broadcast %23 : vector<1x128xf32> to vector<32x128xf32>
    %25 = arith.addf %21, %24 : vector<32x128xf32>
    %26 = vector.shape_cast %11 : vector<32x128xf32> to vector<2x16x128xf32>
    %27 = vector.shape_cast %18 : vector<32x128xf32> to vector<2x16x128xf32>
    %28 = vector.shape_cast %25 : vector<32x128xf32> to vector<2x16x128xf32>
    %29 = vector.extract_strided_slice %26 {offsets = [0, 0, 0], sizes = [2, 16, 32], strides = [1, 1, 1]} : vector<2x16x128xf32> to vector<2x16x32xf32>
    %30 = vector.extract_strided_slice %27 {offsets = [0, 0, 0], sizes = [2, 16, 32], strides = [1, 1, 1]} : vector<2x16x128xf32> to vector<2x16x32xf32>
    %31 = vector.extract_strided_slice %28 {offsets = [0, 0, 0], sizes = [2, 16, 32], strides = [1, 1, 1]} : vector<2x16x128xf32> to vector<2x16x32xf32>
    "tpu.trace_start"() <{level = 10 : i32, message = "bqw,bkw->bqk"}> : () -> ()
    %cst_23 = arith.constant dense<0.000000e+00> : vector<2x16x16xf32>
    %32 = tpu.matmul %29, %30, %cst_23 {dimension_numbers = #tpu.dot_dimension_numbers<[2], [2], [1], [1], [0, 0, 0, 1, 1, 1], [0], [0]>} : vector<2x16x32xf32>, vector<2x16x32xf32>, vector<2x16x16xf32> -> vector<2x16x16xf32>
    "tpu.trace_stop"() : () -> ()
    %cst_24 = arith.constant 0.176776692 : f32
    %33 = vector.broadcast %cst_24 : f32 to vector<2x16x16xf32>
    %34 = arith.mulf %32, %33 : vector<2x16x16xf32>
    %cst_25 = arith.constant dense<0xFF800000> : vector<2x16xf32>
    %35 = vector.multi_reduction <maximumf>, %34, %cst_25 [2] : vector<2x16x16xf32> to vector<2x16xf32>
    %36 = vector.shape_cast %35 : vector<2x16xf32> to vector<2x16x1xf32>
    %37 = vector.broadcast %36 : vector<2x16x1xf32> to vector<2x16x16xf32>
    %38 = arith.subf %34, %37 : vector<2x16x16xf32>
    %39 = math.exp %38 : vector<2x16x16xf32>
    %cst_26 = arith.constant dense<0.000000e+00> : vector<2x16xf32>
    %40 = vector.multi_reduction <add>, %39, %cst_26 [2] : vector<2x16x16xf32> to vector<2x16xf32>
    %41 = vector.shape_cast %40 : vector<2x16xf32> to vector<2x16x1xf32>
    %42 = vector.broadcast %41 : vector<2x16x1xf32> to vector<2x16x16xf32>
    %43 = arith.divf %39, %42 : vector<2x16x16xf32>
    "tpu.trace_start"() <{level = 10 : i32, message = "bqk,bkw->bqw"}> : () -> ()
    %cst_27 = arith.constant dense<0.000000e+00> : vector<2x16x32xf32>
    %44 = tpu.matmul %43, %31, %cst_27 {dimension_numbers = #tpu.dot_dimension_numbers<[2], [1], [1], [2], [0, 0, 0, 1, 1, 2], [0], [0]>} : vector<2x16x16xf32>, vector<2x16x32xf32>, vector<2x16x32xf32> -> vector<2x16x32xf32>
    "tpu.trace_stop"() : () -> ()
    %45 = vector.extract_strided_slice %26 {offsets = [0, 0, 32], sizes = [2, 16, 32], strides = [1, 1, 1]} : vector<2x16x128xf32> to vector<2x16x32xf32>
    %46 = vector.extract_strided_slice %27 {offsets = [0, 0, 32], sizes = [2, 16, 32], strides = [1, 1, 1]} : vector<2x16x128xf32> to vector<2x16x32xf32>
    %47 = vector.extract_strided_slice %28 {offsets = [0, 0, 32], sizes = [2, 16, 32], strides = [1, 1, 1]} : vector<2x16x128xf32> to vector<2x16x32xf32>
    "tpu.trace_start"() <{level = 10 : i32, message = "bqw,bkw->bqk"}> : () -> ()
    %cst_28 = arith.constant dense<0.000000e+00> : vector<2x16x16xf32>
    %48 = tpu.matmul %45, %46, %cst_28 {dimension_numbers = #tpu.dot_dimension_numbers<[2], [2], [1], [1], [0, 0, 0, 1, 1, 1], [0], [0]>} : vector<2x16x32xf32>, vector<2x16x32xf32>, vector<2x16x16xf32> -> vector<2x16x16xf32>
    "tpu.trace_stop"() : () -> ()
    %cst_29 = arith.constant 0.176776692 : f32
    %49 = vector.broadcast %cst_29 : f32 to vector<2x16x16xf32>
    %50 = arith.mulf %48, %49 : vector<2x16x16xf32>
    %cst_30 = arith.constant dense<0xFF800000> : vector<2x16xf32>
    %51 = vector.multi_reduction <maximumf>, %50, %cst_30 [2] : vector<2x16x16xf32> to vector<2x16xf32>
    %52 = vector.shape_cast %51 : vector<2x16xf32> to vector<2x16x1xf32>
    %53 = vector.broadcast %52 : vector<2x16x1xf32> to vector<2x16x16xf32>
    %54 = arith.subf %50, %53 : vector<2x16x16xf32>
    %55 = math.exp %54 : vector<2x16x16xf32>
    %cst_31 = arith.constant dense<0.000000e+00> : vector<2x16xf32>
    %56 = vector.multi_reduction <add>, %55, %cst_31 [2] : vector<2x16x16xf32> to vector<2x16xf32>
    %57 = vector.shape_cast %56 : vector<2x16xf32> to vector<2x16x1xf32>
    %58 = vector.broadcast %57 : vector<2x16x1xf32> to vector<2x16x16xf32>
    %59 = arith.divf %55, %58 : vector<2x16x16xf32>
    "tpu.trace_start"() <{level = 10 : i32, message = "bqk,bkw->bqw"}> : () -> ()
    %cst_32 = arith.constant dense<0.000000e+00> : vector<2x16x32xf32>
    %60 = tpu.matmul %59, %47, %cst_32 {dimension_numbers = #tpu.dot_dimension_numbers<[2], [1], [1], [2], [0, 0, 0, 1, 1, 2], [0], [0]>} : vector<2x16x16xf32>, vector<2x16x32xf32>, vector<2x16x32xf32> -> vector<2x16x32xf32>
    "tpu.trace_stop"() : () -> ()
    %61 = vector.extract_strided_slice %26 {offsets = [0, 0, 64], sizes = [2, 16, 32], strides = [1, 1, 1]} : vector<2x16x128xf32> to vector<2x16x32xf32>
    %62 = vector.extract_strided_slice %27 {offsets = [0, 0, 64], sizes = [2, 16, 32], strides = [1, 1, 1]} : vector<2x16x128xf32> to vector<2x16x32xf32>
    %63 = vector.extract_strided_slice %28 {offsets = [0, 0, 64], sizes = [2, 16, 32], strides = [1, 1, 1]} : vector<2x16x128xf32> to vector<2x16x32xf32>
    "tpu.trace_start"() <{level = 10 : i32, message = "bqw,bkw->bqk"}> : () -> ()
    %cst_33 = arith.constant dense<0.000000e+00> : vector<2x16x16xf32>
    %64 = tpu.matmul %61, %62, %cst_33 {dimension_numbers = #tpu.dot_dimension_numbers<[2], [2], [1], [1], [0, 0, 0, 1, 1, 1], [0], [0]>} : vector<2x16x32xf32>, vector<2x16x32xf32>, vector<2x16x16xf32> -> vector<2x16x16xf32>
    "tpu.trace_stop"() : () -> ()
    %cst_34 = arith.constant 0.176776692 : f32
    %65 = vector.broadcast %cst_34 : f32 to vector<2x16x16xf32>
    %66 = arith.mulf %64, %65 : vector<2x16x16xf32>
    %cst_35 = arith.constant dense<0xFF800000> : vector<2x16xf32>
    %67 = vector.multi_reduction <maximumf>, %66, %cst_35 [2] : vector<2x16x16xf32> to vector<2x16xf32>
    %68 = vector.shape_cast %67 : vector<2x16xf32> to vector<2x16x1xf32>
    %69 = vector.broadcast %68 : vector<2x16x1xf32> to vector<2x16x16xf32>
    %70 = arith.subf %66, %69 : vector<2x16x16xf32>
    %71 = math.exp %70 : vector<2x16x16xf32>
    %cst_36 = arith.constant dense<0.000000e+00> : vector<2x16xf32>
    %72 = vector.multi_reduction <add>, %71, %cst_36 [2] : vector<2x16x16xf32> to vector<2x16xf32>
    %73 = vector.shape_cast %72 : vector<2x16xf32> to vector<2x16x1xf32>
    %74 = vector.broadcast %73 : vector<2x16x1xf32> to vector<2x16x16xf32>
    %75 = arith.divf %71, %74 : vector<2x16x16xf32>
    "tpu.trace_start"() <{level = 10 : i32, message = "bqk,bkw->bqw"}> : () -> ()
    %cst_37 = arith.constant dense<0.000000e+00> : vector<2x16x32xf32>
    %76 = tpu.matmul %75, %63, %cst_37 {dimension_numbers = #tpu.dot_dimension_numbers<[2], [1], [1], [2], [0, 0, 0, 1, 1, 2], [0], [0]>} : vector<2x16x16xf32>, vector<2x16x32xf32>, vector<2x16x32xf32> -> vector<2x16x32xf32>
    "tpu.trace_stop"() : () -> ()
    %77 = vector.extract_strided_slice %26 {offsets = [0, 0, 96], sizes = [2, 16, 32], strides = [1, 1, 1]} : vector<2x16x128xf32> to vector<2x16x32xf32>
    %78 = vector.extract_strided_slice %27 {offsets = [0, 0, 96], sizes = [2, 16, 32], strides = [1, 1, 1]} : vector<2x16x128xf32> to vector<2x16x32xf32>
    %79 = vector.extract_strided_slice %28 {offsets = [0, 0, 96], sizes = [2, 16, 32], strides = [1, 1, 1]} : vector<2x16x128xf32> to vector<2x16x32xf32>
    "tpu.trace_start"() <{level = 10 : i32, message = "bqw,bkw->bqk"}> : () -> ()
    %cst_38 = arith.constant dense<0.000000e+00> : vector<2x16x16xf32>
    %80 = tpu.matmul %77, %78, %cst_38 {dimension_numbers = #tpu.dot_dimension_numbers<[2], [2], [1], [1], [0, 0, 0, 1, 1, 1], [0], [0]>} : vector<2x16x32xf32>, vector<2x16x32xf32>, vector<2x16x16xf32> -> vector<2x16x16xf32>
    "tpu.trace_stop"() : () -> ()
    %cst_39 = arith.constant 0.176776692 : f32
    %81 = vector.broadcast %cst_39 : f32 to vector<2x16x16xf32>
    %82 = arith.mulf %80, %81 : vector<2x16x16xf32>
    %cst_40 = arith.constant dense<0xFF800000> : vector<2x16xf32>
    %83 = vector.multi_reduction <maximumf>, %82, %cst_40 [2] : vector<2x16x16xf32> to vector<2x16xf32>
    %84 = vector.shape_cast %83 : vector<2x16xf32> to vector<2x16x1xf32>
    %85 = vector.broadcast %84 : vector<2x16x1xf32> to vector<2x16x16xf32>
    %86 = arith.subf %82, %85 : vector<2x16x16xf32>
    %87 = math.exp %86 : vector<2x16x16xf32>
    %cst_41 = arith.constant dense<0.000000e+00> : vector<2x16xf32>
    %88 = vector.multi_reduction <add>, %87, %cst_41 [2] : vector<2x16x16xf32> to vector<2x16xf32>
    %89 = vector.shape_cast %88 : vector<2x16xf32> to vector<2x16x1xf32>
    %90 = vector.broadcast %89 : vector<2x16x1xf32> to vector<2x16x16xf32>
    %91 = arith.divf %87, %90 : vector<2x16x16xf32>
    "tpu.trace_start"() <{level = 10 : i32, message = "bqk,bkw->bqw"}> : () -> ()
    %cst_42 = arith.constant dense<0.000000e+00> : vector<2x16x32xf32>
    %92 = tpu.matmul %91, %79, %cst_42 {dimension_numbers = #tpu.dot_dimension_numbers<[2], [1], [1], [2], [0, 0, 0, 1, 1, 2], [0], [0]>} : vector<2x16x16xf32>, vector<2x16x32xf32>, vector<2x16x32xf32> -> vector<2x16x32xf32>
    "tpu.trace_stop"() : () -> ()
    %93 = tpu.concatenate %44, %60, %76, %92 in 2 : vector<2x16x32xf32>, vector<2x16x32xf32>, vector<2x16x32xf32>, vector<2x16x32xf32> -> vector<2x16x128xf32>
    %94 = vector.shape_cast %93 : vector<2x16x128xf32> to vector<32x128xf32>
    %c0_43 = arith.constant 0 : index
    %c0_44 = arith.constant 0 : index
    %c0_45 = arith.constant 0 : index
    %95 = vector.load %arg10[%c0_43, %c0_44, %c0_45] : memref<1x128x128xf32, #tpu.memory_space<vmem>>, vector<1x128x128xf32>
    %96 = vector.shape_cast %95 : vector<1x128x128xf32> to vector<128x128xf32>
    %cst_46 = arith.constant dense<0.000000e+00> : vector<32x128xf32>
    %97 = tpu.matmul %94, %96, %cst_46 {dimension_numbers = #tpu.dot_dimension_numbers<[1], [0], [0], [1], [0, 0, 1, 1], [], []>} : vector<32x128xf32>, vector<128x128xf32>, vector<32x128xf32> -> vector<32x128xf32>
    %c0_47 = arith.constant 0 : index
    %c0_48 = arith.constant 0 : index
    %c0_49 = arith.constant 0 : index
    %98 = vector.load %arg11[%c0_47, %c0_48, %c0_49] : memref<1x1x128xf32, #tpu.memory_space<vmem>>, vector<1x1x128xf32>
    %99 = vector.shape_cast %98 : vector<1x1x128xf32> to vector<1x128xf32>
    %100 = vector.broadcast %99 : vector<1x128xf32> to vector<32x128xf32>
    %101 = arith.addf %97, %100 : vector<32x128xf32>
    %102 = vector.shape_cast %101 : vector<32x128xf32> to vector<2x16x128xf32>
    %103 = arith.addf %3, %102 : vector<2x16x128xf32>
    %c0_50 = arith.constant 0 : index
    %c0_51 = arith.constant 0 : index
    %c0_52 = arith.constant 0 : index
    %104 = vector.load %arg12[%c0_50, %c0_51, %c0_52] : memref<1x1x128xf32, #tpu.memory_space<vmem>>, vector<1x1x128xf32>
    %105 = vector.shape_cast %104 : vector<1x1x128xf32> to vector<1x128xf32>
    %c0_53 = arith.constant 0 : index
    %c0_54 = arith.constant 0 : index
    %c0_55 = arith.constant 0 : index
    %106 = vector.load %arg13[%c0_53, %c0_54, %c0_55] : memref<1x1x128xf32, #tpu.memory_space<vmem>>, vector<1x1x128xf32>
    %107 = vector.shape_cast %106 : vector<1x1x128xf32> to vector<1x128xf32>
    %cst_56 = arith.constant dense<0.000000e+00> : vector<2x16xf32>
    %108 = vector.multi_reduction <add>, %103, %cst_56 [2] : vector<2x16x128xf32> to vector<2x16xf32>
    %109 = vector.shape_cast %108 : vector<2x16xf32> to vector<2x16x1xf32>
    %cst_57 = arith.constant 1.280000e+02 : f32
    %110 = vector.broadcast %cst_57 : f32 to vector<2x16x1xf32>
    %111 = arith.divf %109, %110 : vector<2x16x1xf32>
    %112 = vector.broadcast %111 : vector<2x16x1xf32> to vector<2x16x128xf32>
    %113 = arith.subf %103, %112 : vector<2x16x128xf32>
    %114 = arith.mulf %113, %113 : vector<2x16x128xf32>
    %cst_58 = arith.constant dense<0.000000e+00> : vector<2x16xf32>
    %115 = vector.multi_reduction <add>, %114, %cst_58 [2] : vector<2x16x128xf32> to vector<2x16xf32>
    %116 = vector.shape_cast %115 : vector<2x16xf32> to vector<2x16x1xf32>
    %cst_59 = arith.constant 1.280000e+02 : f32
    %117 = vector.broadcast %cst_59 : f32 to vector<2x16x1xf32>
    %118 = arith.divf %116, %117 : vector<2x16x1xf32>
    %cst_60 = arith.constant 9.99999996E-13 : f32
    %119 = vector.broadcast %cst_60 : f32 to vector<2x16x1xf32>
    %120 = arith.addf %118, %119 : vector<2x16x1xf32>
    %121 = math.rsqrt %120 : vector<2x16x1xf32>
    %122 = vector.broadcast %121 : vector<2x16x1xf32> to vector<2x16x128xf32>
    %123 = arith.mulf %113, %122 : vector<2x16x128xf32>
    %124 = vector.shape_cast %105 : vector<1x128xf32> to vector<1x1x128xf32>
    %125 = vector.broadcast %124 : vector<1x1x128xf32> to vector<2x16x128xf32>
    %126 = arith.mulf %125, %123 : vector<2x16x128xf32>
    %127 = vector.shape_cast %107 : vector<1x128xf32> to vector<1x1x128xf32>
    %128 = vector.broadcast %127 : vector<1x1x128xf32> to vector<2x16x128xf32>
    %129 = arith.addf %126, %128 : vector<2x16x128xf32>
    %130 = vector.shape_cast %129 : vector<2x16x128xf32> to vector<32x128xf32>
    %c0_61 = arith.constant 0 : index
    %c0_62 = arith.constant 0 : index
    %c0_63 = arith.constant 0 : index
    %131 = vector.load %arg14[%c0_61, %c0_62, %c0_63] : memref<1x128x512xf32, #tpu.memory_space<vmem>>, vector<1x128x512xf32>
    %132 = vector.shape_cast %131 : vector<1x128x512xf32> to vector<128x512xf32>
    %cst_64 = arith.constant dense<0.000000e+00> : vector<32x512xf32>
    %133 = tpu.matmul %130, %132, %cst_64 {dimension_numbers = #tpu.dot_dimension_numbers<[1], [0], [0], [1], [0, 0, 1, 1], [], []>} : vector<32x128xf32>, vector<128x512xf32>, vector<32x512xf32> -> vector<32x512xf32>
    %c0_65 = arith.constant 0 : index
    %c0_66 = arith.constant 0 : index
    %c0_67 = arith.constant 0 : index
    %134 = vector.load %arg15[%c0_65, %c0_66, %c0_67] : memref<1x1x512xf32, #tpu.memory_space<vmem>>, vector<1x1x512xf32>
    %135 = vector.shape_cast %134 : vector<1x1x512xf32> to vector<1x512xf32>
    %136 = vector.broadcast %135 : vector<1x512xf32> to vector<32x512xf32>
    %137 = arith.addf %133, %136 : vector<32x512xf32>
    %cst_68 = arith.constant 5.000000e-01 : f32
    %138 = vector.broadcast %cst_68 : f32 to vector<32x512xf32>
    %139 = arith.mulf %137, %138 : vector<32x512xf32>
    %cst_69 = arith.constant 0.707106769 : f32
    %140 = vector.broadcast %cst_69 : f32 to vector<32x512xf32>
    %141 = arith.mulf %137, %140 : vector<32x512xf32>
    %142 = math.absf %141 : vector<32x512xf32>
    %cst_70 = arith.constant 0.327591091 : f32
    %143 = vector.broadcast %cst_70 : f32 to vector<32x512xf32>
    %144 = arith.mulf %143, %142 : vector<32x512xf32>
    %cst_71 = arith.constant 1.000000e+00 : f32
    %145 = vector.broadcast %cst_71 : f32 to vector<32x512xf32>
    %146 = arith.addf %145, %144 : vector<32x512xf32>
    %cst_72 = arith.constant 1.000000e+00 : f32
    %147 = vector.broadcast %cst_72 : f32 to vector<32x512xf32>
    %148 = arith.divf %147, %146 : vector<32x512xf32>
    %cst_73 = arith.constant 1.06140542 : f32
    %149 = vector.broadcast %cst_73 : f32 to vector<32x512xf32>
    %150 = arith.mulf %149, %148 : vector<32x512xf32>
    %cst_74 = arith.constant -1.45315206 : f32
    %151 = vector.broadcast %cst_74 : f32 to vector<32x512xf32>
    %152 = arith.addf %150, %151 : vector<32x512xf32>
    %153 = arith.mulf %152, %148 : vector<32x512xf32>
    %cst_75 = arith.constant 1.42141378 : f32
    %154 = vector.broadcast %cst_75 : f32 to vector<32x512xf32>
    %155 = arith.addf %153, %154 : vector<32x512xf32>
    %156 = arith.mulf %155, %148 : vector<32x512xf32>
    %cst_76 = arith.constant -0.284496725 : f32
    %157 = vector.broadcast %cst_76 : f32 to vector<32x512xf32>
    %158 = arith.addf %156, %157 : vector<32x512xf32>
    %159 = arith.mulf %158, %148 : vector<32x512xf32>
    %cst_77 = arith.constant 0.254829586 : f32
    %160 = vector.broadcast %cst_77 : f32 to vector<32x512xf32>
    %161 = arith.addf %159, %160 : vector<32x512xf32>
    %162 = arith.mulf %161, %148 : vector<32x512xf32>
    %163 = arith.mulf %142, %142 : vector<32x512xf32>
    %cst_78 = arith.constant 0.000000e+00 : f32
    %164 = vector.broadcast %cst_78 : f32 to vector<32x512xf32>
    %165 = arith.subf %164, %163 : vector<32x512xf32>
    %166 = math.exp %165 : vector<32x512xf32>
    %167 = arith.mulf %162, %166 : vector<32x512xf32>
    %cst_79 = arith.constant 1.000000e+00 : f32
    %168 = vector.broadcast %cst_79 : f32 to vector<32x512xf32>
    %169 = arith.subf %168, %167 : vector<32x512xf32>
    %cst_80 = arith.constant 0.000000e+00 : f32
    %170 = vector.broadcast %cst_80 : f32 to vector<32x512xf32>
    %171 = arith.cmpf oge, %141, %170 : vector<32x512xf32>
    %cst_81 = arith.constant 0.000000e+00 : f32
    %172 = vector.broadcast %cst_81 : f32 to vector<32x512xf32>
    %173 = arith.subf %172, %169 : vector<32x512xf32>
    %174 = arith.select %171, %169, %173 : vector<32x512xi1>, vector<32x512xf32>
    %cst_82 = arith.constant 1.000000e+00 : f32
    %175 = vector.broadcast %cst_82 : f32 to vector<32x512xf32>
    %176 = arith.addf %175, %174 : vector<32x512xf32>
    %177 = arith.mulf %139, %176 : vector<32x512xf32>
    %c0_83 = arith.constant 0 : index
    %c0_84 = arith.constant 0 : index
    %c0_85 = arith.constant 0 : index
    %178 = vector.load %arg16[%c0_83, %c0_84, %c0_85] : memref<1x512x128xf32, #tpu.memory_space<vmem>>, vector<1x512x128xf32>
    %179 = vector.shape_cast %178 : vector<1x512x128xf32> to vector<512x128xf32>
    %cst_86 = arith.constant dense<0.000000e+00> : vector<32x128xf32>
    %180 = tpu.matmul %177, %179, %cst_86 {dimension_numbers = #tpu.dot_dimension_numbers<[1], [0], [0], [1], [0, 0, 1, 1], [], []>} : vector<32x512xf32>, vector<512x128xf32>, vector<32x128xf32> -> vector<32x128xf32>
    %c0_87 = arith.constant 0 : index
    %c0_88 = arith.constant 0 : index
    %c0_89 = arith.constant 0 : index
    %181 = vector.load %arg17[%c0_87, %c0_88, %c0_89] : memref<1x1x128xf32, #tpu.memory_space<vmem>>, vector<1x1x128xf32>
    %182 = vector.shape_cast %181 : vector<1x1x128xf32> to vector<1x128xf32>
    %183 = vector.broadcast %182 : vector<1x128xf32> to vector<32x128xf32>
    %184 = arith.addf %180, %183 : vector<32x128xf32>
    %185 = vector.shape_cast %184 : vector<32x128xf32> to vector<2x16x128xf32>
    %186 = arith.addf %129, %185 : vector<2x16x128xf32>
    %c0_90 = arith.constant 0 : index
    %c0_91 = arith.constant 0 : index
    %c0_92 = arith.constant 0 : index
    %187 = vector.load %arg18[%c0_90, %c0_91, %c0_92] : memref<1x1x128xf32, #tpu.memory_space<vmem>>, vector<1x1x128xf32>
    %188 = vector.shape_cast %187 : vector<1x1x128xf32> to vector<1x128xf32>
    %c0_93 = arith.constant 0 : index
    %c0_94 = arith.constant 0 : index
    %c0_95 = arith.constant 0 : index
    %189 = vector.load %arg19[%c0_93, %c0_94, %c0_95] : memref<1x1x128xf32, #tpu.memory_space<vmem>>, vector<1x1x128xf32>
    %190 = vector.shape_cast %189 : vector<1x1x128xf32> to vector<1x128xf32>
    %cst_96 = arith.constant dense<0.000000e+00> : vector<2x16xf32>
    %191 = vector.multi_reduction <add>, %186, %cst_96 [2] : vector<2x16x128xf32> to vector<2x16xf32>
    %192 = vector.shape_cast %191 : vector<2x16xf32> to vector<2x16x1xf32>
    %cst_97 = arith.constant 1.280000e+02 : f32
    %193 = vector.broadcast %cst_97 : f32 to vector<2x16x1xf32>
    %194 = arith.divf %192, %193 : vector<2x16x1xf32>
    %195 = vector.broadcast %194 : vector<2x16x1xf32> to vector<2x16x128xf32>
    %196 = arith.subf %186, %195 : vector<2x16x128xf32>
    %197 = arith.mulf %196, %196 : vector<2x16x128xf32>
    %cst_98 = arith.constant dense<0.000000e+00> : vector<2x16xf32>
    %198 = vector.multi_reduction <add>, %197, %cst_98 [2] : vector<2x16x128xf32> to vector<2x16xf32>
    %199 = vector.shape_cast %198 : vector<2x16xf32> to vector<2x16x1xf32>
    %cst_99 = arith.constant 1.280000e+02 : f32
    %200 = vector.broadcast %cst_99 : f32 to vector<2x16x1xf32>
    %201 = arith.divf %199, %200 : vector<2x16x1xf32>
    %cst_100 = arith.constant 9.99999996E-13 : f32
    %202 = vector.broadcast %cst_100 : f32 to vector<2x16x1xf32>
    %203 = arith.addf %201, %202 : vector<2x16x1xf32>
    %204 = math.rsqrt %203 : vector<2x16x1xf32>
    %205 = vector.broadcast %204 : vector<2x16x1xf32> to vector<2x16x128xf32>
    %206 = arith.mulf %196, %205 : vector<2x16x128xf32>
    %207 = vector.shape_cast %188 : vector<1x128xf32> to vector<1x1x128xf32>
    %208 = vector.broadcast %207 : vector<1x1x128xf32> to vector<2x16x128xf32>
    %209 = arith.mulf %208, %206 : vector<2x16x128xf32>
    %210 = vector.shape_cast %190 : vector<1x128xf32> to vector<1x1x128xf32>
    %211 = vector.broadcast %210 : vector<1x1x128xf32> to vector<2x16x128xf32>
    %212 = arith.addf %209, %211 : vector<2x16x128xf32>
    %c0_101 = arith.constant 0 : index
    %c0_102 = arith.constant 0 : index
    %c0_103 = arith.constant 0 : index
    %213 = vector.load %arg21[%c0_101, %c0_102, %c0_103] : memref<2x16x128xf32, #tpu.memory_space<vmem>>, vector<2x16x128xf32>
    tpu.vector_store %arg21[%c0_101, %c0_102, %c0_103], %212 {strides = array<i32>} : memref<2x16x128xf32, #tpu.memory_space<vmem>>, vector<2x16x128xf32>,
    %c2_i32 = arith.constant 2 : i32
    %214 = arith.cmpi sge, %arg0, %c2_i32 : i32
    %215 = arith.extui %214 : i1 to i32
    %c0_i32_104 = arith.constant 0 : i32
    %216 = arith.cmpi ne, %215, %c0_i32_104 : i32
    scf.if %216 {
      %c0_105 = arith.constant 0 : index
      %c0_106 = arith.constant 0 : index
      %217 = vector.load %arg20[%c0_105, %c0_106] : memref<2x128xf32, #tpu.memory_space<vmem>>, vector<2x128xf32>
      %218 = vector.extract_strided_slice %212 {offsets = [0, 0, 0], sizes = [2, 1, 128], strides = [1, 1, 1]} : vector<2x16x128xf32> to vector<2x1x128xf32>
      %219 = vector.shape_cast %218 : vector<2x1x128xf32> to vector<2x128xf32>
      %220 = arith.addf %217, %219 : vector<2x128xf32>
      %c0_107 = arith.constant 0 : index
      %c0_108 = arith.constant 0 : index
      %221 = vector.load %arg20[%c0_107, %c0_108] : memref<2x128xf32, #tpu.memory_space<vmem>>, vector<2x128xf32>
      tpu.vector_store %arg20[%c0_107, %c0_108], %220 {strides = array<i32>} : memref<2x128xf32, #tpu.memory_space<vmem>>, vector<2x128xf32>,
    } else {
    }
    return
  }
  func.func @transform_0(%arg0: i32) -> (i32, i32, i32) {
    %c0_i32 = arith.constant 0 : i32
    %c0_i32_0 = arith.constant 0 : i32
    %c0_i32_1 = arith.constant 0 : i32
    %c0_i32_2 = arith.constant 0 : i32
    return %c0_i32, %c0_i32_0, %c0_i32_1 : i32, i32, i32
  }
  func.func @transform_1(%arg0: i32) -> (i32, i32) {
    %c0_i32 = arith.constant 0 : i32
    %c0_i32_0 = arith.constant 0 : i32
    %c0_i32_1 = arith.constant 0 : i32
    return %c0_i32, %c0_i32_0 : i32, i32
  }
  func.func @transform_2(%arg0: i32) -> (i32, i32) {
    %c0_i32 = arith.constant 0 : i32
    %c0_i32_0 = arith.constant 0 : i32
    %c0_i32_1 = arith.constant 0 : i32
    return %c0_i32, %c0_i32_0 : i32, i32
  }
  func.func @transform_3(%arg0: i32) -> (i32, i32, i32) {
    %c0_i32 = arith.constant 0 : i32
    %c0_i32_0 = arith.constant 0 : i32
    %c0_i32_1 = arith.constant 0 : i32
    return %arg0, %c0_i32, %c0_i32_0 : i32, i32, i32
  }
  func.func @transform_4(%arg0: i32) -> (i32, i32, i32) {
    %c0_i32 = arith.constant 0 : i32
    %c0_i32_0 = arith.constant 0 : i32
    %c0_i32_1 = arith.constant 0 : i32
    return %arg0, %c0_i32, %c0_i32_0 : i32, i32, i32
  }
  func.func @transform_5(%arg0: i32) -> (i32, i32, i32) {
    %c0_i32 = arith.constant 0 : i32
    %c0_i32_0 = arith.constant 0 : i32
    %c0_i32_1 = arith.constant 0 : i32
    return %arg0, %c0_i32, %c0_i32_0 : i32, i32, i32
  }
  func.func @transform_6(%arg0: i32) -> (i32, i32, i32) {
    %c0_i32 = arith.constant 0 : i32
    %c0_i32_0 = arith.constant 0 : i32
    %c0_i32_1 = arith.constant 0 : i32
    return %arg0, %c0_i32, %c0_i32_0 : i32, i32, i32
  }
  func.func @transform_7(%arg0: i32) -> (i32, i32, i32) {
    %c0_i32 = arith.constant 0 : i32
    %c0_i32_0 = arith.constant 0 : i32
    %c0_i32_1 = arith.constant 0 : i32
    return %arg0, %c0_i32, %c0_i32_0 : i32, i32, i32
  }
  func.func @transform_8(%arg0: i32) -> (i32, i32, i32) {
    %c0_i32 = arith.constant 0 : i32
    %c0_i32_0 = arith.constant 0 : i32
    %c0_i32_1 = arith.constant 0 : i32
    return %arg0, %c0_i32, %c0_i32_0 : i32, i32, i32
  }
  func.func @transform_9(%arg0: i32) -> (i32, i32, i32) {
    %c0_i32 = arith.constant 0 : i32
    %c0_i32_0 = arith.constant 0 : i32
    %c0_i32_1 = arith.constant 0 : i32
    return %arg0, %c0_i32, %c0_i32_0 : i32, i32, i32
  }
  func.func @transform_10(%arg0: i32) -> (i32, i32, i32) {
    %c0_i32 = arith.constant 0 : i32
    %c0_i32_0 = arith.constant 0 : i32
    %c0_i32_1 = arith.constant 0 : i32
    return %arg0, %c0_i32, %c0_i32_0 : i32, i32, i32
  }
  func.func @transform_11(%arg0: i32) -> (i32, i32, i32) {
    %c0_i32 = arith.constant 0 : i32
    %c0_i32_0 = arith.constant 0 : i32
    %c0_i32_1 = arith.constant 0 : i32
    return %arg0, %c0_i32, %c0_i32_0 : i32, i32, i32
  }
  func.func @transform_12(%arg0: i32) -> (i32, i32, i32) {
    %c0_i32 = arith.constant 0 : i32
    %c0_i32_0 = arith.constant 0 : i32
    %c0_i32_1 = arith.constant 0 : i32
    return %arg0, %c0_i32, %c0_i32_0 : i32, i32, i32
  }
  func.func @transform_13(%arg0: i32) -> (i32, i32, i32) {
    %c0_i32 = arith.constant 0 : i32
    %c0_i32_0 = arith.constant 0 : i32
    %c0_i32_1 = arith.constant 0 : i32
    return %arg0, %c0_i32, %c0_i32_0 : i32, i32, i32
  }
  func.func @transform_14(%arg0: i32) -> (i32, i32, i32) {
    %c0_i32 = arith.constant 0 : i32
    %c0_i32_0 = arith.constant 0 : i32
    %c0_i32_1 = arith.constant 0 : i32
    return %arg0, %c0_i32, %c0_i32_0 : i32, i32, i32
  }
  func.func @transform_15(%arg0: i32) -> (i32, i32, i32) {
    %c0_i32 = arith.constant 0 : i32
    %c0_i32_0 = arith.constant 0 : i32
    %c0_i32_1 = arith.constant 0 : i32
    return %arg0, %c0_i32, %c0_i32_0 : i32, i32, i32
  }
  func.func @transform_16(%arg0: i32) -> (i32, i32, i32) {
    %c0_i32 = arith.constant 0 : i32
    %c0_i32_0 = arith.constant 0 : i32
    %c0_i32_1 = arith.constant 0 : i32
    return %arg0, %c0_i32, %c0_i32_0 : i32, i32, i32
  }
  func.func @transform_17(%arg0: i32) -> (i32, i32, i32) {
    %c0_i32 = arith.constant 0 : i32
    %c0_i32_0 = arith.constant 0 : i32
    %c0_i32_1 = arith.constant 0 : i32
    return %arg0, %c0_i32, %c0_i32_0 : i32, i32, i32
  }
  func.func @transform_18(%arg0: i32) -> (i32, i32, i32) {
    %c0_i32 = arith.constant 0 : i32
    %c0_i32_0 = arith.constant 0 : i32
    %c0_i32_1 = arith.constant 0 : i32
    return %arg0, %c0_i32, %c0_i32_0 : i32, i32, i32
  }
  func.func @transform_19(%arg0: i32) -> (i32, i32) {
    %c0_i32 = arith.constant 0 : i32
    %c0_i32_0 = arith.constant 0 : i32
    %c0_i32_1 = arith.constant 0 : i32
    return %c0_i32, %c0_i32_0 : i32, i32
  }
}

</mosaic_0001>

<bundles_post_ra>
// kernel: tpu_custom_call.1
= control target key start
LH: loop header
LB: loop body
LE: loop exit
PB: predicated region body
PF: predicated region fallthrough
CT: control target
= control target key end

     0   :  { %s7650_s0 = inlined_call_operand.hbm [shape: f32[2,16,128], index: 0, kind: input, shape index: {}]   ;;  %s7651_s1 = inlined_call_operand.hbm [shape: f32[1,128], index: 1, kind: input, shape index: {}]   ;;  %s7652_s2 = inlined_call_operand.hbm [shape: f32[1,128], index: 2, kind: input, shape index: {}]   ;;  %s7653_s3 = inlined_call_operand.hbm [shape: f32[4,128,128], index: 3, kind: input, shape index: {}]   ;;  %s7654_s4 = inlined_call_operand.vmem [shape: f32[4,1,128], index: 4, kind: input, shape index: {}]   ;;  %s7655_s5 = inlined_call_operand.hbm [shape: f32[4,128,128], index: 5, kind: input, shape index: {}]   ;;  %s7656_s6 = inlined_call_operand.vmem [shape: f32[4,1,128], index: 6, kind: input, shape index: {}]   ;;  %s7657_s7 = inlined_call_operand.hbm [shape: f32[4,128,128], index: 7, kind: input, shape index: {}]   ;;  %s7658_s8 = inlined_call_operand.hbm [shape: f32[4,1,128], index: 8, kind: input, shape index: {}]   ;;  %s7659_s9 = inlined_call_operand.hbm [shape: f32[4,128,128], index: 9, kind: input, shape index: {}]   ;;  %s7660_s10 = inlined_call_operand.hbm [shape: f32[4,1,128], index: 10, kind: input, shape index: {}]   ;;  %s7661_s11 = inlined_call_operand.hbm [shape: f32[4,1,128], index: 11, kind: input, shape index: {}]   ;;  %s7662_s12 = inlined_call_operand.hbm [shape: f32[4,1,128], index: 12, kind: input, shape index: {}]   ;;  %s7663_s13 = inlined_call_operand.hbm [shape: f32[4,128,512], index: 13, kind: input, shape index: {}]   ;;  %s7664_s14 = inlined_call_operand.vmem [shape: f32[4,1,512], index: 14, kind: input, shape index: {}]   ;;  %s7665_s15 = inlined_call_operand.hbm [shape: f32[4,512,128], index: 15, kind: input, shape index: {}]   ;;  %s7666_s16 = inlined_call_operand.vmem [shape: f32[4,1,128], index: 16, kind: input, shape index: {}]   ;;  %s7667_s17 = inlined_call_operand.hbm [shape: f32[4,1,128], index: 17, kind: input, shape index: {}]   ;;  %s7668_s18 = inlined_call_operand.vmem [shape: f32[4,1,128], index: 18, kind: input, shape index: {}]   ;;  %s7669_s19 = inlined_call_operand.hbm [shape: f32[2,128], index: 19, kind: output, shape index: {}]  }
   0x1   :  { %7709 = sst [smem:[#allocation57_spill]] %s7650_s0 }
   0x2   :  { %7710 = sst [smem:[#allocation58_spill]] %s7651_s1 }
   0x3   :  { %7711 = sst [smem:[#allocation59_spill]] %s7652_s2 }
   0x4   :  { %7712 = sst [smem:[#allocation60_spill]] %s7653_s3 }
   0x5   :  { %7713 = sst [smem:[#allocation61_spill]] %s7654_s4 }
   0x6   :  { %7714 = sst [smem:[#allocation62_spill]] %s7655_s5 }
   0x7   :  { %7715 = sst [smem:[#allocation63_spill]] %s7656_s6 }
   0x8   :  { %7716 = sst [smem:[#allocation64_spill]] %s7657_s7 }
   0x9   :  { %7717 = sst [smem:[#allocation65_spill]] %s7658_s8 }
   0xa   :  { %7718 = sst [smem:[#allocation66_spill]] %s7659_s9 }
   0xb   :  { %7719 = sst [smem:[#allocation67_spill]] %s7660_s10 }
   0xc   :  { %7720 = sst [smem:[#allocation68_spill]] %s7661_s11 }
   0xd   :  { %7721 = sst [smem:[#allocation69_spill]] %s7663_s13 }
   0xe   :  { %7722 = sst [smem:[#allocation70_spill]] %s7664_s14 }
   0xf   :  { %7723 = sst [smem:[#allocation71_spill]] %s7666_s16 }
  0x10   :  { %7724 = sst [smem:[#allocation72_spill]] %s7667_s17 }
  0x11   :  { %7725 = sst [smem:[#allocation73_spill]] %s7668_s18 }
  0x12   :  { %7726 = sst [smem:[#allocation74_spill]] %s7669_s19 }
  0x13   :  { %24 = vsyncpa [#allocation4], 0 }
  0x14   :  { %25 = vsyncpa [#allocation7], 0 }
  0x15   :  { %26 = vsyncpa [#allocation10], 0 }
  0x16   :  { %28 = vsyncpa [#allocation10 + $0x1], 0 }
  0x17   :  { %29 = vsyncpa [#allocation13], 0 }
  0x18   :  { %31 = vsyncpa [#allocation13 + $0x1], 0 }
  0x19   :  { %32 = vsyncpa [#allocation16], 0 }
  0x1a   :  { %34 = vsyncpa [#allocation16 + $0x1], 0 }
  0x1b   :  { %35 = vsyncpa [#allocation19], 0 }
  0x1c   :  { %37 = vsyncpa [#allocation19 + $0x1], 0 }
  0x1d   :  { %38 = vsyncpa [#allocation22], 0 }
  0x1e   :  { %40 = vsyncpa [#allocation22 + $0x1], 0 }
  0x1f   :  { %41 = vsyncpa [#allocation25], 0 }
  0x20   :  { %43 = vsyncpa [#allocation25 + $0x1], 0 }
  0x21   :  { %44 = vsyncpa [#allocation5], 0  ;;  %s6219_s0 = smov 0   ;;  %s6221_s30 = smov 0  }
  0x22   :  { %s6223_s20 = smov 0   ;;  %s6225_s21 = smov 0  }
  0x23 LB: > { %7727 = sst [smem:[#allocation36_spill]] %s6085_s30  ;;  %s6238_s1 = sadd.s32 4294967295, %s6093_s21   ;;  %s6093_s21 = sphi %s6225_s21, %s7819_s21   ;;  %s6089_s20 = sphi %s6223_s20, %s7822_s20   ;;  %s6085_s30 = sphi %s6221_s30, %s7821_s30   ;;  %s6081_s0 = sphi %s6219_s0, %s7820_s0  }
  0x24   : > { %7728 = sst [smem:[#allocation37_spill]] %s6089_s20  ;;  %s6241_s22 = sadd.s32 1, %s6093_s21  }
  0x25   : > { %7729 = sst [smem:[#allocation38_spill]] %s6238_s1  ;;  %s117_s2 = ssub.s32 %s6093_s21, %s6241_s22 }
  0x26   : > { %7730 = sst [smem:[#allocation39_spill]] %s6241_s22  ;;  %s120_s23 = sadd.s32 1, %s6089_s20 }
  0x27   : > { %p118_p0 = scmp.eq.s32.totalorder %s117_s2, 0  ;;  %p127_p1 = scmp.ne.s32.totalorder %s6089_s20, %s6085_s30 }
  0x28   : > { %p128_p2 = scmp.eq.s32.totalorder %s6093_s21, 0  ;;  %p133_p3 = scmp.ne.s32.totalorder %s6085_s30, %s6081_s0 }
  0x29   : > { %s6251_s24 = scalar_select %p118_p0, %s6089_s20, %s120_s23  }
  0x2a   : > { %p6253_p4 = por %p128_p2, %p127_p1  ;;  %p7671_p5 = scmp.eq.s32.totalorder %s6238_s1, 0 }
  0x2b   : > { %7731 = sst [smem:[#allocation40_spill]] %s6251_s24  ;;  %p4689_p6 = scmp.ge.s32.totalorder %s6093_s21, 1 }
  0x2c   : > { %p555_p7 = scmp.lt.s32.totalorder %s6093_s21, 5  ;;  %p6262_p8 = por %p7671_p5, %p133_p3 }
  0x2d   : > { %s6095_s27 = smov [#allocation6]   ;;  %p5380_p12 = scmp.lt.s32.totalorder %s6093_s21, 4 }
  0x2e   : > { %s7733_s3 = scalar_select %p6262_p8, 1, 0 }
  0x2f   : > { %p6267_p10 = pnand %p4689_p6, %p555_p7  ;;  %s581_s28 = sshll.u32 %s6095_s27, 4  ;;  %s582_s28 = int_to_ptr.vmem [resolvable:$true] %s581_s28 }
  0x30   : > { %7734 = sst [smem:[#allocation41_spill]] %s7733_s3  ;;  %s6275_s29 = sand.u32 1, %s6089_s20  }
  0x31   : > { %s7735_s26 = scalar_select %p6267_p10, 1, 0 }
  0x32   : > { %p5333_p11 = pneg %p6267_p10  ;;  %p6285_p0 = pnand %p5380_p12, %p6253_p4 }
  0x33   : > { %7736 = sst [smem:[#allocation42_spill]] %s7735_s26  ;;  %s6290_s23 = sand.u32 1, %s6093_s21  }
  0x34   : > { %p6279_p13 = pnand %p5333_p11, %p7671_p5  ;;  %s5628_s27 = scalar_lea.vmem %s582_s28, 16 }
  0x35   : > { %p5629_p2 = scmp.ne.s32.totalorder %s582_s28, %s5628_s27  ;;  %s5635_s24 = scalar_lea.vmem %s582_s28, 32 }
  0x36   : > { %s7737_s0 = scalar_select %p6279_p13, 1, 0 }
  0x37   : > { %p7678_p1 = pneg %p6279_p13  ;;  %p5636_p7 = scmp.lt.s32.totalorder %s582_s28, %s582_s28 }
  0x38   : > { %p5637_p11 = scmp.lt.s32.totalorder %s5635_s24, %s5628_s27 }
  0x39   : > { %p5631_p3 = pnand %p5629_p2, %p7678_p1 }
  0x3a   : > { %p5638_p9 = por %p5637_p11, %p5636_p7 }
  0x3b   : > { %p5632_p6 = pneg %p5631_p3 }
  0x3d   : > { %p5639_p5 = pnand %p5638_p9, %p5632_p6 }
  0x3f   : > { %5642 = shalt.err (!%p5639_p5)
}
  0x40   : > { %s7739_s22 = sld [smem:[#allocation58_spill]]  ;;  %s6303_s19 = sshll.u32 %s6275_s29, 7 }
  0x41   : > { %s6306_s18 = sshll.u32 %s6093_s21, 11  ;;  %s7740_s14 = sld [smem:[#allocation60_spill]] }
  0x42   : > { %s607_s20 = scalar_lea.vmem [#allocation9], %s6303_s19  ;;  %p6322_p5 = pneg %p6285_p0 }
  0x43   : > { %s614_s25 = sshll.u32 %s607_s20, 4  ;;  %s6315_s25 = int_to_ptr.vmem [resolvable:$true] %s614_s25 }
  0x46   : > { %5339 = dma.hbm_to_vmem [thread:$0]  (!%p6279_p13), %s7739_s22, 16, %s582_s28, [#allocation7]  }
  0x47   : > { %s6312_s16 = scalar_lea.hbm %s7740_s14, %s6306_s18  ;;  %s5648_s4 = scalar_lea.hbm %s7740_s14, 8192 }
  0x48   : > { %s5643_s22 = scalar_lea.hbm %s6312_s16, 2048  ;;  %p5649_p2 = scmp.lt.s32.totalorder %s6312_s16, %s7740_s14 }
  0x49   : > { %p5644_p4 = scmp.ne.s32.totalorder %s6312_s16, %s5643_s22  ;;  %p5650_p3 = scmp.lt.s32.totalorder %s5648_s4, %s5643_s22 }
  0x4b   : > { %p5646_p9 = pnand %p6322_p5, %p5644_p4  ;;  %p5651_p6 = por %p5650_p3, %p5649_p2 }
  0x4d   : > { %p5647_p12 = pneg %p5646_p9 }
  0x4f   : > { %p5652_p7 = pnand %p5651_p6, %p5647_p12 }
  0x51   : > { %5655 = shalt.err (!%p5652_p7)
}
  0x52   : > { %s5656_s6 = scalar_lea.vmem %s6315_s25, 2048  ;;  %s6096_s30 = smov [#allocation9]  }
  0x53   : > { %p5657_p11 = scmp.ne.s32.totalorder %s6315_s25, %s5656_s6  ;;  %s5661_s24 = sshll.u32 %s6096_s30, 4  ;;  %s5662_s24 = int_to_ptr.vmem [resolvable:$false] %s5661_s24 }
  0x54   : > { %s5663_s27 = scalar_lea.vmem %s5662_s24, 4096  ;;  %p5664_p1 = scmp.lt.s32.totalorder %s6315_s25, %s5662_s24 }
  0x55   : > { %p5659_p4 = pnand %p5657_p11, %p6322_p5  ;;  %p5665_p8 = scmp.lt.s32.totalorder %s5663_s27, %s5656_s6 }
  0x57   : > { %p5660_p9 = pneg %p5659_p4  ;;  %p5666_p10 = por %p5665_p8, %p5664_p1 }
  0x59   : > { %p5667_p13 = pnand %p5666_p10, %p5660_p9 }
  0x5b   : > { %5670 = shalt.err (!%p5667_p13)
}
  0x5c   : > { %s7689_s4 = smov 128   ;;  %s7691_s3 = smov 8  }
  0x5d   : > { %s7742_s30 = scalar_lea.sflag [#allocation10], %s6290_s23  ;;  %s7743_s7 = sld [smem:[#allocation64_spill]] }
  0x5e   : > { %5346 = dma.hbm_to_vmem [thread:$0]  (!%p6285_p0), %s6312_s16, 2048, %s6315_s25, %s7742_s30, %s7689_s4, %s7689_s4, %s7691_s3  }
  0x5f   : > { %s661_s24 = scalar_lea.vmem [#allocation12], %s6303_s19  ;;  %s7688_s14 = scalar_lea.sflag [#allocation13], %s6290_s23 }
  0x60   : > { %s668_s27 = sshll.u32 %s661_s24, 4  ;;  %s6356_s27 = int_to_ptr.vmem [resolvable:$true] %s668_s27 }
  0x63   : > { %s6353_s20 = scalar_lea.hbm %s7743_s7, %s6306_s18  ;;  %s5676_s25 = scalar_lea.hbm %s7743_s7, 8192 }
  0x64   : > { %s5671_s1 = scalar_lea.hbm %s6353_s20, 2048  ;;  %p5677_p1 = scmp.lt.s32.totalorder %s6353_s20, %s7743_s7 }
  0x65   : > { %p5672_p8 = scmp.ne.s32.totalorder %s6353_s20, %s5671_s1  ;;  %p5678_p12 = scmp.lt.s32.totalorder %s5676_s25, %s5671_s1 }
  0x67   : > { %p5674_p10 = pnand %p5672_p8, %p6322_p5  ;;  %p5679_p2 = por %p5678_p12, %p5677_p1 }
  0x69   : > { %p5675_p13 = pneg %p5674_p10 }
  0x6b   : > { %p5680_p3 = pnand %p5679_p2, %p5675_p13 }
  0x6d   : > { %5683 = shalt.err (!%p5680_p3)
}
  0x6e   : > { %s5684_s22 = scalar_lea.vmem %s6356_s27, 2048  ;;  %s6099_s24 = smov [#allocation12]  }
  0x6f   : > { %p5685_p6 = scmp.ne.s32.totalorder %s6356_s27, %s5684_s22  ;;  %s5689_s26 = sshll.u32 %s6099_s24, 4  ;;  %s5690_s26 = int_to_ptr.vmem [resolvable:$false] %s5689_s26 }
  0x70   : > { %s5691_s16 = scalar_lea.vmem %s5690_s26, 4096  ;;  %p5692_p4 = scmp.lt.s32.totalorder %s6356_s27, %s5690_s26 }
  0x71   : > { %p5687_p7 = pnand %p5685_p6, %p6322_p5  ;;  %p5693_p9 = scmp.lt.s32.totalorder %s5691_s16, %s5684_s22 }
  0x73   : > { %p5688_p11 = pneg %p5687_p7  ;;  %p5694_p8 = por %p5693_p9, %p5692_p4 }
  0x75   : > { %p5695_p10 = pnand %p5694_p8, %p5688_p11 }
  0x77   : > { %5698 = shalt.err (!%p5695_p10)
}
  0x78   : > { %5352 = dma.hbm_to_vmem [thread:$0]  (!%p6285_p0), %s6353_s20, 2048, %s6356_s27, %s7688_s14, %s7689_s4, %s7689_s4, %s7691_s3  }
  0x79   : > { %s7744_s9 = sld [smem:[#allocation66_spill]]  ;;  %s699_s6 = scalar_lea.vmem [#allocation15], %s6303_s19 }
  0x7a   : > { %s706_s22 = sshll.u32 %s699_s6, 4  ;;  %s6392_s24 = sshll.u32 %s6093_s21, 4  ;;  %s6394_s22 = int_to_ptr.vmem [resolvable:$true] %s706_s22 }
  0x7f   : > { %s6388_s30 = scalar_lea.hbm %s7744_s9, %s6306_s18  ;;  %s5704_s1 = scalar_lea.hbm %s7744_s9, 8192 }
  0x80   : > { %s5699_s16 = scalar_lea.hbm %s6388_s30, 2048  ;;  %p5705_p2 = scmp.lt.s32.totalorder %s6388_s30, %s7744_s9 }
  0x81   : > { %p5700_p13 = scmp.ne.s32.totalorder %s6388_s30, %s5699_s16  ;;  %p5706_p3 = scmp.lt.s32.totalorder %s5704_s1, %s5699_s16 }
  0x83   : > { %p5702_p1 = pnand %p5700_p13, %p6322_p5  ;;  %p5707_p6 = por %p5706_p3, %p5705_p2 }
  0x85   : > { %p5703_p12 = pneg %p5702_p1 }
  0x87   : > { %p5708_p7 = pnand %p5707_p6, %p5703_p12 }
  0x89   : > { %5711 = shalt.err (!%p5708_p7)
}
  0x8a   : > { %s5712_s6 = scalar_lea.vmem %s6394_s22, 2048  ;;  %s6100_s26 = smov [#allocation15]  }
  0x8b   : > { %p5713_p11 = scmp.ne.s32.totalorder %s6394_s22, %s5712_s6  ;;  %s5717_s20 = sshll.u32 %s6100_s26, 4  ;;  %s5718_s20 = int_to_ptr.vmem [resolvable:$false] %s5717_s20 }
  0x8c   : > { %s5719_s27 = scalar_lea.vmem %s5718_s20, 4096  ;;  %p5720_p8 = scmp.lt.s32.totalorder %s6394_s22, %s5718_s20 }
  0x8d   : > { %p5715_p4 = pnand %p5713_p11, %p6322_p5  ;;  %p5721_p10 = scmp.lt.s32.totalorder %s5719_s27, %s5712_s6 }
  0x8f   : > { %p5716_p9 = pneg %p5715_p4  ;;  %p5722_p13 = por %p5721_p10, %p5720_p8 }
  0x91   : > { %p5723_p1 = pnand %p5722_p13, %p5716_p9 }
  0x93   : > { %5726 = shalt.err (!%p5723_p1)
}
  0x94   : > { %s7745_s14 = scalar_lea.sflag [#allocation16], %s6290_s23  ;;  %s7746_s11 = sld [smem:[#allocation68_spill]] }
  0x95   : > { %5358 = dma.hbm_to_vmem [thread:$0]  (!%p6285_p0), %s6388_s30, 2048, %s6394_s22, %s7745_s14, %s7689_s4, %s7689_s4, %s7691_s3  }
  0x96   : > { %s736_s25 = scalar_lea.vmem [#allocation18], %s6275_s29  ;;  %s4710_s20 = sshll.u32 %s6275_s29, 9 }
  0x97   : > { %s743_s6 = sshll.u32 %s736_s25, 4  ;;  %s7693_s27 = scalar_lea.sflag [#allocation19], %s6290_s23  ;;  %s744_s6 = int_to_ptr.vmem [resolvable:$true] %s743_s6 }
  0x9a   : > { %s6426_s1 = scalar_lea.hbm %s7746_s11, %s6392_s24  ;;  %s5732_s22 = scalar_lea.hbm %s7746_s11, 64 }
  0x9b   : > { %s5727_s7 = scalar_lea.hbm %s6426_s1, 16  ;;  %p5733_p6 = scmp.lt.s32.totalorder %s6426_s1, %s7746_s11 }
  0x9c   : > { %p5728_p12 = scmp.ne.s32.totalorder %s6426_s1, %s5727_s7  ;;  %p5734_p7 = scmp.lt.s32.totalorder %s5732_s22, %s5727_s7 }
  0x9e   : > { %p5730_p2 = pnand %p5728_p12, %p6322_p5  ;;  %p5735_p11 = por %p5734_p7, %p5733_p6 }
  0xa0   : > { %p5731_p3 = pneg %p5730_p2 }
  0xa2   : > { %p5736_p4 = pnand %p5735_p11, %p5731_p3 }
  0xa4   : > { %5739 = shalt.err (!%p5736_p4)
}
  0xa5   : > { %s5740_s16 = scalar_lea.vmem %s744_s6, 16  ;;  %s6101_s25 = smov [#allocation18]  }
  0xa6   : > { %p5741_p9 = scmp.ne.s32.totalorder %s744_s6, %s5740_s16  ;;  %s5745_s4 = sshll.u32 %s6101_s25, 4  ;;  %s5746_s4 = int_to_ptr.vmem [resolvable:$false] %s5745_s4 }
  0xa7   : > { %s5747_s3 = scalar_lea.vmem %s5746_s4, 32  ;;  %p5748_p13 = scmp.lt.s32.totalorder %s744_s6, %s5746_s4 }
  0xa8   : > { %p5743_p8 = pnand %p5741_p9, %p6322_p5  ;;  %p5749_p1 = scmp.lt.s32.totalorder %s5747_s3, %s5740_s16 }
  0xaa   : > { %p5744_p10 = pneg %p5743_p8  ;;  %p5750_p12 = por %p5749_p1, %p5748_p13 }
  0xac   : > { %p5751_p2 = pnand %p5750_p12, %p5744_p10 }
  0xae   : > { %5754 = shalt.err (!%p5751_p2)
}
  0xaf   : > { %5364 = dma.hbm_to_vmem [thread:$0]  (!%p6285_p0), %s6426_s1, 16, %s744_s6, %s7693_s27  }
  0xb0   : > { %s4797_s7 = sshll.u32 %s6093_s21, 13  ;;  %s7747_s13 = sld [smem:[#allocation69_spill]] }
  0xb1   : > { %s771_s3 = scalar_lea.vmem [#allocation21], %s4710_s20  ;;  %s768_s14 = scalar_lea.sflag [#allocation22], %s6290_s23 }
  0xb2   : > { %s778_s22 = sshll.u32 %s771_s3, 4  ;;  %s6459_s22 = int_to_ptr.vmem [resolvable:$true] %s778_s22 }
  0xb6   : > { %s6455_s4 = scalar_lea.hbm %s7747_s13, %s4797_s7  ;;  %s5760_s16 = scalar_lea.hbm %s7747_s13, 32768 }
  0xb7   : > { %s5755_s26 = scalar_lea.hbm %s6455_s4, 8192  ;;  %p5761_p11 = scmp.lt.s32.totalorder %s6455_s4, %s7747_s13 }
  0xb8   : > { %p5756_p3 = scmp.ne.s32.totalorder %s6455_s4, %s5755_s26  ;;  %p5762_p4 = scmp.lt.s32.totalorder %s5760_s16, %s5755_s26 }
  0xba   : > { %p5758_p6 = pnand %p5756_p3, %p6322_p5  ;;  %p5763_p9 = por %p5762_p4, %p5761_p11 }
  0xbc   : > { %p5759_p7 = pneg %p5758_p6 }
  0xbe   : > { %p5764_p8 = pnand %p5763_p9, %p5759_p7 }
  0xc0   : > { %5767 = shalt.err (!%p5764_p8)
}
  0xc1   : > { %s5768_s30 = scalar_lea.vmem %s6459_s22, 8192  ;;  %s6102_s3 = smov [#allocation21]  }
  0xc2   : > { %p5769_p10 = scmp.ne.s32.totalorder %s6459_s22, %s5768_s30  ;;  %s5773_s1 = sshll.u32 %s6102_s3, 4  ;;  %s5774_s1 = int_to_ptr.vmem [resolvable:$false] %s5773_s1 }
  0xc3   : > { %s5775_s6 = scalar_lea.vmem %s5774_s1, 16384  ;;  %p5776_p12 = scmp.lt.s32.totalorder %s6459_s22, %s5774_s1 }
  0xc4   : > { %p5771_p13 = pnand %p5769_p10, %p6322_p5  ;;  %p5777_p2 = scmp.lt.s32.totalorder %s5775_s6, %s5768_s30 }
  0xc6   : > { %p5772_p1 = pneg %p5771_p13  ;;  %p5778_p3 = por %p5777_p2, %p5776_p12 }
  0xc8   : > { %p5779_p6 = pnand %p5778_p3, %p5772_p1 }
  0xca   : > { %5782 = shalt.err (!%p5779_p6)
}
  0xcb   : > { %s6103_s26 = smov 512   ;;  %s6104_s16 = smov 32  }
  0xcc   : > { %5370 = dma.hbm_to_vmem [thread:$0]  (!%p6285_p0), %s6455_s4, 8192, %s6459_s22, %s768_s14, %s6103_s26, %s6103_s26, %s6104_s16  }
  0xcd   : > { %s6489_s30 = scalar_lea.hbm %s7665_s15, %s4797_s7  ;;  %s799_s3 = scalar_lea.vmem [#allocation23], %s4710_s20 }
  0xce   : > { %s806_s1 = sshll.u32 %s799_s3, 4  ;;  %s6105_s6 = smov [#allocation3]   ;;  %s6493_s1 = int_to_ptr.vmem [resolvable:$true] %s806_s1 }
  0xcf   : > { %s567_s27 = sshll.u32 %s6105_s6, 4  ;;  %s6106_s11 = smov [#allocation8]   ;;  %s568_s27 = int_to_ptr.vmem [resolvable:$true] %s567_s27 }
  0xd0   : > { %s592_s13 = sshll.u32 %s6106_s11, 4  ;;  %s5794_s17 = scalar_lea.vmem %s568_s27, 512  ;;  %s593_s13 = int_to_ptr.vmem [resolvable:$true] %s592_s13 }
  0xd1   : > { %p5795_p7 = scmp.ne.s32.totalorder %s568_s27, %s5794_s17  ;;  %p7748_p11 = scmp.ne.s32.totalorder %s7737_s0, 0 }
  0xd2   : > { %p5802_p10 = scmp.lt.s32.totalorder %s568_s27, %s568_s27  ;;  %p5803_p13 = scmp.lt.s32.totalorder %s5794_s17, %s5794_s17 }
  0xd3   : > { %p7749_p4 = pneg %p7748_p11 }
  0xd4   : > { %p5804_p1 = por %p5803_p13, %p5802_p10 }
  0xd5   : > { %p5797_p9 = pnand %p5795_p7, %p7749_p4 }
  0xd7   : > { %p5798_p8 = pneg %p5797_p9 }
  0xd9   : > { %p5805_p12 = pnand %p5804_p1, %p5798_p8 }
  0xdb   : > { %5808 = shalt.err (!%p5805_p12)
}
  0xdc   : > { %s7750_s21 = smov 8   ;;  %s7751_s20 = smov 128  }
  0xdd   : > { %s7752_s22 = sld [smem:[#allocation57_spill]]  ;;  %s5820_s11 = scalar_lea.vmem %s593_s13, 16 }
  0xde   : > { %p5821_p2 = scmp.ne.s32.totalorder %s593_s13, %s5820_s11  ;;  %p7753_p3 = pmov %p7749_p4 }
  0xdf   : > { %s5827_s17 = scalar_lea.vmem %s593_s13, 32  ;;  %p5828_p4 = scmp.lt.s32.totalorder %s593_s13, %s593_s13 }
  0xe0   : > { %p5823_p6 = pnand %p5821_p2, %p7753_p3  ;;  %p5829_p9 = scmp.lt.s32.totalorder %s5827_s17, %s5820_s11 }
  0xe2   : > { %p5824_p7 = pneg %p5823_p6  ;;  %p5830_p8 = por %p5829_p9, %p5828_p4 }
  0xe3   : > { %5336 = dma.hbm_to_vmem [thread:$0]  (!%p7748_p11), %s7752_s22, 512, %s568_s27, [#allocation4], %s7751_s20, %s7751_s20, %s7750_s21  }
  0xe4   : > { %p5831_p10 = pnand %p5830_p8, %p5824_p7 }
  0xe6   : > { %5834 = shalt.err (!%p5831_p10)
}
  0xe7   : > { %s7754_s25 = sld [smem:[#allocation59_spill]]  ;;  %s634_s6 = scalar_lea.vmem [#allocation11], %s6303_s19 }
  0xe8   : > { %s7755_s5 = sld [smem:[#allocation62_spill]]  ;;  %s641_s7 = sshll.u32 %s634_s6, 4  ;;  %s642_s7 = int_to_ptr.vmem [resolvable:$true] %s641_s7 }
  0xed   : > { %5342 = dma.hbm_to_vmem [thread:$0]  (!%p7748_p11), %s7754_s25, 16, %s593_s13, [#allocation7]  }
  0xee   : > { %s6518_s3 = scalar_lea.hbm %s7755_s5, %s6306_s18  ;;  %s5840_s13 = scalar_lea.hbm %s7755_s5, 8192 }
  0xef   : > { %s5835_s4 = scalar_lea.hbm %s6518_s3, 2048  ;;  %p5841_p11 = scmp.lt.s32.totalorder %s6518_s3, %s7755_s5 }
  0xf0   : > { %p5836_p13 = scmp.ne.s32.totalorder %s6518_s3, %s5835_s4  ;;  %p5842_p2 = scmp.lt.s32.totalorder %s5840_s13, %s5835_s4 }
  0xf2   : > { %p5838_p1 = pnand %p5836_p13, %p6322_p5  ;;  %p5843_p3 = por %p5842_p2, %p5841_p11 }
  0xf4   : > { %p5839_p12 = pneg %p5838_p1 }
  0xf6   : > { %p5844_p6 = pnand %p5843_p3, %p5839_p12 }
  0xf8   : > { %5847 = shalt.err (!%p5844_p6)
}
  0xf9   : > { %s5848_s18 = scalar_lea.vmem %s642_s7, 2048  ;;  %s6107_s19 = smov [#allocation11]  }
  0xfa   : > { %p5849_p7 = scmp.ne.s32.totalorder %s642_s7, %s5848_s18  ;;  %s5853_s26 = sshll.u32 %s6107_s19, 4  ;;  %s5854_s26 = int_to_ptr.vmem [resolvable:$false] %s5853_s26 }
  0xfb   : > { %s5855_s16 = scalar_lea.vmem %s5854_s26, 4096  ;;  %p5856_p8 = scmp.lt.s32.totalorder %s642_s7, %s5854_s26 }
  0xfc   : > { %p5851_p4 = pnand %p5849_p7, %p6322_p5  ;;  %p5857_p10 = scmp.lt.s32.totalorder %s5855_s16, %s5848_s18 }
  0xfe   : > { %p5852_p9 = pneg %p5851_p4  ;;  %p5858_p13 = por %p5857_p10, %p5856_p8 }
 0x100   : > { %p5859_p1 = pnand %p5858_p13, %p5852_p9 }
 0x102   : > { %5862 = shalt.err (!%p5859_p1)
}
 0x103   : > { %s7756_s25 = scalar_lea.sflag [#allocation10], %s6290_s23  ;;  %s7757_s8 = sld [smem:[#allocation65_spill]] }
 0x104   : > { %5349 = dma.hbm_to_vmem [thread:$0]  (!%p6285_p0), %s6518_s3, 2048, %s642_s7, %s7756_s25, %s7751_s20, %s7751_s20, %s7750_s21  }
 0x105   : > { %s681_s4 = scalar_lea.vmem [#allocation14], %s6275_s29 }
 0x106   : > { %s688_s0 = sshll.u32 %s681_s4, 4  ;;  %s689_s0 = int_to_ptr.vmem [resolvable:$true] %s688_s0 }
 0x109   : > { %s686_s6 = scalar_lea.hbm %s7757_s8, %s6392_s24  ;;  %s5868_s17 = scalar_lea.hbm %s7757_s8, 64 }
 0x10a   : > { %s5863_s22 = scalar_lea.hbm %s686_s6, 16  ;;  %p5869_p3 = scmp.lt.s32.totalorder %s686_s6, %s7757_s8 }
 0x10b   : > { %p5864_p12 = scmp.ne.s32.totalorder %s686_s6, %s5863_s22  ;;  %p5870_p6 = scmp.lt.s32.totalorder %s5868_s17, %s5863_s22 }
 0x10d   : > { %p5866_p11 = pnand %p5864_p12, %p6322_p5  ;;  %p5871_p7 = por %p5870_p6, %p5869_p3 }
 0x10f   : > { %p5867_p2 = pneg %p5866_p11 }
 0x111   : > { %p5872_p4 = pnand %p5871_p7, %p5867_p2 }
 0x113   : > { %5875 = shalt.err (!%p5872_p4)
}
 0x114   : > { %s5876_s3 = scalar_lea.vmem %s689_s0, 16  ;;  %s6108_s7 = smov [#allocation14]  }
 0x115   : > { %p5877_p9 = scmp.ne.s32.totalorder %s689_s0, %s5876_s3  ;;  %s5881_s26 = sshll.u32 %s6108_s7, 4  ;;  %s5882_s26 = int_to_ptr.vmem [resolvable:$false] %s5881_s26 }
 0x116   : > { %s5883_s16 = scalar_lea.vmem %s5882_s26, 32  ;;  %p5884_p13 = scmp.lt.s32.totalorder %s689_s0, %s5882_s26 }
 0x117   : > { %p5879_p8 = pnand %p5877_p9, %p6322_p5  ;;  %p5885_p1 = scmp.lt.s32.totalorder %s5883_s16, %s5876_s3 }
 0x119   : > { %p5880_p10 = pneg %p5879_p8  ;;  %p5886_p12 = por %p5885_p1, %p5884_p13 }
 0x11b   : > { %p5887_p11 = pnand %p5886_p12, %p5880_p10 }
 0x11d   : > { %5890 = shalt.err (!%p5887_p11)
}
 0x11e   : > { %s7758_s25 = scalar_lea.sflag [#allocation13], %s6290_s23  ;;  %s7759_s10 = sld [smem:[#allocation67_spill]] }
 0x11f   : > { %5355 = dma.hbm_to_vmem [thread:$0]  (!%p6285_p0), %s686_s6, 16, %s689_s0, %s7758_s25  }
 0x120   : > { %s719_s22 = scalar_lea.vmem [#allocation17], %s6275_s29 }
 0x121   : > { %s726_s13 = sshll.u32 %s719_s22, 4  ;;  %s727_s13 = int_to_ptr.vmem [resolvable:$true] %s726_s13 }
 0x124   : > { %s724_s4 = scalar_lea.hbm %s7759_s10, %s6392_s24  ;;  %s5896_s19 = scalar_lea.hbm %s7759_s10, 64 }
 0x125   : > { %s5891_s11 = scalar_lea.hbm %s724_s4, 16  ;;  %p5897_p7 = scmp.lt.s32.totalorder %s724_s4, %s7759_s10 }
 0x126   : > { %p5892_p2 = scmp.ne.s32.totalorder %s724_s4, %s5891_s11  ;;  %p5898_p4 = scmp.lt.s32.totalorder %s5896_s19, %s5891_s11 }
 0x128   : > { %p5894_p3 = pnand %p5892_p2, %p6322_p5  ;;  %p5899_p9 = por %p5898_p4, %p5897_p7 }
 0x12a   : > { %p5895_p6 = pneg %p5894_p3 }
 0x12c   : > { %p5900_p8 = pnand %p5899_p9, %p5895_p6 }
 0x12e   : > { %5903 = shalt.err (!%p5900_p8)
}
 0x12f   : > { %s5904_s6 = scalar_lea.vmem %s727_s13, 16  ;;  %s6109_s0 = smov [#allocation17]  }
 0x130   : > { %p5905_p10 = scmp.ne.s32.totalorder %s727_s13, %s5904_s6  ;;  %s5909_s26 = sshll.u32 %s6109_s0, 4  ;;  %s5910_s26 = int_to_ptr.vmem [resolvable:$false] %s5909_s26 }
 0x131   : > { %s5911_s16 = scalar_lea.vmem %s5910_s26, 32  ;;  %p5912_p12 = scmp.lt.s32.totalorder %s727_s13, %s5910_s26 }
 0x132   : > { %p5907_p13 = pnand %p5905_p10, %p6322_p5  ;;  %p5913_p11 = scmp.lt.s32.totalorder %s5911_s16, %s5904_s6 }
 0x134   : > { %p5908_p1 = pneg %p5907_p13  ;;  %p5914_p2 = por %p5913_p11, %p5912_p12 }
 0x136   : > { %p5915_p3 = pnand %p5914_p2, %p5908_p1 }
 0x138   : > { %5918 = shalt.err (!%p5915_p3)
}
 0x139   : > { %s7760_s25 = scalar_lea.sflag [#allocation16], %s6290_s23  ;;  %s758_s22 = scalar_lea.hbm %s7662_s12, %s6392_s24 }
 0x13a   : > { %5361 = dma.hbm_to_vmem [thread:$0]  (!%p6285_p0), %s724_s4, 16, %s727_s13, %s7760_s25  }
 0x13b   : > { %s753_s11 = scalar_lea.vmem [#allocation20], %s6275_s29  ;;  %s5919_s18 = scalar_lea.hbm %s758_s22, 16 }
 0x13c   : > { %s760_s17 = sshll.u32 %s753_s11, 4  ;;  %p5920_p6 = scmp.ne.s32.totalorder %s758_s22, %s5919_s18  ;;  %s761_s17 = int_to_ptr.vmem [resolvable:$true] %s760_s17 }
 0x13d   : > { %s5924_s7 = scalar_lea.hbm %s7662_s12, 64  ;;  %p5925_p9 = scmp.lt.s32.totalorder %s758_s22, %s7662_s12 }
 0x13e   : > { %p5922_p7 = pnand %p5920_p6, %p6322_p5  ;;  %p5926_p8 = scmp.lt.s32.totalorder %s5924_s7, %s5919_s18 }
 0x140   : > { %p5923_p4 = pneg %p5922_p7  ;;  %p5927_p10 = por %p5926_p8, %p5925_p9 }
 0x142   : > { %p5928_p13 = pnand %p5927_p10, %p5923_p4 }
 0x144   : > { %5931 = shalt.err (!%p5928_p13)
}
 0x145   : > { %s5932_s4 = scalar_lea.vmem %s761_s17, 16  ;;  %s6110_s13 = smov [#allocation20]  }
 0x146   : > { %p5933_p1 = scmp.ne.s32.totalorder %s761_s17, %s5932_s4  ;;  %s5937_s26 = sshll.u32 %s6110_s13, 4  ;;  %s5938_s26 = int_to_ptr.vmem [resolvable:$false] %s5937_s26 }
 0x147   : > { %s5939_s16 = scalar_lea.vmem %s5938_s26, 32  ;;  %p5940_p2 = scmp.lt.s32.totalorder %s761_s17, %s5938_s26 }
 0x148   : > { %p5935_p12 = pnand %p5933_p1, %p6322_p5  ;;  %p5941_p3 = scmp.lt.s32.totalorder %s5939_s16, %s5932_s4 }
 0x14a   : > { %p5936_p11 = pneg %p5935_p12  ;;  %p5942_p6 = por %p5941_p3, %p5940_p2 }
 0x14c   : > { %p5943_p7 = pnand %p5942_p6, %p5936_p11 }
 0x14e   : > { %5946 = shalt.err (!%p5943_p7)
}
 0x14f   : > { %s7761_s25 = scalar_lea.sflag [#allocation19], %s6290_s23  ;;  %s5947_s27 = scalar_lea.hbm %s6489_s30, 8192 }
 0x150   : > { %5367 = dma.hbm_to_vmem [thread:$0]  (!%p6285_p0), %s758_s22, 16, %s761_s17, %s7761_s25  }
 0x151   : > { %p5948_p4 = scmp.ne.s32.totalorder %s6489_s30, %s5947_s27  ;;  %s5952_s18 = scalar_lea.hbm %s7665_s15, 32768 }
 0x152   : > { %p5953_p10 = scmp.lt.s32.totalorder %s6489_s30, %s7665_s15  ;;  %p5954_p13 = scmp.lt.s32.totalorder %s5952_s18, %s5947_s27 }
 0x153   : > { %p5950_p9 = pnand %p5948_p4, %p6322_p5 }
 0x154   : > { %p5955_p1 = por %p5954_p13, %p5953_p10 }
 0x155   : > { %p5951_p8 = pneg %p5950_p9 }
 0x157   : > { %p5956_p12 = pnand %p5955_p1, %p5951_p8 }
 0x159   : > { %5959 = shalt.err (!%p5956_p12)
}
 0x15a   : > { %s5960_s22 = scalar_lea.vmem %s6493_s1, 8192  ;;  %s6111_s17 = smov [#allocation23]  }
 0x15b   : > { %p5961_p11 = scmp.ne.s32.totalorder %s6493_s1, %s5960_s22  ;;  %s5965_s7 = sshll.u32 %s6111_s17, 4  ;;  %s5966_s7 = int_to_ptr.vmem [resolvable:$false] %s5965_s7 }
 0x15c   : > { %s5967_s6 = scalar_lea.vmem %s5966_s7, 16384  ;;  %p5968_p6 = scmp.lt.s32.totalorder %s6493_s1, %s5966_s7 }
 0x15d   : > { %p5963_p2 = pnand %p5961_p11, %p6322_p5  ;;  %p5969_p7 = scmp.lt.s32.totalorder %s5967_s6, %s5960_s22 }
 0x15f   : > { %p5964_p3 = pneg %p5963_p2  ;;  %p5970_p4 = por %p5969_p7, %p5968_p6 }
 0x161   : > { %p5971_p9 = pnand %p5970_p4, %p5964_p3 }
 0x163   : > { %5974 = shalt.err (!%p5971_p9)
}
 0x164   : > { %5373 = dma.hbm_to_vmem [thread:$0]  (!%p6285_p0), %s6489_s30, 8192, %s6493_s1, %s768_s14, %s7751_s20, %s7751_s20, %s7750_s21  }
 0x165   : > { %s7762_s13 = sld [smem:[#allocation72_spill]]  ;;  %s825_s16 = scalar_lea.vmem [#allocation24], %s6275_s29 }
 0x166   : > { %s832_s25 = sshll.u32 %s825_s16, 4  ;;  %s823_s27 = scalar_lea.sflag [#allocation25], %s6275_s29  ;;  %s833_s25 = int_to_ptr.vmem [resolvable:$true] %s832_s25 }
 0x16b   : > { %s6628_s26 = scalar_lea.hbm %s7762_s13, %s6392_s24  ;;  %s5980_s14 = scalar_lea.hbm %s7762_s13, 64 }
 0x16c   : > { %s5975_s23 = scalar_lea.hbm %s6628_s26, 16  ;;  %p5981_p1 = scmp.lt.s32.totalorder %s6628_s26, %s7762_s13 }
 0x16d   : > { %p5976_p8 = scmp.ne.s32.totalorder %s6628_s26, %s5975_s23  ;;  %p5982_p12 = scmp.lt.s32.totalorder %s5980_s14, %s5975_s23 }
 0x16f   : > { %p5978_p10 = pnand %p5976_p8, %p6322_p5  ;;  %p5983_p11 = por %p5982_p12, %p5981_p1 }
 0x171   : > { %p5979_p13 = pneg %p5978_p10 }
 0x173   : > { %p5984_p2 = pnand %p5983_p11, %p5979_p13 }
 0x175   : > { %5987 = shalt.err (!%p5984_p2)
}
 0x176   : > { %s5988_s24 = scalar_lea.vmem %s833_s25, 16  ;;  %s6112_s29 = smov [#allocation24]  }
 0x177   : > { %p5989_p3 = scmp.ne.s32.totalorder %s833_s25, %s5988_s24  ;;  %s5993_s21 = sshll.u32 %s6112_s29, 4  ;;  %s5994_s21 = int_to_ptr.vmem [resolvable:$false] %s5993_s21 }
 0x178   : > { %s5995_s20 = scalar_lea.vmem %s5994_s21, 32  ;;  %p5996_p4 = scmp.lt.s32.totalorder %s833_s25, %s5994_s21 }
 0x179   : > { %p5991_p6 = pnand %p5989_p3, %p6322_p5  ;;  %p5997_p9 = scmp.lt.s32.totalorder %s5995_s20, %s5988_s24 }
 0x17b   : > { %p5992_p7 = pneg %p5991_p6  ;;  %p5998_p8 = por %p5997_p9, %p5996_p4 }
 0x17d   : > { %p5999_p10 = pnand %p5998_p8, %p5992_p7 }
 0x17f   : > { %6002 = shalt.err (!%p5999_p10)
}
 0x180   : > { %5376 = dma.hbm_to_vmem [thread:$0]  (!%p6285_p0), %s6628_s26, 16, %s833_s25, %s823_s27  }
 0x181   : > { %s7763_s18 = sld [smem:[#allocation42_spill]] }
 0x187   : > { %p7764_p13 = scmp.ne.s32.totalorder %s7763_s18, 0 }
 0x189   : > { %847 = sbr.rel (%p7764_p13) target bundleno = 4790 (0x12b6), region = 96 }
 0x18e   : > { %s7765_s19 = sld [smem:[#allocation38_spill]] }
 0x194   : > { %p7766_p1 = scmp.eq.s32.totalorder %s7765_s19, 0 }
 0x196   : > { %6044 = dma.done.wait (%p7766_p1), [#allocation4], 512   ;;  %p7767_p5 = pmov %p7766_p1 }
 0x197   : > { %p7768_p12 = pmov %p7766_p1 }
 0x198   : > { %6046 = vsyncadd (%p7767_p5), [#allocation4], 4294966784 }
 0x199   : > { %6048 = dma.done.wait (%p7768_p12), [#allocation7], 32   ;;  %p7769_p11 = pmov %p7766_p1 }
 0x19a   : > { %s7770_s28 = sld [smem:[#allocation36_spill]]  ;;  %s861_s3 = sand.u32 1, %s7765_s19  }
 0x19b   : > { %6050 = vsyncadd (%p7769_p11), [#allocation7], 4294967264  ;;  %s7771_s2 = sld [smem:[#allocation41_spill]]  ;;  %s862_s7 = scalar_lea.sflag [#allocation10], %s861_s3 }
 0x1a0   : > { %s6660_s22 = sand.u32 1, %s7770_s28  }
 0x1a1   : > { %s4721_s17 = sshll.u32 %s6660_s22, 7  ;;  %p7772_p0 = scmp.ne.s32.totalorder %s7771_s2, 0 }
 0x1a2   : > { %s6663_s6 = scalar_lea.vmem [#allocation9], %s4721_s17 }
 0x1a3   : > { %6052 = dma.done.wait (%p7772_p0), %s862_s7, 4096  }
 0x1a4   : > { %6054 = vsyncadd (%p7772_p0), %s862_s7, 4294963200  ;;  %s6669_s0 = scalar_lea.vmem [#allocation11], %s4721_s17  ;;  %s880_s4 = scalar_lea.sflag [#allocation13], %s861_s3 }
 0x1a5   : > { %s6671_s26 = scalar_lea.vmem [#allocation12], %s4721_s17 }
 0x1a6   : > { %6056 = dma.done.wait (%p7772_p0), %s880_s4, 2064  }
 0x1a7   : > { %6058 = vsyncadd (%p7772_p0), %s880_s4, 4294965232  ;;  %s897_s25 = scalar_lea.sflag [#allocation16], %s861_s3  ;;  %s6678_s27 = scalar_lea.vmem [#allocation15], %s4721_s17 }
 0x1a8   : > { %6060 = dma.done.wait (%p7772_p0), %s897_s25, 2064  }
 0x1a9   : > { %6062 = vsyncadd (%p7772_p0), %s897_s25, 4294965232  ;;  %s914_s9 = scalar_lea.sflag [#allocation19], %s861_s3 }
 0x1aa   : > { %6064 = dma.done.wait (%p7772_p0), %s914_s9, 32  }
 0x1ab   : > { %6066 = vsyncadd (%p7772_p0), %s914_s9, 4294967264  ;;  %s4725_s14 = sshll.u32 %s6660_s22, 9  ;;  %s930_s1 = scalar_lea.sflag [#allocation22], %s861_s3 }
 0x1ac   : > { %s6692_s24 = scalar_lea.vmem [#allocation21], %s4725_s14 }
 0x1ad   : > { %6068 = dma.done.wait (%p7772_p0), %s930_s1, 16384  }
 0x1ae   : > { %6070 = vsyncadd (%p7772_p0), %s930_s1, 4294950912  ;;  %s6698_s29 = scalar_lea.vmem [#allocation23], %s4725_s14  ;;  %s948_s21 = scalar_lea.sflag [#allocation25], %s6660_s22 }
 0x1af   : > { %6072 = dma.done.wait (%p7772_p0), %s948_s21, 16  }
 0x1b0   : > { %6074 = vsyncadd (%p7772_p0), %s948_s21, 4294967280  ;;  %p1061_p2 = scmp.lt.s32.totalorder %s7765_s19, 3  ;;  %s7773_s17 = sld [smem:[#allocation61_spill]] }
 0x1b1   : > { %s7774_s9 = sld [smem:[#allocation63_spill]]  ;;  %p7778_p3 = scmp.ne.s32.totalorder %s7765_s19, 0 }
 0x1b2   : > { %s6708_s18 = scalar_select %p1061_p2, %s7765_s19, 3 }
 0x1b3   : > { %s7775_s20 = sld [smem:[#allocation71_spill]] }
 0x1b4   : > { %s4727_s2 = sshll.u32 %s6708_s18, 2  ;;  %s7776_s16 = sld [smem:[#allocation70_spill]] }
 0x1b5   : > { %s7777_s8 = sld [smem:[#allocation73_spill]] }
 0x1b6   : > { %s1063_s7 = scalar_lea.vmem %s7773_s17, %s6708_s18 }
 0x1b7   : > { %s1066_s14 = scalar_lea.vmem %s7774_s9, %s6708_s18  ;;  %1080 = sbr.rel (%p7778_p3) target bundleno = 760 (0x2f8), region = 156 }
 0x1b9   : > { %s1073_s30 = scalar_lea.vmem %s7775_s20, %s6708_s18 }
 0x1ba   : > { %s6726_s5 = scalar_lea.vmem %s7776_s16, %s4727_s2 }
 0x1bb   : > { %s1076_s10 = scalar_lea.vmem %s7777_s8, %s6708_s18 }
 0x1bc   : > { %v1081_v0 = vld [vmem:[#allocation3] sm:$0xff]  ;;  %v1083_v1 = vld [vmem:[#allocation3 + $0x10] sm:$0xff]  ;;  %v1082_v2 = vld [vmem:[#allocation3 + $0x8] sm:$0xff]  ;;  %v6113_v20 = vmov 0.0  }
 0x1bd   : > { %1087 = vadd.xlane.f32.xlu0 %v1081_v0  ;;  %1091 = vadd.xlane.f32.xlu1 %v1083_v1  ;;  %v1084_v3 = vld [vmem:[#allocation3 + $0x18] sm:$0xff]  ;;  %1156 = vst [vmem:[#allocation26] sm:$0x3] %v6113_v20  ;;  %v4729_v34 = vld [vmem:[#allocation6] ss:$0 sm:$0xff] }
 0x1be   : > { %v4730_v36 = vld [vmem:[#allocation8] ss:$0 sm:$0xff] }
 0x1c1   : > { %1089 = vadd.xlane.f32.xlu0 %v1082_v2  ;;  %1093 = vadd.xlane.f32.xlu1 %v1084_v3 }
 0x246   : > { %v1088_v4 = vpop.xlane.xlu0 %1087  ;;  %v1092_v5 = vpop.xlane.xlu1 %1091 }
 0x247   : > { %v1096_v6 = vmul.f32 0.0078125, %v1088_v4  ;;  %v1098_v7 = vmul.f32 0.0078125, %v1092_v5 }
 0x249   : > { %v1100_v8 = vsub.f32 %v1081_v0, %v1096_v6  ;;  %v1102_v9 = vsub.f32 %v1083_v1, %v1098_v7 }
 0x24a   : > { %v1090_v10 = vpop.xlane.xlu0 %1089  ;;  %v1094_v11 = vpop.xlane.xlu1 %1093 }
 0x24b   : > { %v1097_v12 = vmul.f32 0.0078125, %v1090_v10  ;;  %v1104_v13 = vmul.f32 %v1100_v8, %v1100_v8  ;;  %v1099_v14 = vmul.f32 0.0078125, %v1094_v11  ;;  %v1106_v17 = vmul.f32 %v1102_v9, %v1102_v9 }
 0x24d   : > { %v1101_v15 = vsub.f32 %v1082_v2, %v1097_v12  ;;  %1108 = vadd.xlane.f32.xlu0 %v1104_v13  ;;  %v1103_v16 = vsub.f32 %v1084_v3, %v1099_v14 }
 0x24f   : > { %v1105_v18 = vmul.f32 %v1101_v15, %v1101_v15  ;;  %v1107_v19 = vmul.f32 %v1103_v16, %v1103_v16 }
 0x251   : > { %1112 = vadd.xlane.f32.xlu0 %v1106_v17  ;;  %1110 = vadd.xlane.f32.xlu1 %v1105_v18 }
 0x255   : > { %1114 = vadd.xlane.f32.xlu1 %v1107_v19 }
 0x2d6   : > { %v1109_v21 = vpop.xlane.xlu0 %1108 }
 0x2d7   : > { %v1116_v22 = vmul.f32 0.0078125, %v1109_v21 }
 0x2d9   : > { %v1120_v23 = vadd.f32 1e-12, %v1116_v22 }
 0x2da   : > { %v1111_v24 = vpop.xlane.xlu1 %1110  ;;  %v1113_v25 = vpop.xlane.xlu0 %1112 }
 0x2db   : > { %5431 = vrsqrt.f32 %v1120_v23  ;;  %v1117_v26 = vmul.f32 0.0078125, %v1111_v24  ;;  %v1118_v27 = vmul.f32 0.0078125, %v1113_v25 }
 0x2dd   : > { %v1121_v28 = vadd.f32 1e-12, %v1117_v26  ;;  %v1122_v29 = vadd.f32 1e-12, %v1118_v27 }
 0x2de   : > { %v1115_v30 = vpop.xlane.xlu1 %1114 }
 0x2df   : > { %5433 = vrsqrt.f32 %v1121_v28  ;;  %v1119_v31 = vmul.f32 0.0078125, %v1115_v30 }
 0x2e0   : > { %5435 = vrsqrt.f32 %v1122_v29 }
 0x2e1   : > { %v1123_v32 = vadd.f32 1e-12, %v1119_v31 }
 0x2e3   : > { %5437 = vrsqrt.f32 %v1123_v32 }
 0x2e8   : > { %v5432_v33 = vpop.eup %5431 }
 0x2e9   : > { %v1128_v35 = vmul.f32 %v5432_v33, %v1100_v8 }
 0x2eb   : > { %v1138_v37 = vmul.f32 %v4729_v34, %v1128_v35 }
 0x2ec   : > { %v5434_v38 = vpop.eup %5433 }
 0x2ed   : > { %v5436_v39 = vpop.eup %5435  ;;  %v1148_v40 = vadd.f32 %v4730_v36, %v1138_v37  ;;  %v1129_v41 = vmul.f32 %v5434_v38, %v1101_v15 }
 0x2ee   : > { %v1130_v42 = vmul.f32 %v5436_v39, %v1102_v9 }
 0x2ef   : > { %1152 = vst [vmem:[#allocation2 + $0x10] sm:$0xff] %v1148_v40  ;;  %v1139_v43 = vmul.f32 %v4729_v34, %v1129_v41 }
 0x2f0   : > { %v5438_v44 = vpop.eup %5437  ;;  %v1140_v45 = vmul.f32 %v4729_v34, %v1130_v42 }
 0x2f1   : > { %v1149_v46 = vadd.f32 %v4730_v36, %v1139_v43  ;;  %v1131_v47 = vmul.f32 %v5438_v44, %v1103_v16 }
 0x2f2   : > { %v1150_v48 = vadd.f32 %v4730_v36, %v1140_v45 }
 0x2f3   : > { %1153 = vst [vmem:[#allocation2] sm:$0xff] %v1149_v46  ;;  %v1141_v49 = vmul.f32 %v4729_v34, %v1131_v47 }
 0x2f4   : > { %1154 = vst [vmem:[#allocation2 + $0x18] sm:$0xff] %v1150_v48 }
 0x2f5   : > { %v1151_v50 = vadd.f32 %v4730_v36, %v1141_v49 }
 0x2f7   : > { %1155 = vst [vmem:[#allocation2 + $0x8] sm:$0xff] %v1151_v50 }
 0x2f8 PF: > { %v1284_v51 = vld [vmem:[%s6669_s0 + $0x78] sm:$0xff]  ;;  %v1283_v52 = vld [vmem:[%s6669_s0 + $0x70] sm:$0xff]  ;;  %v1282_v55 = vld [vmem:[%s6669_s0 + $0x68] sm:$0xff]  ;;  %vm1485_vm0 = vcmask 261120   ;;  %vm1664_vm1 = vcmask 130048   ;;  %s6114_s11 = smov 96  }
 0x2f9   : > { %v1176_v53 = vld [vmem:[%s6663_s6 + $0x78] sm:$0xff]  ;;  %5069 = vmatprep.subr.mxu1 %v1284_v51  ;;  %v1175_v54 = vld [vmem:[%s6663_s6 + $0x70] sm:$0xff]  ;;  %v1174_v56 = vld [vmem:[%s6663_s6 + $0x68] sm:$0xff]  ;;  %s6115_s20 = smov 64   ;;  %s6116_s17 = smov 32   ;;  %vm3139_vm2 = vcmask 523264  }
 0x2fa   : > { %5031 = vmatprep.subr.mxu0 %v1176_v53  ;;  %5070 = vmatpush3.msra.mxu1 %v1284_v51  ;;  %v1281_v57 = vld [vmem:[%s6669_s0 + $0x60] sm:$0xff]  ;;  %v1280_v59 = vld [vmem:[%s6669_s0 + $0x58] sm:$0xff]  ;;  %v1279_v61 = vld [vmem:[%s6669_s0 + $0x50] sm:$0xff]  ;;  %vm3144_vm3 = vcmask 785408  }
 0x2fb   : > { %5032 = vmatpush3.msra.mxu0 %v1176_v53  ;;  %5071 = vmatprep.subr.mxu1 %v1283_v52  ;;  %v1173_v58 = vld [vmem:[%s6663_s6 + $0x60] sm:$0xff]  ;;  %v1172_v60 = vld [vmem:[%s6663_s6 + $0x58] sm:$0xff]  ;;  %v1171_v62 = vld [vmem:[%s6663_s6 + $0x50] sm:$0xff] }
 0x2fc   : > { %5033 = vmatprep.subr.mxu0 %v1175_v54  ;;  %5072 = vmatpush3.msra.mxu1 %v1283_v52  ;;  %v1278_v63 = vld [vmem:[%s6669_s0 + $0x48] sm:$0xff]  ;;  %v1277_v1 = vld [vmem:[%s6669_s0 + $0x40] sm:$0xff]  ;;  %v1276_v3 = vld [vmem:[%s6669_s0 + $0x38] sm:$0xff] }
 0x2fd   : > { %5034 = vmatpush3.msra.mxu0 %v1175_v54  ;;  %5073 = vmatprep.subr.mxu1 %v1282_v55  ;;  %v1170_v0 = vld [vmem:[%s6663_s6 + $0x48] sm:$0xff]  ;;  %v1169_v2 = vld [vmem:[%s6663_s6 + $0x40] sm:$0xff]  ;;  %v1168_v4 = vld [vmem:[%s6663_s6 + $0x38] sm:$0xff] }
 0x2fe   : > { %5035 = vmatprep.subr.mxu0 %v1174_v56  ;;  %5074 = vmatpush3.msra.mxu1 %v1282_v55  ;;  %v1275_v5 = vld [vmem:[%s6669_s0 + $0x30] sm:$0xff]  ;;  %v1274_v7 = vld [vmem:[%s6669_s0 + $0x28] sm:$0xff]  ;;  %v1273_v9 = vld [vmem:[%s6669_s0 + $0x20] sm:$0xff] }
 0x2ff   : > { %5036 = vmatpush3.msra.mxu0 %v1174_v56  ;;  %5075 = vmatprep.subr.mxu1 %v1281_v57  ;;  %v1167_v6 = vld [vmem:[%s6663_s6 + $0x30] sm:$0xff]  ;;  %v1166_v8 = vld [vmem:[%s6663_s6 + $0x28] sm:$0xff]  ;;  %v1165_v10 = vld [vmem:[%s6663_s6 + $0x20] sm:$0xff] }
 0x300   : > { %5037 = vmatprep.subr.mxu0 %v1173_v58  ;;  %5076 = vmatpush3.msra.mxu1 %v1281_v57  ;;  %v1272_v11 = vld [vmem:[%s6669_s0 + $0x18] sm:$0xff]  ;;  %v1271_v13 = vld [vmem:[%s6669_s0 + $0x10] sm:$0xff]  ;;  %v1270_v15 = vld [vmem:[%s6669_s0 + $0x8] sm:$0xff] }
 0x301   : > { %5038 = vmatpush3.msra.mxu0 %v1173_v58  ;;  %5077 = vmatprep.subr.mxu1 %v1280_v59  ;;  %v1164_v12 = vld [vmem:[%s6663_s6 + $0x18] sm:$0xff]  ;;  %v1163_v14 = vld [vmem:[%s6663_s6 + $0x10] sm:$0xff]  ;;  %v1162_v17 = vld [vmem:[%s6663_s6 + $0x8] sm:$0xff] }
 0x302   : > { %5039 = vmatprep.subr.mxu0 %v1172_v60  ;;  %5078 = vmatpush3.msra.mxu1 %v1280_v59  ;;  %v1157_v16 = vld [vmem:[#allocation2 + $0x10] sm:$0xff]  ;;  %v1269_v18 = vld [vmem:[%s6669_s0] sm:$0xff]  ;;  %v6768_v21 = vld [vmem:[#allocation2 + $0x18] sm:$0xff] }
 0x303   : > { %5040 = vmatpush3.msra.mxu0 %v1172_v60  ;;  %5079 = vmatprep.subr.mxu1 %v1279_v61  ;;  %v1161_v19 = vld [vmem:[%s6663_s6] sm:$0xff]  ;;  %v4732_v23 = vld [vmem:[%s1066_s14] ss:$0 sm:$0xff]  ;;  %v1391_v42 = vld [vmem:[%s6671_s26 + $0x70] sm:$0xff] }
 0x304   : > { %5041 = vmatprep.subr.mxu0 %v1171_v62  ;;  %5080 = vmatpush3.msra.mxu1 %v1279_v61  ;;  %v6766_v20 = vld [vmem:[#allocation2] sm:$0xff]  ;;  %v6772_v22 = vld [vmem:[#allocation2 + $0x8] sm:$0xff]  ;;  %v1387_v46 = vld [vmem:[%s6671_s26 + $0x50] sm:$0xff] }
 0x305   : > { %5042 = vmatpush3.msra.mxu0 %v1171_v62  ;;  %5081 = vmatprep.subr.mxu1 %v1278_v63  ;;  %v4731_v28 = vld [vmem:[%s1063_s7] ss:$0 sm:$0xff]  ;;  %v1390_v43 = vld [vmem:[%s6671_s26 + $0x68] sm:$0xff]  ;;  %v1389_v44 = vld [vmem:[%s6671_s26 + $0x60] sm:$0xff]  ;;  %s7784_s7 = scalar_lea.vmem [#allocation20], %s6660_s22 }
 0x306   : > { %5043 = vmatprep.subr.mxu0 %v1170_v0  ;;  %5082 = vmatpush3.msra.mxu1 %v1278_v63  ;;  %v1392_v41 = vld [vmem:[%s6671_s26 + $0x78] sm:$0xff]  ;;  %v1386_v47 = vld [vmem:[%s6671_s26 + $0x48] sm:$0xff]  ;;  %v1385_v48 = vld [vmem:[%s6671_s26 + $0x40] sm:$0xff] }
 0x307   : > { %5044 = vmatpush3.msra.mxu0 %v1170_v0  ;;  %5083 = vmatprep.subr.mxu1 %v1277_v1  ;;  %v1388_v45 = vld [vmem:[%s6671_s26 + $0x58] sm:$0xff]  ;;  %v1383_v50 = vld [vmem:[%s6671_s26 + $0x30] sm:$0xff]  ;;  %v1382_v51 = vld [vmem:[%s6671_s26 + $0x28] sm:$0xff] }
 0x308   : > { %5045 = vmatprep.subr.mxu0 %v1169_v2  ;;  %5084 = vmatpush3.msra.mxu1 %v1277_v1  ;;  %v1384_v49 = vld [vmem:[%s6671_s26 + $0x38] sm:$0xff]  ;;  %v1381_v52 = vld [vmem:[%s6671_s26 + $0x20] sm:$0xff]  ;;  %v1379_v54 = vld [vmem:[%s6671_s26 + $0x10] sm:$0xff] }
 0x309   : > { %5046 = vmatpush3.msra.mxu0 %v1169_v2  ;;  %5085 = vmatprep.subr.mxu1 %v1276_v3  ;;  %v1380_v53 = vld [vmem:[%s6671_s26 + $0x18] sm:$0xff]  ;;  %v1378_v55 = vld [vmem:[%s6671_s26 + $0x8] sm:$0xff]  ;;  %v1377_v56 = vld [vmem:[%s6671_s26] sm:$0xff]  ;;  %s7781_s26 = scalar_lea.vmem [#allocation14], %s6660_s22 }
 0x30a   : > { %5047 = vmatprep.subr.mxu0 %v1168_v4  ;;  %5086 = vmatpush3.msra.mxu1 %v1276_v3 }
 0x30b   : > { %5048 = vmatpush3.msra.mxu0 %v1168_v4  ;;  %5087 = vmatprep.subr.mxu1 %v1275_v5 }
 0x30c   : > { %5049 = vmatprep.subr.mxu0 %v1167_v6  ;;  %5088 = vmatpush3.msra.mxu1 %v1275_v5 }
 0x30d   : > { %5050 = vmatpush3.msra.mxu0 %v1167_v6  ;;  %5089 = vmatprep.subr.mxu1 %v1274_v7 }
 0x30e   : > { %5051 = vmatprep.subr.mxu0 %v1166_v8  ;;  %5090 = vmatpush3.msra.mxu1 %v1274_v7 }
 0x30f   : > { %5052 = vmatpush3.msra.mxu0 %v1166_v8  ;;  %5091 = vmatprep.subr.mxu1 %v1273_v9 }
 0x310   : > { %5053 = vmatprep.subr.mxu0 %v1165_v10  ;;  %5092 = vmatpush3.msra.mxu1 %v1273_v9 }
 0x311   : > { %5054 = vmatpush3.msra.mxu0 %v1165_v10  ;;  %5093 = vmatprep.subr.mxu1 %v1272_v11 }
 0x312   : > { %5055 = vmatprep.subr.mxu0 %v1164_v12  ;;  %5094 = vmatpush3.msra.mxu1 %v1272_v11 }
 0x313   : > { %5056 = vmatpush3.msra.mxu0 %v1164_v12  ;;  %5095 = vmatprep.subr.mxu1 %v1271_v13 }
 0x314   : > { %5057 = vmatprep.subr.mxu0 %v1163_v14  ;;  %5096 = vmatpush3.msra.mxu1 %v1271_v13 }
 0x315   : > { %5058 = vmatpush3.msra.mxu0 %v1163_v14  ;;  %5097 = vmatprep.subr.mxu1 %v1270_v15 }
 0x316   : > { %5101 = vmatprep.mubr.f32.mxu1 %v1157_v16  ;;  %5098 = vmatpush3.msra.mxu1 %v1270_v15 }
 0x317   : > { %5059 = vmatprep.subr.mxu0 %v1162_v17  ;;  %5099 = vmatprep.subr.mxu1 %v1269_v18 }
 0x318   : > { %5060 = vmatpush3.msra.mxu0 %v1162_v17  ;;  %5100 = vmatpush3.msra.mxu1 %v1269_v18 }
 0x319   : > { %5061 = vmatprep.subr.mxu0 %v1161_v19  ;;  %5102 = vmatmul.mubr.f32.vlgmr.msra.gmra.mxu1 %v6766_v20 }
 0x31a   : > { %5062 = vmatpush3.msra.mxu0 %v1161_v19  ;;  %5063 = vmatprep.mubr.f32.mxu0 %v1157_v16 }
 0x31b   : > { %5104 = vmatprep.mubr.f32.mxu1 %v6768_v21  ;;  %5064 = vmatmul.mubr.f32.vlgmr.msra.gmra.mxu0 %v6766_v20 }
 0x31c   : > { %5066 = vmatprep.mubr.f32.mxu0 %v6768_v21  ;;  %5107 = vmatprep.subr.mxu0 %v1392_v41 }
 0x31d   : > { %5105 = vmatmul.mubr.f32.gmra.mxu1 %v6772_v22  ;;  %5108 = vmatpush3.msra.mxu0 %v1392_v41 }
 0x31e   : > { %5109 = vmatprep.subr.mxu0 %v1391_v42 }
 0x31f   : > { %5067 = vmatmul.mubr.f32.gmra.mxu0 %v6772_v22 }
 0x320   : > { %5139 = vmatprep.mubr.f32.mxu0 %v1157_v16  ;;  %5110 = vmatpush3.msra.mxu0 %v1391_v42 }
 0x321   : > { %5111 = vmatprep.subr.mxu0 %v1390_v43 }
 0x322   : > { %5112 = vmatpush3.msra.mxu0 %v1390_v43 }
 0x323   : > { %5113 = vmatprep.subr.mxu0 %v1389_v44 }
 0x324   : > { %5114 = vmatpush3.msra.mxu0 %v1389_v44 }
 0x325   : > { %5115 = vmatprep.subr.mxu0 %v1388_v45 }
 0x326   : > { %5116 = vmatpush3.msra.mxu0 %v1388_v45 }
 0x327   : > { %5117 = vmatprep.subr.mxu0 %v1387_v46 }
 0x328   : > { %5118 = vmatpush3.msra.mxu0 %v1387_v46 }
 0x329   : > { %5119 = vmatprep.subr.mxu0 %v1386_v47 }
 0x32a   : > { %5120 = vmatpush3.msra.mxu0 %v1386_v47 }
 0x32b   : > { %5121 = vmatprep.subr.mxu0 %v1385_v48 }
 0x32c   : > { %5122 = vmatpush3.msra.mxu0 %v1385_v48 }
 0x32d   : > { %5123 = vmatprep.subr.mxu0 %v1384_v49 }
 0x32e   : > { %5124 = vmatpush3.msra.mxu0 %v1384_v49 }
 0x32f   : > { %5125 = vmatprep.subr.mxu0 %v1383_v50 }
 0x330   : > { %5126 = vmatpush3.msra.mxu0 %v1383_v50 }
 0x331   : > { %5127 = vmatprep.subr.mxu0 %v1382_v51 }
 0x332   : > { %5128 = vmatpush3.msra.mxu0 %v1382_v51 }
 0x333   : > { %5129 = vmatprep.subr.mxu0 %v1381_v52 }
 0x334   : > { %5130 = vmatpush3.msra.mxu0 %v1381_v52 }
 0x335   : > { %5131 = vmatprep.subr.mxu0 %v1380_v53 }
 0x336   : > { %5132 = vmatpush3.msra.mxu0 %v1380_v53 }
 0x337   : > { %5133 = vmatprep.subr.mxu0 %v1379_v54 }
 0x338   : > { %5134 = vmatpush3.msra.mxu0 %v1379_v54 }
 0x339   : > { %5135 = vmatprep.subr.mxu0 %v1378_v55 }
 0x33a   : > { %5136 = vmatpush3.msra.mxu0 %v1378_v55 }
 0x33b   : > { %5137 = vmatprep.subr.mxu0 %v1377_v56 }
 0x33c   : > { %5138 = vmatpush3.msra.mxu0 %v1377_v56 }
 0x33d   : > { %5140 = vmatmul.mubr.f32.vlgmr.msra.gmra.mxu0 %v6766_v20 }
 0x33e   : > { %5142 = vmatprep.mubr.f32.mxu0 %v6768_v21 }
 0x341   : > { %5143 = vmatmul.mubr.f32.gmra.mxu0 %v6772_v22 }
 0x3d9   : > { %v5103_v24 = vpop.f32.mrf.mxu1 }
 0x3da   : > { %v6783_v25 = vadd.f32 %v5103_v24, %v4732_v23 }
 0x3db   : > { %v1358_v26 = vpop.f32.mrf.mxu1  ;;  %v5065_v27 = vpop.f32.mrf.mxu0 }
 0x3dc   : > { %v6790_v29 = vadd.f32 %v4732_v23, %v1358_v26  ;;  %5145 = vmatprep.subr.msk.mxu1 %vm1485_vm0, %v6783_v25  ;;  %v6806_v37 = vadd.f32 %v5065_v27, %v4731_v28  ;;  %v4733_v27 = vld [vmem:[%s7781_s26] ss:$0 sm:$0xff] }
 0x3dd   : > { %5146 = vmatpush3.xpose.msk.msra.mxu1 %vm1485_vm0, %v6783_v25  ;;  %v1250_v30 = vpop.f32.mrf.mxu0  ;;  %v5106_v31 = vpop.f32.mrf.mxu1 }
 0x3de   : > { %5147 = vmatprep.subr.msk.mxu1 %vm1485_vm0, %v6790_v29  ;;  %v6798_v32 = vadd.f32 %v4731_v28, %v1250_v30  ;;  %v6800_v33 = vadd.f32 %v5106_v31, %v4732_v23 }
 0x3df   : > { %v5068_v34 = vpop.f32.mrf.mxu0  ;;  %v1368_v35 = vpop.f32.mrf.mxu1 }
 0x3e0   : > { %5149 = vmatprep.mubr.msk.f32.mxu1 %vm1485_vm0, %v6798_v32  ;;  %v6812_v39 = vadd.f32 %v4732_v23, %v1368_v35  ;;  %v6824_v40 = vadd.f32 %v5068_v34, %v4731_v28 }
 0x3e1   : > { %5148 = vmatpush3.xpose.msk.msra.mxu1 %vm1485_vm0, %v6790_v29  ;;  %v1260_v36 = vpop.f32.mrf.mxu0 }
 0x3e2   : > { %5152 = vmatprep.subr.msk.mxu1 %vm1485_vm0, %v6800_v33  ;;  %v6810_v38 = vadd.f32 %v4731_v28, %v1260_v36 }
 0x3e4   : > { %5150 = vmatmul.mubr.msk.f32.vlgmr.msra.gmra.mxu1 %vm1485_vm0, %v6806_v37 }
 0x3e5   : > { %5153 = vmatpush3.xpose.msk.msra.mxu1 %vm1485_vm0, %v6800_v33  ;;  %5156 = vmatprep.mubr.msk.f32.mxu1 %vm1485_vm0, %v6810_v38 }
 0x3e6   : > { %5154 = vmatprep.subr.msk.mxu1 %vm1485_vm0, %v6812_v39 }
 0x3e9   : > { %5155 = vmatpush3.xpose.msk.msra.mxu1 %vm1485_vm0, %v6812_v39 }
 0x3ec   : > { %5157 = vmatmul.mubr.msk.f32.vlgmr.msra.gmra.mxu1 %vm1485_vm0, %v6824_v40 }
 0x3fd   : > { %v5141_v26 = vpop.f32.mrf.mxu0 }
 0x3fe   : > { %v6857_v28 = vadd.f32 %v5141_v26, %v4733_v27 }
 0x3ff   : > { %v1466_v30 = vpop.f32.mrf.mxu0 }
 0x400   : > { %v6859_v31 = vadd.f32 %v4733_v27, %v1466_v30  ;;  %5159 = vmatprep.subr.mxu1 %v6857_v28 }
 0x401   : > { %v5144_v34 = vpop.f32.mrf.mxu0  ;;  %5160 = vmatpush3.msra.mxu1 %v6857_v28 }
 0x402   : > { %v6863_v35 = vadd.f32 %v5144_v34, %v4733_v27  ;;  %5161 = vmatprep.subr.mxu1 %v6859_v31 }
 0x403   : > { %5162 = vmatpush3.msra.mxu1 %v6859_v31  ;;  %v1476_v46 = vpop.f32.mrf.mxu0 }
 0x404   : > { %5166 = vmatprep.subr.mxu1 %v6863_v35  ;;  %v6885_v48 = vadd.f32 %v4733_v27, %v1476_v46 }
 0x4a4   : > { %v5151_v57 = vpop.f32.mrf.mxu1 }
 0x4a5   : > { %v1661_v60 = vmul.f32 0.17677669, %v5151_v57 }
 0x4a6   : > { %v1564_v58 = vpop.f32.mrf.mxu1 }
 0x4a7   : > { %v1660_v59 = vmul.f32 0.17677669, %v1564_v58  ;;  %v1668_v63 = vsel %vm1664_vm1, %v1661_v60, -inf }
 0x4a9   : > { %v1665_v61 = vsel %vm1664_vm1, %v1660_v59, -inf }
 0x4aa   : > { %1666 = vmax.xlane.f32.xlu0 %v1665_v61 }
 0x4ac   : > { %v5158_v62 = vpop.f32.mrf.mxu1 }
 0x4ad   : > { %v1663_v2 = vmul.f32 0.17677669, %v5158_v62 }
 0x4ae   : > { %1669 = vmax.xlane.f32.xlu0 %v1668_v63  ;;  %v1651_v0 = vpop.f32.mrf.mxu1 }
 0x4af   : > { %v1662_v1 = vmul.f32 0.17677669, %v1651_v0  ;;  %v1674_v4 = vsel %vm1664_vm1, %v1663_v2, -inf }
 0x4b1   : > { %v1671_v3 = vsel %vm1664_vm1, %v1662_v1, -inf }
 0x4b2   : > { %1672 = vmax.xlane.f32.xlu1 %v1671_v3 }
 0x4b6   : > { %1675 = vmax.xlane.f32.xlu1 %v1674_v4 }
 0x533   : > { %v1667_v5 = vpop.xlane.xlu0 %1666 }
 0x534   : > { %v1677_v6 = vsub.f32 %v1660_v59, %v1667_v5 }
 0x536   : > { %v1681_v7 = vmul.f32 1.442695, %v1677_v6 }
 0x537   : > { %v1670_v8 = vpop.xlane.xlu0 %1669 }
 0x538   : > { %5469 = vpow2.f32 %v1681_v7  ;;  %v1678_v9 = vsub.f32 %v1661_v60, %v1670_v8 }
 0x53a   : > { %v1683_v10 = vmul.f32 1.442695, %v1678_v9 }
 0x53b   : > { %v1673_v11 = vpop.xlane.xlu1 %1672 }
 0x53c   : > { %5471 = vpow2.f32 %v1683_v10  ;;  %v1679_v12 = vsub.f32 %v1662_v1, %v1673_v11 }
 0x53e   : > { %v1685_v13 = vmul.f32 1.442695, %v1679_v12 }
 0x53f   : > { %v1676_v14 = vpop.xlane.xlu1 %1675 }
 0x540   : > { %5473 = vpow2.f32 %v1685_v13  ;;  %v1680_v15 = vsub.f32 %v1663_v2, %v1676_v14 }
 0x542   : > { %v1687_v16 = vmul.f32 1.442695, %v1680_v15 }
 0x544   : > { %5475 = vpow2.f32 %v1687_v16 }
 0x545   : > { %v5470_v17 = vpop.eup %5469 }
 0x546   : > { %v1689_v18 = vsel %vm1664_vm1, %v5470_v17, 0.0 }
 0x547   : > { %1690 = vadd.xlane.f32.xlu0 %v1689_v18 }
 0x549   : > { %v5472_v19 = vpop.eup %5471 }
 0x54a   : > { %v1692_v20 = vsel %vm1664_vm1, %v5472_v19, 0.0 }
 0x54b   : > { %1693 = vadd.xlane.f32.xlu1 %v1692_v20 }
 0x54d   : > { %v5474_v21 = vpop.eup %5473 }
 0x54e   : > { %v1695_v22 = vsel %vm1664_vm1, %v5474_v21, 0.0 }
 0x54f   : > { %1696 = vadd.xlane.f32.xlu0 %v1695_v22 }
 0x551   : > { %v5476_v23 = vpop.eup %5475 }
 0x552   : > { %v1698_v24 = vsel %vm1664_vm1, %v5476_v23, 0.0 }
 0x553   : > { %1699 = vadd.xlane.f32.xlu1 %v1698_v24 }
 0x564   : > { %1875 = vrot.lane.b32.xlu1 %v6790_v29, %s6114_s11 }
 0x565   : > { %1877 = vrot.lane.b32.xlu0 %v6783_v25, %s6114_s11 }
 0x568   : > { %1871 = vrot.lane.b32.xlu1 %v6798_v32, %s6114_s11 }
 0x569   : > { %1873 = vrot.lane.b32.xlu0 %v6806_v37, %s6114_s11 }
 0x56c   : > { %1968 = vrot.lane.b32.xlu1 %v6800_v33, %s6114_s11 }
 0x56d   : > { %1962 = vrot.lane.b32.xlu0 %v6810_v38, %s6114_s11 }
 0x570   : > { %1966 = vrot.lane.b32.xlu1 %v6812_v39, %s6114_s11 }
 0x574   : > { %1964 = vrot.lane.b32.xlu1 %v6824_v40, %s6114_s11 }
 0x5d0   : > { %v1691_v36 = vpop.xlane.xlu0 %1690 }
 0x5d1   : > { %5477 = vrcp.f32 %v1691_v36 }
 0x5d4   : > { %v1694_v41 = vpop.xlane.xlu1 %1693 }
 0x5d5   : > { %5479 = vrcp.f32 %v1694_v41 }
 0x5d8   : > { %v1697_v42 = vpop.xlane.xlu0 %1696 }
 0x5d9   : > { %5481 = vrcp.f32 %v1697_v42 }
 0x5dc   : > { %v1700_v43 = vpop.xlane.xlu1 %1699  ;;  %v1878_v53 = vpop.permute.xlu0 %1877 }
 0x5dd   : > { %5483 = vrcp.f32 %v1700_v43 }
 0x5de   : > { %v5478_v44 = vpop.eup %5477 }
 0x5df   : > { %v1702_v45 = vmul.f32 %v5478_v44, %v5470_v17 }
 0x5e0   : > { %v1876_v50 = vpop.permute.xlu1 %1875  ;;  %v1874_v57 = vpop.permute.xlu0 %1873 }
 0x5e1   : > { %5163 = vmatprep.mubr.msk.f32.mxu1 %vm1664_vm1, %v1702_v45 }
 0x5e2   : > { %v5480_v47 = vpop.eup %5479 }
 0x5e3   : > { %v1704_v49 = vmul.f32 %v5480_v47, %v5472_v19 }
 0x5e4   : > { %v1872_v55 = vpop.permute.xlu1 %1871  ;;  %v1963_v59 = vpop.permute.xlu0 %1962 }
 0x5e5   : > { %5164 = vmatmul.mubr.msk.f32.vlgmr.msra.gmra.mxu1 %vm1664_vm1, %v1704_v49 }
 0x5e6   : > { %v5482_v51 = vpop.eup %5481  ;;  %5167 = vmatpush3.msra.mxu1 %v6863_v35 }
 0x5e7   : > { %5168 = vmatprep.subr.mxu1 %v6885_v48  ;;  %v1706_v52 = vmul.f32 %v5482_v51, %v5474_v21 }
 0x5e8   : > { %5169 = vmatpush3.msra.mxu1 %v6885_v48  ;;  %v1969_v58 = vpop.permute.xlu1 %1968 }
 0x5e9   : > { %5173 = vmatprep.subr.msk.mxu1 %vm1485_vm0, %v1878_v53  ;;  %5170 = vmatprep.mubr.msk.f32.mxu1 %vm1664_vm1, %v1706_v52 }
 0x5ea   : > { %v5484_v54 = vpop.eup %5483 }
 0x5eb   : > { %v1708_v56 = vmul.f32 %v5484_v54, %v5476_v23 }
 0x5ec   : > { %v1967_v60 = vpop.permute.xlu1 %1966 }
 0x5ed   : > { %5171 = vmatmul.mubr.msk.f32.vlgmr.msra.gmra.mxu1 %vm1664_vm1, %v1708_v56 }
 0x5ee   : > { %5174 = vmatpush3.xpose.msk.msra.mxu1 %vm1485_vm0, %v1878_v53  ;;  %5177 = vmatprep.mubr.msk.f32.mxu1 %vm1485_vm0, %v1872_v55 }
 0x5ef   : > { %5175 = vmatprep.subr.msk.mxu1 %vm1485_vm0, %v1876_v50 }
 0x5f0   : > { %v1965_v61 = vpop.permute.xlu1 %1964 }
 0x5f2   : > { %5176 = vmatpush3.xpose.msk.msra.mxu1 %vm1485_vm0, %v1876_v50 }
 0x5f3   : > { %5180 = vmatprep.subr.msk.mxu1 %vm1485_vm0, %v1969_v58 }
 0x5f5   : > { %5178 = vmatmul.mubr.msk.f32.vlgmr.msra.gmra.mxu1 %vm1485_vm0, %v1874_v57 }
 0x5f6   : > { %5181 = vmatpush3.xpose.msk.msra.mxu1 %vm1485_vm0, %v1969_v58  ;;  %5184 = vmatprep.mubr.msk.f32.mxu1 %vm1485_vm0, %v1963_v59 }
 0x5f7   : > { %5182 = vmatprep.subr.msk.mxu1 %vm1485_vm0, %v1967_v60 }
 0x5fa   : > { %5183 = vmatpush3.xpose.msk.msra.mxu1 %vm1485_vm0, %v1967_v60 }
 0x5fd   : > { %5185 = vmatmul.mubr.msk.f32.vlgmr.msra.gmra.mxu1 %vm1485_vm0, %v1965_v61 }
 0x6a5   : > { %v6905_v62 = vpop.f32.mrf.mxu1 }
 0x6a7   : > { %v6907_v63 = vpop.f32.mrf.mxu1 }
 0x6ad   : > { %v6909_v0 = vpop.f32.mrf.mxu1 }
 0x6af   : > { %v6911_v1 = vpop.f32.mrf.mxu1 }
 0x6b5   : > { %v5179_v2 = vpop.f32.mrf.mxu1 }
 0x6b6   : > { %v2054_v3 = vmul.f32 0.17677669, %v5179_v2 }
 0x6b7   : > { %v1953_v4 = vpop.f32.mrf.mxu1 }
 0x6b8   : > { %v2053_v5 = vmul.f32 0.17677669, %v1953_v4  ;;  %v2060_v6 = vsel %vm1664_vm1, %v2054_v3, -inf }
 0x6b9   : > { %2061 = vmax.xlane.f32.xlu1 %v2060_v6 }
 0x6ba   : > { %v2057_v7 = vsel %vm1664_vm1, %v2053_v5, -inf }
 0x6bb   : > { %2058 = vmax.xlane.f32.xlu0 %v2057_v7 }
 0x6bd   : > { %v5186_v8 = vpop.f32.mrf.mxu1 }
 0x6be   : > { %v2056_v11 = vmul.f32 0.17677669, %v5186_v8 }
 0x6bf   : > { %v2044_v9 = vpop.f32.mrf.mxu1 }
 0x6c0   : > { %v2055_v10 = vmul.f32 0.17677669, %v2044_v9  ;;  %v2066_v13 = vsel %vm1664_vm1, %v2056_v11, -inf }
 0x6c2   : > { %v2063_v12 = vsel %vm1664_vm1, %v2055_v10, -inf }
 0x6c3   : > { %2064 = vmax.xlane.f32.xlu0 %v2063_v12 }
 0x6c7   : > { %2067 = vmax.xlane.f32.xlu0 %v2066_v13 }
 0x6ca   : > { %2103 = vrot.lane.b32.xlu1 %v6859_v31, %s6114_s11 }
 0x6ce   : > { %2194 = vrot.lane.b32.xlu1 %v6863_v35, %s6114_s11 }
 0x6d2   : > { %2192 = vrot.lane.b32.xlu1 %v6885_v48, %s6114_s11 }
 0x6dd   : > { %2105 = vrot.lane.b32.xlu0 %v6857_v28, %s6114_s11 }
 0x742   : > { %v2062_v14 = vpop.xlane.xlu1 %2061 }
 0x743   : > { %v2070_v15 = vsub.f32 %v2054_v3, %v2062_v14 }
 0x744   : > { %v2059_v16 = vpop.xlane.xlu0 %2058 }
 0x745   : > { %v2075_v17 = vmul.f32 1.442695, %v2070_v15  ;;  %v2069_v18 = vsub.f32 %v2053_v5, %v2059_v16 }
 0x746   : > { %v2104_v26 = vpop.permute.xlu1 %2103 }
 0x747   : > { %5485 = vpow2.f32 %v2075_v17  ;;  %v2073_v19 = vmul.f32 1.442695, %v2069_v18 }
 0x749   : > { %5487 = vpow2.f32 %v2073_v19 }
 0x74a   : > { %v2195_v43 = vpop.permute.xlu1 %2194 }
 0x74c   : > { %v2065_v20 = vpop.xlane.xlu0 %2064 }
 0x74d   : > { %v2071_v21 = vsub.f32 %v2055_v10, %v2065_v20 }
 0x74e   : > { %v2193_v49 = vpop.permute.xlu1 %2192 }
 0x74f   : > { %v2077_v22 = vmul.f32 1.442695, %v2071_v21 }
 0x750   : > { %v2068_v23 = vpop.xlane.xlu0 %2067 }
 0x751   : > { %5489 = vpow2.f32 %v2077_v22  ;;  %v2072_v24 = vsub.f32 %v2056_v11, %v2068_v23 }
 0x753   : > { %v2079_v27 = vmul.f32 1.442695, %v2072_v24 }
 0x754   : > { %v5486_v30 = vpop.eup %5485  ;;  %v2106_v34 = vpop.permute.xlu0 %2105 }
 0x755   : > { %5491 = vpow2.f32 %v2079_v27  ;;  %5187 = vmatprep.subr.mxu1 %v2106_v34  ;;  %v2084_v36 = vsel %vm1664_vm1, %v5486_v30, 0.0 }
 0x756   : > { %v5488_v41 = vpop.eup %5487  ;;  %5188 = vmatpush3.msra.mxu1 %v2106_v34  ;;  %2085 = vadd.xlane.f32.xlu1 %v2084_v36 }
 0x757   : > { %5189 = vmatprep.subr.mxu1 %v2104_v26  ;;  %v2081_v42 = vsel %vm1664_vm1, %v5488_v41, 0.0 }
 0x758   : > { %2082 = vadd.xlane.f32.xlu0 %v2081_v42  ;;  %5190 = vmatpush3.msra.mxu1 %v2104_v26 }
 0x759   : > { %5194 = vmatprep.subr.mxu1 %v2195_v43 }
 0x75e   : > { %v5490_v44 = vpop.eup %5489 }
 0x75f   : > { %v2087_v45 = vsel %vm1664_vm1, %v5490_v44, 0.0 }
 0x760   : > { %2088 = vadd.xlane.f32.xlu0 %v2087_v45 }
 0x762   : > { %v5492_v46 = vpop.eup %5491 }
 0x763   : > { %v2090_v47 = vsel %vm1664_vm1, %v5492_v46, 0.0 }
 0x764   : > { %2091 = vadd.xlane.f32.xlu1 %v2090_v47 }
 0x775   : > { %2374 = vrot.lane.b32.xlu1 %v6812_v39, %s6115_s20 }
 0x776   : > { %2376 = vrot.lane.b32.xlu0 %v6800_v33, %s6115_s20 }
 0x779   : > { %2372 = vrot.lane.b32.xlu1 %v6824_v40, %s6115_s20 }
 0x77a   : > { %2370 = vrot.lane.b32.xlu0 %v6810_v38, %s6115_s20 }
 0x7df   : > { %v2086_v50 = vpop.xlane.xlu1 %2085 }
 0x7e0   : > { %5493 = vrcp.f32 %v2086_v50 }
 0x7e1   : > { %v2083_v51 = vpop.xlane.xlu0 %2082 }
 0x7e2   : > { %5495 = vrcp.f32 %v2083_v51 }
 0x7e9   : > { %v2089_v52 = vpop.xlane.xlu0 %2088 }
 0x7ea   : > { %5497 = vrcp.f32 %v2089_v52 }
 0x7ed   : > { %v2092_v53 = vpop.xlane.xlu1 %2091  ;;  %v5494_v54 = vpop.eup %5493 }
 0x7ee   : > { %5499 = vrcp.f32 %v2092_v53  ;;  %v2096_v57 = vmul.f32 %v5494_v54, %v5486_v30  ;;  %v2377_v58 = vpop.permute.xlu0 %2376 }
 0x7ef   : > { %v5496_v55 = vpop.eup %5495 }
 0x7f0   : > { %v2094_v56 = vmul.f32 %v5496_v55, %v5488_v41 }
 0x7f1   : > { %v2375_v4 = vpop.permute.xlu1 %2374 }
 0x7f2   : > { %5191 = vmatprep.mubr.msk.f32.mxu1 %vm1664_vm1, %v2094_v56  ;;  %v2371_v3 = vpop.permute.xlu0 %2370 }
 0x7f3   : > { %5192 = vmatmul.mubr.msk.f32.vlgmr.msra.gmra.mxu1 %vm1664_vm1, %v2096_v57 }
 0x7f4   : > { %5195 = vmatpush3.msra.mxu1 %v2195_v43 }
 0x7f5   : > { %5196 = vmatprep.subr.mxu1 %v2193_v49  ;;  %v2373_v5 = vpop.permute.xlu1 %2372 }
 0x7f6   : > { %5197 = vmatpush3.msra.mxu1 %v2193_v49 }
 0x7f7   : > { %v5498_v59 = vpop.eup %5497  ;;  %5208 = vmatprep.subr.msk.mxu1 %vm1485_vm0, %v2377_v58 }
 0x7f8   : > { %v2098_v60 = vmul.f32 %v5498_v59, %v5490_v44 }
 0x7fa   : > { %5198 = vmatprep.mubr.msk.f32.mxu1 %vm1664_vm1, %v2098_v60 }
 0x7fb   : > { %v5500_v61 = vpop.eup %5499 }
 0x7fc   : > { %v2100_v2 = vmul.f32 %v5500_v61, %v5492_v46 }
 0x7fe   : > { %5199 = vmatmul.mubr.msk.f32.vlgmr.msra.gmra.mxu1 %vm1664_vm1, %v2100_v2 }
 0x7ff   : > { %5209 = vmatpush3.xpose.msk.msra.mxu1 %vm1485_vm0, %v2377_v58  ;;  %5212 = vmatprep.mubr.msk.f32.mxu1 %vm1485_vm0, %v2371_v3 }
 0x800   : > { %5210 = vmatprep.subr.msk.mxu1 %vm1485_vm0, %v2375_v4 }
 0x803   : > { %5211 = vmatpush3.xpose.msk.msra.mxu1 %vm1485_vm0, %v2375_v4 }
 0x806   : > { %5213 = vmatmul.mubr.msk.f32.vlgmr.msra.gmra.mxu1 %vm1485_vm0, %v2373_v5 }
 0x8b3   : > { %v6947_v6 = vpop.f32.mrf.mxu1 }
 0x8b5   : > { %v6949_v7 = vpop.f32.mrf.mxu1 }
 0x8b6   : > { %v5439_v8 = vpack.i.bf16 %v6947_v6, %v6949_v7 }
 0x8be   : > { %v6953_v9 = vpop.f32.mrf.mxu1 }
 0x8c0   : > { %v6955_v10 = vpop.f32.mrf.mxu1 }
 0x8c1   : > { %v5454_v11 = vpack.i.bf16 %v6953_v9, %v6955_v10  ;;  %v3152_v9 = vld [vmem:[%s6678_s27 + $0x18] sm:$0xff]  ;;  %v3151_v10 = vld [vmem:[%s6678_s27 + $0x10] sm:$0xff] }
 0x8c6   : > { %v5214_v12 = vpop.f32.mrf.mxu1 }
 0x8c7   : > { %v2464_v13 = vmul.f32 0.17677669, %v5214_v12 }
 0x8c8   : > { %v2452_v14 = vpop.f32.mrf.mxu1 }
 0x8c9   : > { %v2463_v15 = vmul.f32 0.17677669, %v2452_v14  ;;  %v2474_v16 = vsel %vm1664_vm1, %v2464_v13, -inf }
 0x8ca   : > { %2475 = vmax.xlane.f32.xlu1 %v2474_v16 }
 0x8cb   : > { %v2471_v17 = vsel %vm1664_vm1, %v2463_v15, -inf }
 0x8cc   : > { %2472 = vmax.xlane.f32.xlu0 %v2471_v17 }
 0x8db   : > { %2598 = vrot.lane.b32.xlu1 %v6863_v35, %s6115_s20 }
 0x8df   : > { %2596 = vrot.lane.b32.xlu1 %v6885_v48, %s6115_s20 }
 0x8e2   : > { %2285 = vrot.lane.b32.xlu0 %v6783_v25, %s6115_s20 }
 0x8e3   : > { %2283 = vrot.lane.b32.xlu1 %v6790_v29, %s6115_s20 }
 0x8e6   : > { %2689 = vrot.lane.b32.xlu0 %v6783_v25, %s6116_s17 }
 0x8e7   : > { %2279 = vrot.lane.b32.xlu1 %v6798_v32, %s6115_s20 }
 0x8eb   : > { %2687 = vrot.lane.b32.xlu1 %v6790_v29, %s6116_s17 }
 0x8ef   : > { %2685 = vrot.lane.b32.xlu1 %v6806_v37, %s6116_s17 }
 0x8f3   : > { %2778 = vrot.lane.b32.xlu1 %v6812_v39, %s6116_s17 }
 0x8f7   : > { %2776 = vrot.lane.b32.xlu1 %v6824_v40, %s6116_s17 }
 0x953   : > { %v2476_v18 = vpop.xlane.xlu1 %2475 }
 0x954   : > { %v2480_v19 = vsub.f32 %v2464_v13, %v2476_v18 }
 0x955   : > { %v2473_v20 = vpop.xlane.xlu0 %2472 }
 0x956   : > { %v2487_v21 = vmul.f32 1.442695, %v2480_v19  ;;  %v2479_v25 = vsub.f32 %v2463_v15, %v2473_v20 }
 0x957   : > { %v2599_v22 = vpop.permute.xlu1 %2598 }
 0x958   : > { %5501 = vpow2.f32 %v2487_v21  ;;  %v2485_v23 = vmul.f32 1.442695, %v2479_v25  ;;  %5222 = vmatprep.subr.mxu1 %v2599_v22 }
 0x959   : > { %5223 = vmatpush3.msra.mxu1 %v2599_v22  ;;  %v2286_v29 = vpop.permute.xlu0 %2285 }
 0x95a   : > { %5503 = vpow2.f32 %v2485_v23  ;;  %5201 = vmatprep.subr.msk.mxu0 %vm1485_vm0, %v2286_v29 }
 0x95b   : > { %v2597_v24 = vpop.permute.xlu1 %2596  ;;  %5202 = vmatpush3.xpose.msk.msra.mxu0 %vm1485_vm0, %v2286_v29 }
 0x95c   : > { %5224 = vmatprep.subr.mxu1 %v2597_v24 }
 0x95d   : > { %5225 = vmatpush3.msra.mxu1 %v2597_v24  ;;  %v2690_v39 = vpop.permute.xlu0 %2689 }
 0x95e   : > { %5229 = vmatprep.subr.msk.mxu1 %vm1485_vm0, %v2690_v39 }
 0x95f   : > { %v2284_v40 = vpop.permute.xlu1 %2283 }
 0x960   : > { %5203 = vmatprep.subr.msk.mxu0 %vm1485_vm0, %v2284_v40 }
 0x961   : > { %5204 = vmatpush3.xpose.msk.msra.mxu0 %vm1485_vm0, %v2284_v40 }
 0x963   : > { %v2280_v26 = vpop.permute.xlu1 %2279 }
 0x964   : > { %5205 = vmatprep.mubr.msk.f32.mxu0 %vm1485_vm0, %v2280_v26 }
 0x965   : > { %v5502_v27 = vpop.eup %5501 }
 0x966   : > { %v2498_v30 = vsel %vm1664_vm1, %v5502_v27, 0.0 }
 0x967   : > { %v5504_v34 = vpop.eup %5503  ;;  %2499 = vadd.xlane.f32.xlu0 %v2498_v30 }
 0x968   : > { %v2495_v36 = vsel %vm1664_vm1, %v5504_v34, 0.0 }
 0x96b   : > { %2496 = vadd.xlane.f32.xlu0 %v2495_v36 }
 0x981   : > { %2281 = vrot.lane.b32.xlu0 %v6806_v37, %s6115_s20  ;;  %v2688_v37 = vpop.permute.xlu1 %2687 }
 0x985   : > { %2683 = vrot.lane.b32.xlu0 %v6798_v32, %s6116_s17 }
 0x989   : > { %2780 = vrot.lane.b32.xlu0 %v6800_v33, %s6116_s17  ;;  %v2686_v33 = vpop.permute.xlu1 %2685 }
 0x98d   : > { %2774 = vrot.lane.b32.xlu0 %v6810_v38, %s6116_s17  ;;  %v2779_v50 = vpop.permute.xlu1 %2778 }
 0x991   : > { %v2777_v51 = vpop.permute.xlu1 %2776 }
 0x9f0   : > { %v2500_v41 = vpop.xlane.xlu0 %2499 }
 0x9f1   : > { %5505 = vrcp.f32 %v2500_v41 }
 0x9f4   : > { %v2497_v42 = vpop.xlane.xlu0 %2496 }
 0x9f5   : > { %5507 = vrcp.f32 %v2497_v42 }
 0x9f8   : > { %v2282_v43 = vpop.permute.xlu0 %2281 }
 0x9f9   : > { %5206 = vmatmul.mubr.msk.f32.vlgmr.msra.gmra.mxu0 %vm1485_vm0, %v2282_v43 }
 0x9fc   : > { %v2684_v46 = vpop.permute.xlu0 %2683 }
 0x9fe   : > { %v5506_v44 = vpop.eup %5505 }
 0x9ff   : > { %v2508_v49 = vmul.f32 %v5506_v44, %v5502_v27 }
 0xa00   : > { %v2781_v32 = vpop.permute.xlu0 %2780 }
 0xa02   : > { %v5508_v45 = vpop.eup %5507 }
 0xa03   : > { %v2506_v47 = vmul.f32 %v5508_v45, %v5504_v34 }
 0xa04   : > { %v2775_v38 = vpop.permute.xlu0 %2774 }
 0xa05   : > { %5226 = vmatprep.mubr.msk.f32.mxu1 %vm1664_vm1, %v2506_v47 }
 0xa06   : > { %5227 = vmatmul.mubr.msk.f32.vlgmr.msra.gmra.mxu1 %vm1664_vm1, %v2508_v49 }
 0xa07   : > { %5230 = vmatpush3.xpose.msk.msra.mxu1 %vm1485_vm0, %v2690_v39  ;;  %5233 = vmatprep.mubr.msk.f32.mxu1 %vm1485_vm0, %v2684_v46 }
 0xa08   : > { %5231 = vmatprep.subr.msk.mxu1 %vm1485_vm0, %v2688_v37 }
 0xa0b   : > { %5232 = vmatpush3.xpose.msk.msra.mxu1 %vm1485_vm0, %v2688_v37 }
 0xa0c   : > { %5236 = vmatprep.subr.msk.mxu1 %vm1485_vm0, %v2781_v32 }
 0xa0e   : > { %5234 = vmatmul.mubr.msk.f32.vlgmr.msra.gmra.mxu1 %vm1485_vm0, %v2686_v33 }
 0xa0f   : > { %5237 = vmatpush3.xpose.msk.msra.mxu1 %vm1485_vm0, %v2781_v32  ;;  %5240 = vmatprep.mubr.msk.f32.mxu1 %vm1485_vm0, %v2775_v38 }
 0xa10   : > { %5238 = vmatprep.subr.msk.mxu1 %vm1485_vm0, %v2779_v50 }
 0xa13   : > { %5239 = vmatpush3.xpose.msk.msra.mxu1 %vm1485_vm0, %v2779_v50 }
 0xa16   : > { %5241 = vmatmul.mubr.msk.f32.vlgmr.msra.gmra.mxu1 %vm1485_vm0, %v2777_v51 }
 0xab9   : > { %v5207_v52 = vpop.f32.mrf.mxu0 }
 0xaba   : > { %v2462_v53 = vmul.f32 0.17677669, %v5207_v52 }
 0xabb   : > { %v2361_v54 = vpop.f32.mrf.mxu0 }
 0xabc   : > { %v2461_v55 = vmul.f32 0.17677669, %v2361_v54  ;;  %v2468_v56 = vsel %vm1664_vm1, %v2462_v53, -inf }
 0xabd   : > { %2469 = vmax.xlane.f32.xlu1 %v2468_v56 }
 0xabe   : > { %v2465_v57 = vsel %vm1664_vm1, %v2461_v55, -inf }
 0xabf   : > { %2466 = vmax.xlane.f32.xlu0 %v2465_v57 }
 0xac6   : > { %v7013_v58 = vpop.f32.mrf.mxu1 }
 0xac8   : > { %v7015_v59 = vpop.f32.mrf.mxu1 }
 0xac9   : > { %v5459_v60 = vpack.i.bf16 %v7013_v58, %v7015_v59 }
 0xace   : > { %v5235_v61 = vpop.f32.mrf.mxu1 }
 0xacf   : > { %v2866_v4 = vmul.f32 0.17677669, %v5235_v61 }
 0xad0   : > { %v2765_v2 = vpop.f32.mrf.mxu1 }
 0xad1   : > { %v2865_v3 = vmul.f32 0.17677669, %v2765_v2  ;;  %v2872_v14 = vsel %vm1664_vm1, %v2866_v4, -inf }
 0xad3   : > { %v2869_v5 = vsel %vm1664_vm1, %v2865_v3, -inf }
 0xad4   : > { %2870 = vmax.xlane.f32.xlu0 %v2869_v5 }
 0xad6   : > { %v5242_v12 = vpop.f32.mrf.mxu1 }
 0xad7   : > { %v2868_v13 = vmul.f32 0.17677669, %v5242_v12 }
 0xad8   : > { %2873 = vmax.xlane.f32.xlu0 %v2872_v14  ;;  %v2856_v15 = vpop.f32.mrf.mxu1 }
 0xad9   : > { %v2867_v16 = vmul.f32 0.17677669, %v2856_v15  ;;  %v2878_v17 = vsel %vm1664_vm1, %v2868_v13, -inf }
 0xada   : > { %2879 = vmax.xlane.f32.xlu1 %v2878_v17 }
 0xadb   : > { %v2875_v18 = vsel %vm1664_vm1, %v2867_v16, -inf }
 0xadc   : > { %2876 = vmax.xlane.f32.xlu0 %v2875_v18 }
 0xb46   : > { %v2470_v19 = vpop.xlane.xlu1 %2469 }
 0xb47   : > { %v2478_v20 = vsub.f32 %v2462_v53, %v2470_v19  ;;  %v3164_v19 = vld [vmem:[%s6678_s27 + $0x78] sm:$0xff] }
 0xb48   : > { %v2467_v21 = vpop.xlane.xlu0 %2466 }
 0xb49   : > { %v2483_v25 = vmul.f32 1.442695, %v2478_v20  ;;  %v2477_v22 = vsub.f32 %v2461_v55, %v2467_v21  ;;  %v3163_v20 = vld [vmem:[%s6678_s27 + $0x70] sm:$0xff]  ;;  %v3162_v21 = vld [vmem:[%s6678_s27 + $0x68] sm:$0xff] }
 0xb4b   : > { %5509 = vpow2.f32 %v2483_v25  ;;  %v2481_v23 = vmul.f32 1.442695, %v2477_v22  ;;  %v3161_v22 = vld [vmem:[%s6678_s27 + $0x60] sm:$0xff] }
 0xb4d   : > { %5511 = vpow2.f32 %v2481_v23 }
 0xb58   : > { %v5510_v29 = vpop.eup %5509 }
 0xb59   : > { %v2492_v24 = vsel %vm1664_vm1, %v5510_v29, 0.0 }
 0xb5a   : > { %v5512_v39 = vpop.eup %5511  ;;  %2493 = vadd.xlane.f32.xlu1 %v2492_v24 }
 0xb5b   : > { %v2489_v40 = vsel %vm1664_vm1, %v5512_v39, 0.0 }
 0xb5c   : > { %2490 = vadd.xlane.f32.xlu0 %v2489_v40  ;;  %v3158_v40 = vld [vmem:[%s6678_s27 + $0x48] sm:$0xff] }
 0xb5d   : > { %v2871_v26 = vpop.xlane.xlu0 %2870 }
 0xb5e   : > { %v2881_v30 = vsub.f32 %v2865_v3, %v2871_v26  ;;  %v3157_v26 = vld [vmem:[%s6678_s27 + $0x40] sm:$0xff] }
 0xb60   : > { %v2885_v36 = vmul.f32 1.442695, %v2881_v30  ;;  %v3155_v30 = vld [vmem:[%s6678_s27 + $0x30] sm:$0xff] }
 0xb61   : > { %v2874_v27 = vpop.xlane.xlu0 %2873 }
 0xb62   : > { %v2882_v42 = vsub.f32 %v2866_v4, %v2874_v27  ;;  %5513 = vpow2.f32 %v2885_v36  ;;  %v3156_v27 = vld [vmem:[%s6678_s27 + $0x38] sm:$0xff]  ;;  %v3153_v36 = vld [vmem:[%s6678_s27 + $0x20] sm:$0xff] }
 0xb63   : > { %v2880_v43 = vpop.xlane.xlu1 %2879 }
 0xb64   : > { %v2887_v45 = vmul.f32 1.442695, %v2882_v42  ;;  %v2884_v46 = vsub.f32 %v2868_v13, %v2880_v43 }
 0xb65   : > { %v2877_v34 = vpop.xlane.xlu0 %2876 }
 0xb66   : > { %v2883_v41 = vsub.f32 %v2867_v16, %v2877_v34  ;;  %v2891_v37 = vmul.f32 1.442695, %v2884_v46  ;;  %v3154_v34 = vld [vmem:[%s6678_s27 + $0x28] sm:$0xff] }
 0xb68   : > { %v2889_v44 = vmul.f32 1.442695, %v2883_v41  ;;  %v3149_v41 = vld [vmem:[%s6678_s27] sm:$0xff] }
 0xb6a   : > { %5515 = vpow2.f32 %v2889_v44 }
 0xb6b   : > { %2509 = vrot.lane.b32.xlu1 %v6859_v31, %s6115_s20  ;;  %5517 = vpow2.f32 %v2887_v45 }
 0xb6c   : > { %5519 = vpow2.f32 %v2891_v37 }
 0xb6f   : > { %2915 = vrot.lane.b32.xlu1 %v6857_v28, %s6116_s17  ;;  %v5514_v47 = vpop.eup %5513 }
 0xb72   : > { %2511 = vrot.lane.b32.xlu0 %v6857_v28, %s6115_s20  ;;  %v2893_v28 = vsel %vm1664_vm1, %v5514_v47, 0.0 }
 0xb73   : > { %2913 = vrot.lane.b32.xlu1 %v6859_v31, %s6116_s17 }
 0xb77   : > { %v5516_v49 = vpop.eup %5515 }
 0xb78   : > { %v5518_v31 = vpop.eup %5517  ;;  %v2899_v32 = vsel %vm1664_vm1, %v5516_v49, 0.0 }
 0xb79   : > { %v2896_v33 = vsel %vm1664_vm1, %v5518_v31, 0.0  ;;  %v5520_v38 = vpop.eup %5519 }
 0xb7a   : > { %v2902_v50 = vsel %vm1664_vm1, %v5520_v38, 0.0 }
 0xb91   : > { %2894 = vadd.xlane.f32.xlu0 %v2893_v28 }
 0xb95   : > { %2900 = vadd.xlane.f32.xlu0 %v2899_v32 }
 0xb97   : > { %2897 = vadd.xlane.f32.xlu1 %v2896_v33 }
 0xb9b   : > { %2903 = vadd.xlane.f32.xlu1 %v2902_v50 }
 0xbab   : > { %3002 = vrot.lane.b32.xlu0 %v6863_v35, %s6116_s17 }
 0xbac   : > { %3000 = vrot.lane.b32.xlu1 %v6885_v48, %s6116_s17 }
 0xbaf   : > { %5440 = vrot.lane.b32.xlu0 %v5439_v8, %s6116_s17 }
 0xbe3   : > { %v2494_v51 = vpop.xlane.xlu1 %2493 }
 0xbe4   : > { %5521 = vrcp.f32 %v2494_v51 }
 0xbe5   : > { %v2491_v52 = vpop.xlane.xlu0 %2490 }
 0xbe6   : > { %5523 = vrcp.f32 %v2491_v52 }
 0xbe7   : > { %v2510_v53 = vpop.permute.xlu1 %2509 }
 0xbe9   : > { %v2512_v54 = vpop.permute.xlu0 %2511 }
 0xbea   : > { %5215 = vmatprep.subr.mxu0 %v2512_v54 }
 0xbeb   : > { %5216 = vmatpush3.msra.mxu0 %v2512_v54  ;;  %v2916_v55 = vpop.permute.xlu1 %2915 }
 0xbec   : > { %5217 = vmatprep.subr.mxu0 %v2510_v53 }
 0xbed   : > { %5218 = vmatpush3.msra.mxu0 %v2510_v53 }
 0xbee   : > { %5243 = vmatprep.subr.mxu0 %v2916_v55 }
 0xbef   : > { %v2914_v6 = vpop.permute.xlu1 %2913 }
 0xbf1   : > { %v5522_v35 = vpop.eup %5521 }
 0xbf2   : > { %v2504_v57 = vmul.f32 %v5522_v35, %v5510_v29  ;;  %v3160_v29 = vld [vmem:[%s6678_s27 + $0x58] sm:$0xff] }
 0xbf3   : > { %v5524_v56 = vpop.eup %5523 }
 0xbf4   : > { %v2502_v48 = vmul.f32 %v5524_v56, %v5512_v39  ;;  %v3159_v39 = vld [vmem:[%s6678_s27 + $0x50] sm:$0xff] }
 0xbf6   : > { %5219 = vmatprep.mubr.msk.f32.mxu0 %vm1664_vm1, %v2502_v48 }
 0xbf7   : > { %5220 = vmatmul.mubr.msk.f32.vlgmr.msra.gmra.mxu0 %vm1664_vm1, %v2504_v57 }
 0xbf8   : > { %5244 = vmatpush3.msra.mxu0 %v2916_v55 }
 0xbf9   : > { %5245 = vmatprep.subr.mxu0 %v2914_v6 }
 0xbfa   : > { %5246 = vmatpush3.msra.mxu0 %v2914_v6 }
 0xbfb   : > { %5257 = vmatprep.subr.mxu0 %v3164_v19 }
 0xc1a   : > { %v2895_v7 = vpop.xlane.xlu0 %2894 }
 0xc1b   : > { %5525 = vrcp.f32 %v2895_v7 }
 0xc1e   : > { %v2901_v8 = vpop.xlane.xlu0 %2900 }
 0xc1f   : > { %5527 = vrcp.f32 %v2901_v8 }
 0xc20   : > { %v2898_v61 = vpop.xlane.xlu1 %2897 }
 0xc21   : > { %5529 = vrcp.f32 %v2898_v61 }
 0xc22   : > { %v3003_v2 = vpop.permute.xlu0 %3002 }
 0xc23   : > { %5250 = vmatprep.subr.mxu1 %v3003_v2 }
 0xc24   : > { %v2904_v3 = vpop.xlane.xlu1 %2903  ;;  %5251 = vmatpush3.msra.mxu1 %v3003_v2 }
 0xc25   : > { %5531 = vrcp.f32 %v2904_v3 }
 0xc26   : > { %v5441_v28 = vpop.permute.xlu0 %5440 }
 0xc28   : > { %v5526_v4 = vpop.eup %5525  ;;  %v3001_v5 = vpop.permute.xlu1 %3000 }
 0xc29   : > { %5252 = vmatprep.subr.mxu1 %v3001_v5  ;;  %v2906_v12 = vmul.f32 %v5526_v4, %v5514_v47 }
 0xc2a   : > { %5253 = vmatpush3.msra.mxu1 %v3001_v5 }
 0xc2b   : > { %5247 = vmatprep.mubr.msk.f32.mxu0 %vm1664_vm1, %v2906_v12 }
 0xc2c   : > { %v5528_v13 = vpop.eup %5527 }
 0xc2d   : > { %v2910_v14 = vmul.f32 %v5528_v13, %v5516_v49  ;;  %v5443_v49 = vunpack.i.h.bf16 %v5441_v28 }
 0xc2e   : > { %v5530_v15 = vpop.eup %5529 }
 0xc2f   : > { %5254 = vmatprep.mubr.msk.f32.mxu1 %vm1664_vm1, %v2910_v14  ;;  %v2908_v16 = vmul.f32 %v5530_v15, %v5518_v31  ;;  %v5442_v31 = vunpack.i.l.bf16 %v5441_v28  ;;  %v3136_v51 = vsel %vm1485_vm0, %v6905_v62, %v5443_v49 }
 0xc31   : > { %5248 = vmatmul.mubr.msk.f32.vlgmr.msra.gmra.mxu0 %vm1664_vm1, %v2908_v16  ;;  %v3135_v58 = vsel %vm1485_vm0, %v6907_v63, %v5442_v31 }
 0xc32   : > { %v5532_v17 = vpop.eup %5531  ;;  %5258 = vmatpush3.msra.mxu0 %v3164_v19 }
 0xc33   : > { %v2912_v18 = vmul.f32 %v5532_v17, %v5520_v38  ;;  %5259 = vmatprep.subr.mxu0 %v3163_v20 }
 0xc34   : > { %5260 = vmatpush3.msra.mxu0 %v3163_v20 }
 0xc35   : > { %5255 = vmatmul.mubr.msk.f32.vlgmr.msra.gmra.mxu1 %vm1664_vm1, %v2912_v18  ;;  %5261 = vmatprep.subr.mxu0 %v3162_v21  ;;  %v5614_v18 = vld [vmem:[#allocation2 + $0x10] sm:$0xff] }
 0xc36   : > { %5262 = vmatpush3.msra.mxu0 %v3162_v21 }
 0xc37   : > { %5263 = vmatprep.subr.mxu0 %v3161_v22 }
 0xc38   : > { %5264 = vmatpush3.msra.mxu0 %v3161_v22  ;;  %v5615_v22 = vld [vmem:[#allocation2 + $0x18] sm:$0xff] }
 0xc39   : > { %5265 = vmatprep.subr.mxu0 %v3160_v29 }
 0xc3a   : > { %5266 = vmatpush3.msra.mxu0 %v3160_v29  ;;  %v5616_v29 = vld [vmem:[#allocation2 + $0x8] sm:$0xff] }
 0xc3b   : > { %5267 = vmatprep.subr.mxu0 %v3159_v39 }
 0xc3c   : > { %5268 = vmatpush3.msra.mxu0 %v3159_v39  ;;  %v3389_v39 = vld [vmem:[%s6692_s24 + $0x1e8] sm:$0xff] }
 0xc3d   : > { %5269 = vmatprep.subr.mxu0 %v3158_v40  ;;  %3414 = vmatprep.subr.mxu1 %v3389_v39  ;;  %v3341_v39 = vld [vmem:[%s6692_s24 + $0x68] sm:$0xff] }
 0xc3e   : > { %5270 = vmatpush3.msra.mxu0 %v3158_v40  ;;  %v3391_v40 = vld [vmem:[%s6692_s24 + $0x1f8] sm:$0xff] }
 0xc3f   : > { %5271 = vmatprep.subr.mxu0 %v3157_v26 }
 0xc40   : > { %5272 = vmatpush3.msra.mxu0 %v3157_v26  ;;  %v3388_v26 = vld [vmem:[%s6692_s24 + $0x1e0] sm:$0xff] }
 0xc41   : > { %5273 = vmatprep.subr.mxu0 %v3156_v27  ;;  %3415 = vmatpush1.msra.mxu1 %v3388_v26  ;;  %v3340_v26 = vld [vmem:[%s6692_s24 + $0x60] sm:$0xff] }
 0xc42   : > { %5274 = vmatpush3.msra.mxu0 %v3156_v27  ;;  %v3390_v27 = vld [vmem:[%s6692_s24 + $0x1f0] sm:$0xff] }
 0xc43   : > { %5275 = vmatprep.subr.mxu0 %v3155_v30 }
 0xc44   : > { %5276 = vmatpush3.msra.mxu0 %v3155_v30  ;;  %v3385_v30 = vld [vmem:[%s6692_s24 + $0x1c8] sm:$0xff] }
 0xc45   : > { %5277 = vmatprep.subr.mxu0 %v3154_v34  ;;  %3416 = vmatprep.subr.mxu1 %v3385_v30  ;;  %v3337_v30 = vld [vmem:[%s6692_s24 + $0x48] sm:$0xff] }
 0xc46   : > { %5278 = vmatpush3.msra.mxu0 %v3154_v34  ;;  %v3387_v34 = vld [vmem:[%s6692_s24 + $0x1d8] sm:$0xff] }
 0xc47   : > { %5279 = vmatprep.subr.mxu0 %v3153_v36 }
 0xc48   : > { %5280 = vmatpush3.msra.mxu0 %v3153_v36  ;;  %v3384_v36 = vld [vmem:[%s6692_s24 + $0x1c0] sm:$0xff] }
 0xc49   : > { %5281 = vmatprep.subr.mxu0 %v3152_v9  ;;  %3417 = vmatpush1.msra.mxu1 %v3384_v36  ;;  %v3336_v36 = vld [vmem:[%s6692_s24 + $0x40] sm:$0xff] }
 0xc4a   : > { %5282 = vmatpush3.msra.mxu0 %v3152_v9  ;;  %v3386_v9 = vld [vmem:[%s6692_s24 + $0x1d0] sm:$0xff] }
 0xc4b   : > { %5283 = vmatprep.subr.mxu0 %v3151_v10 }
 0xc4c   : > { %5284 = vmatpush3.msra.mxu0 %v3151_v10  ;;  %v3381_v10 = vld [vmem:[%s6692_s24 + $0x1a8] sm:$0xff] }
 0xc4d   : > { %3418 = vmatprep.subr.mxu1 %v3381_v10  ;;  %v3333_v10 = vld [vmem:[%s6692_s24 + $0x28] sm:$0xff] }
 0xcb7   : > { %v5221_v25 = vpop.f32.mrf.mxu0 }
 0xcb9   : > { %v2587_v23 = vpop.f32.mrf.mxu0 }
 0xcba   : > { %v5444_v24 = vpack.i.bf16 %v5221_v25, %v2587_v23 }
 0xcbc   : > { %5445 = vrot.lane.b32.xlu1 %v5444_v24, %s6115_s20 }
 0xcc0   : > { %5455 = vrot.lane.b32.xlu1 %v5454_v11, %s6116_s17  ;;  %v3150_v11 = vld [vmem:[%s6678_s27 + $0x8] sm:$0xff]  ;;  %s7782_s27 = scalar_lea.vmem [#allocation17], %s6660_s22 }
 0xcc1   : > { %5285 = vmatprep.subr.mxu0 %v3150_v11  ;;  %v4782_v12 = vld [vmem:[%s7782_s27] ss:$0 sm:$0xff] }
 0xcc2   : > { %5286 = vmatpush3.msra.mxu0 %v3150_v11  ;;  %v3383_v11 = vld [vmem:[%s6692_s24 + $0x1b8] sm:$0xff] }
 0xcc3   : > { %5287 = vmatprep.subr.mxu0 %v3149_v41 }
 0xcc4   : > { %5288 = vmatpush3.msra.mxu0 %v3149_v41  ;;  %v3380_v41 = vld [vmem:[%s6692_s24 + $0x1a0] sm:$0xff] }
 0xcc5   : > { %3503 = vmatprep.subr.mxu0 %v3391_v40  ;;  %3419 = vmatpush1.msra.mxu1 %v3380_v41  ;;  %v3343_v40 = vld [vmem:[%s6692_s24 + $0x78] sm:$0xff]  ;;  %v3332_v41 = vld [vmem:[%s6692_s24 + $0x20] sm:$0xff] }
 0xcf1   : > { %v5249_v42 = vpop.f32.mrf.mxu0 }
 0xcf3   : > { %v2991_v43 = vpop.f32.mrf.mxu0 }
 0xcf4   : > { %v5449_v44 = vpack.i.bf16 %v5249_v42, %v2991_v43  ;;  %v3382_v42 = vld [vmem:[%s6692_s24 + $0x1b0] sm:$0xff] }
 0xcf5   : > { %v5256_v45 = vpop.f32.mrf.mxu1 }
 0xcf6   : > { %5450 = vrot.lane.b32.xlu0 %v5449_v44, %s6114_s11 }
 0xcf7   : > { %v3078_v46 = vpop.f32.mrf.mxu1 }
 0xcf8   : > { %v5464_v37 = vpack.i.bf16 %v5256_v45, %v3078_v46 }
 0xcfa   : > { %5460 = vrot.lane.b32.xlu0 %v5459_v60, %s6115_s20  ;;  %5465 = vrot.lane.b32.xlu1 %v5464_v37, %s6114_s11 }
 0xd2e   : > { %v5446_v47 = vpop.permute.xlu1 %5445 }
 0xd2f   : > { %v5448_v32 = vunpack.i.h.bf16 %v5446_v47  ;;  %v5447_v33 = vunpack.i.l.bf16 %v5446_v47 }
 0xd31   : > { %v3140_v54 = vsel %vm3139_vm2, %v3135_v58, %v5447_v33  ;;  %v3141_v55 = vsel %vm3139_vm2, %v3136_v51, %v5448_v32  ;;  %v3377_v58 = vld [vmem:[%s6692_s24 + $0x188] sm:$0xff] }
 0xd32   : > { %v5456_v38 = vpop.permute.xlu1 %5455  ;;  %3420 = vmatprep.subr.mxu1 %v3377_v58 }
 0xd33   : > { %v5458_v59 = vunpack.i.h.bf16 %v5456_v38  ;;  %v5457_v60 = vunpack.i.l.bf16 %v5456_v38 }
 0xd35   : > { %v3137_v63 = vsel %vm1485_vm0, %v6911_v1, %v5457_v60  ;;  %v3138_v61 = vsel %vm1485_vm0, %v6909_v0, %v5458_v59  ;;  %v5613_v1 = vld [vmem:[#allocation2] sm:$0xff]  ;;  %v3376_v60 = vld [vmem:[%s6692_s24 + $0x180] sm:$0xff] }
 0xd36   : > { %v3379_v59 = vld [vmem:[%s6692_s24 + $0x198] sm:$0xff]  ;;  %3421 = vmatpush1.msra.mxu1 %v3376_v60 }
 0xd68   : > { %v5451_v50 = vpop.permute.xlu0 %5450 }
 0xd69   : > { %v5453_v52 = vunpack.i.h.bf16 %v5451_v50  ;;  %v5452_v53 = vunpack.i.l.bf16 %v5451_v50 }
 0xd6b   : > { %v3145_v35 = vsel %vm3144_vm3, %v3140_v54, %v5452_v53  ;;  %v3146_v56 = vsel %vm3144_vm3, %v3141_v55, %v5453_v52  ;;  %v3378_v54 = vld [vmem:[%s6692_s24 + $0x190] sm:$0xff]  ;;  %v3373_v55 = vld [vmem:[%s6692_s24 + $0x168] sm:$0xff] }
 0xd6c   : > { %v5466_v48 = vpop.permute.xlu1 %5465  ;;  %v5461_v57 = vpop.permute.xlu0 %5460  ;;  %5289 = vmatprep.mubr.f32.mxu0 %v3145_v35  ;;  %v3375_v35 = vld [vmem:[%s6692_s24 + $0x178] sm:$0xff]  ;;  %3422 = vmatprep.subr.mxu1 %v3373_v55 }
 0xd6d   : > { %v5468_v62 = vunpack.i.h.bf16 %v5466_v48  ;;  %v5467_v6 = vunpack.i.l.bf16 %v5466_v48  ;;  %v5463_v7 = vunpack.i.h.bf16 %v5461_v57  ;;  %v5462_v8 = vunpack.i.l.bf16 %v5461_v57  ;;  %5290 = vmatmul.mubr.f32.vlgmr.msra.gmra.mxu0 %v3146_v56  ;;  %v3372_v56 = vld [vmem:[%s6692_s24 + $0x160] sm:$0xff]  ;;  %v3374_v48 = vld [vmem:[%s6692_s24 + $0x170] sm:$0xff]  ;;  %v3369_v57 = vld [vmem:[%s6692_s24 + $0x148] sm:$0xff] }
 0xd6e   : > { %3504 = vmatpush1.msra.mxu0 %v3390_v27  ;;  %3423 = vmatpush1.msra.mxu1 %v3372_v56  ;;  %v3342_v27 = vld [vmem:[%s6692_s24 + $0x70] sm:$0xff] }
 0xd6f   : > { %v3142_v2 = vsel %vm3139_vm2, %v3137_v63, %v5462_v8  ;;  %v3143_v3 = vsel %vm3139_vm2, %v3138_v61, %v5463_v7  ;;  %3505 = vmatprep.subr.mxu0 %v3387_v34  ;;  %3424 = vmatprep.subr.mxu1 %v3369_v57  ;;  %v3370_v7 = vld [vmem:[%s6692_s24 + $0x150] sm:$0xff]  ;;  %v3365_v8 = vld [vmem:[%s6692_s24 + $0x128] sm:$0xff]  ;;  %v3367_v63 = vld [vmem:[%s6692_s24 + $0x138] sm:$0xff] }
 0xd70   : > { %v3147_v4 = vsel %vm3144_vm3, %v3142_v2, %v5467_v6  ;;  %v3148_v5 = vsel %vm3144_vm3, %v3143_v3, %v5468_v62  ;;  %3506 = vmatpush1.msra.mxu0 %v3386_v9  ;;  %v3371_v62 = vld [vmem:[%s6692_s24 + $0x158] sm:$0xff]  ;;  %v3368_v6 = vld [vmem:[%s6692_s24 + $0x140] sm:$0xff]  ;;  %v3366_v2 = vld [vmem:[%s6692_s24 + $0x130] sm:$0xff] }
 0xd71   : > { %5292 = vmatprep.mubr.f32.mxu0 %v3147_v4  ;;  %3507 = vmatprep.subr.mxu0 %v3383_v11  ;;  %v3364_v61 = vld [vmem:[%s6692_s24 + $0x120] sm:$0xff]  ;;  %v3361_v3 = vld [vmem:[%s6692_s24 + $0x108] sm:$0xff]  ;;  %v3363_v4 = vld [vmem:[%s6692_s24 + $0x118] sm:$0xff] }
 0xd72   : > { %5293 = vmatmul.mubr.f32.gmra.mxu0 %v3148_v5  ;;  %3425 = vmatpush1.msra.mxu1 %v3368_v6  ;;  %v3360_v5 = vld [vmem:[%s6692_s24 + $0x100] sm:$0xff]  ;;  %v3339_v34 = vld [vmem:[%s6692_s24 + $0x58] sm:$0xff]  ;;  %v3338_v9 = vld [vmem:[%s6692_s24 + $0x50] sm:$0xff] }
 0xd73   : > { %3508 = vmatpush1.msra.mxu0 %v3382_v42  ;;  %3426 = vmatprep.subr.mxu1 %v3365_v8  ;;  %v3335_v11 = vld [vmem:[%s6692_s24 + $0x38] sm:$0xff]  ;;  %v3334_v42 = vld [vmem:[%s6692_s24 + $0x30] sm:$0xff] }
 0xd74   : > { %3509 = vmatprep.subr.mxu0 %v3379_v59  ;;  %3427 = vmatpush1.msra.mxu1 %v3364_v61 }
 0xd75   : > { %3510 = vmatpush1.msra.mxu0 %v3378_v54  ;;  %3428 = vmatprep.subr.mxu1 %v3361_v3 }
 0xd76   : > { %3511 = vmatprep.subr.mxu0 %v3375_v35  ;;  %3429 = vmatpush1.msra.mxu1 %v3360_v5 }
 0xd77   : > { %3512 = vmatpush1.msra.mxu0 %v3374_v48 }
 0xd78   : > { %3513 = vmatprep.subr.mxu0 %v3371_v62 }
 0xd79   : > { %3514 = vmatpush1.msra.mxu0 %v3370_v7  ;;  %v4784_v7 = vld [vmem:[%s7784_s7] ss:$0 sm:$0xff] }
 0xd7a   : > { %3515 = vmatprep.subr.mxu0 %v3367_v63 }
 0xd7b   : > { %3516 = vmatpush1.msra.mxu0 %v3366_v2 }
 0xd7c   : > { %3517 = vmatprep.subr.mxu0 %v3363_v4 }
 0xe2d   : > { %v5291_v13 = vpop.f32.mrf.mxu0 }
 0xe2e   : > { %v3244_v14 = vadd.f32 %v5291_v13, %v4782_v12  ;;  %v3357_v13 = vld [vmem:[%s6692_s24 + $0xe8] sm:$0xff] }
 0xe2f   : > { %v3238_v15 = vpop.f32.mrf.mxu0  ;;  %3430 = vmatprep.subr.mxu1 %v3357_v13  ;;  %v4087_v13 = vld [vmem:[%s6698_s29 + $0x1f8] sm:$0xff] }
 0xe30   : > { %v3239_v16 = vadd.f32 %v4782_v12, %v3238_v15  ;;  %v3258_v17 = vadd.f32 %v5613_v1, %v3244_v14  ;;  %v3359_v14 = vld [vmem:[%s6692_s24 + $0xf8] sm:$0xff]  ;;  %v3356_v15 = vld [vmem:[%s6692_s24 + $0xe0] sm:$0xff]  ;;  %v3353_v1 = vld [vmem:[%s6692_s24 + $0xc8] sm:$0xff] }
 0xe31   : > { %3431 = vmatpush1.msra.mxu1 %v3356_v15  ;;  %v4071_v15 = vld [vmem:[%s6698_s29 + $0x178] sm:$0xff] }
 0xe32   : > { %3265 = vadd.xlane.f32.xlu1 %v3258_v17  ;;  %v5294_v0 = vpop.f32.mrf.mxu0  ;;  %v3257_v19 = vadd.f32 %v5614_v18, %v3239_v16  ;;  %v3358_v16 = vld [vmem:[%s6692_s24 + $0xf0] sm:$0xff]  ;;  %3432 = vmatprep.subr.mxu1 %v3353_v1 }
 0xe33   : > { %v3254_v25 = vadd.f32 %v5294_v0, %v4782_v12  ;;  %v3352_v0 = vld [vmem:[%s6692_s24 + $0xc0] sm:$0xff]  ;;  %v3354_v18 = vld [vmem:[%s6692_s24 + $0xd0] sm:$0xff] }
 0xe34   : > { %v3248_v20 = vpop.f32.mrf.mxu0  ;;  %3263 = vadd.xlane.f32.xlu0 %v3257_v19  ;;  %3433 = vmatpush1.msra.mxu1 %v3352_v0  ;;  %v4086_v1 = vld [vmem:[%s6698_s29 + $0x1f0] sm:$0xff] }
 0xe35   : > { %v3249_v21 = vadd.f32 %v4782_v12, %v3248_v20  ;;  %v3260_v24 = vadd.f32 %v5616_v29, %v3254_v25  ;;  %v3362_v12 = vld [vmem:[%s6692_s24 + $0x110] sm:$0xff]  ;;  %v3351_v20 = vld [vmem:[%s6692_s24 + $0xb8] sm:$0xff]  ;;  %v3344_v29 = vld [vmem:[%s6692_s24 + $0x80] sm:$0xff] }
 0xe36   : > { %3518 = vmatpush1.msra.mxu0 %v3362_v12  ;;  %v3350_v25 = vld [vmem:[%s6692_s24 + $0xb0] sm:$0xff]  ;;  %v4055_v12 = vld [vmem:[%s6698_s29 + $0xf8] sm:$0xff] }
 0xe37   : > { %v3259_v23 = vadd.f32 %v5615_v22, %v3249_v21  ;;  %3519 = vmatprep.subr.mxu0 %v3359_v14  ;;  %v3348_v21 = vld [vmem:[%s6692_s24 + $0xa0] sm:$0xff]  ;;  %v3345_v22 = vld [vmem:[%s6692_s24 + $0x88] sm:$0xff]  ;;  %v4039_v14 = vld [vmem:[%s6698_s29 + $0x78] sm:$0xff] }
 0xe38   : > { %3520 = vmatpush1.msra.mxu0 %v3358_v16  ;;  %v4054_v16 = vld [vmem:[%s6698_s29 + $0xf0] sm:$0xff] }
 0xe39   : > { %3267 = vadd.xlane.f32.xlu0 %v3259_v23  ;;  %v4070_v0 = vld [vmem:[%s6698_s29 + $0x170] sm:$0xff] }
 0xe3d   : > { %3269 = vadd.xlane.f32.xlu0 %v3260_v24 }
 0xebb   : > { %v3266_v43 = vpop.xlane.xlu1 %3265 }
 0xebc   : > { %v3273_v44 = vmul.f32 0.0078125, %v3266_v43  ;;  %v3329_v43 = vld [vmem:[%s6692_s24 + $0x8] sm:$0xff] }
 0xebd   : > { %v3264_v45 = vpop.xlane.xlu0 %3263 }
 0xebe   : > { %v7108_v46 = vsub.f32 %v3258_v17, %v3273_v44  ;;  %v3272_v37 = vmul.f32 0.0078125, %v3264_v45  ;;  %v3355_v17 = vld [vmem:[%s6692_s24 + $0xd8] sm:$0xff]  ;;  %v3328_v45 = vld [vmem:[%s6692_s24] sm:$0xff] }
 0xebf   : > { %3521 = vmatprep.subr.mxu0 %v3355_v17  ;;  %v3331_v44 = vld [vmem:[%s6692_s24 + $0x18] sm:$0xff]  ;;  %v4038_v17 = vld [vmem:[%s6698_s29 + $0x70] sm:$0xff] }
 0xec0   : > { %v7110_v47 = vsub.f32 %v3257_v19, %v3272_v37  ;;  %v3281_v28 = vmul.f32 %v7108_v46, %v7108_v46  ;;  %v3349_v19 = vld [vmem:[%s6692_s24 + $0xa8] sm:$0xff]  ;;  %3522 = vmatpush1.msra.mxu0 %v3354_v18  ;;  %v3330_v37 = vld [vmem:[%s6692_s24 + $0x10] sm:$0xff] }
 0xec1   : > { %3434 = vmatprep.subr.mxu1 %v3349_v19  ;;  %3523 = vmatprep.subr.mxu0 %v3351_v20  ;;  %v4053_v18 = vld [vmem:[%s6698_s29 + $0xe8] sm:$0xff] }
 0xec2   : > { %3286 = vadd.xlane.f32.xlu1 %v3281_v28  ;;  %v3268_v49 = vpop.xlane.xlu0 %3267  ;;  %v3280_v31 = vmul.f32 %v7110_v47, %v7110_v47  ;;  %3435 = vmatpush1.msra.mxu1 %v3348_v21  ;;  %v6117_v28 = vmov 0.0   ;;  %v4085_v19 = vld [vmem:[%s6698_s29 + $0x1e8] sm:$0xff] }
 0xec3   : > { %v3274_v32 = vmul.f32 0.0078125, %v3268_v49  ;;  %3524 = vmatpush1.msra.mxu0 %v3350_v25  ;;  %3436 = vmatprep.subr.mxu1 %v3345_v22  ;;  %v4037_v20 = vld [vmem:[%s6698_s29 + $0x68] sm:$0xff]  ;;  %v4052_v25 = vld [vmem:[%s6698_s29 + $0xe0] sm:$0xff] }
 0xec4   : > { %3284 = vadd.xlane.f32.xlu0 %v3280_v31  ;;  %3437 = vmatpush1.msra.mxu1 %v3344_v29  ;;  %v4069_v21 = vld [vmem:[%s6698_s29 + $0x168] sm:$0xff]  ;;  %v4084_v22 = vld [vmem:[%s6698_s29 + $0x1e0] sm:$0xff] }
 0xec5   : > { %v7116_v33 = vsub.f32 %v3259_v23, %v3274_v32  ;;  %v3347_v23 = vld [vmem:[%s6692_s24 + $0x98] sm:$0xff]  ;;  %3438 = vmatprep.subr.mxu1 %v3341_v39  ;;  %3478 = vmatprep.mubr.f32.mxu1 %v6117_v28  ;;  %v4068_v29 = vld [vmem:[%s6698_s29 + $0x160] sm:$0xff] }
 0xec6   : > { %v3270_v38 = vpop.xlane.xlu0 %3269  ;;  %3525 = vmatprep.subr.mxu0 %v3347_v23  ;;  %3439 = vmatpush1.msra.mxu1 %v3340_v26  ;;  %v4036_v23 = vld [vmem:[%s6698_s29 + $0x60] sm:$0xff]  ;;  %v4083_v39 = vld [vmem:[%s6698_s29 + $0x1d8] sm:$0xff] }
 0xec7   : > { %v3275_v50 = vmul.f32 0.0078125, %v3270_v38  ;;  %v3282_v51 = vmul.f32 %v7116_v33, %v7116_v33  ;;  %3440 = vmatprep.subr.mxu1 %v3337_v30  ;;  %3567 = vmatprep.mubr.f32.mxu0 %v6117_v28  ;;  %v4067_v26 = vld [vmem:[%s6698_s29 + $0x158] sm:$0xff]  ;;  %v4082_v30 = vld [vmem:[%s6698_s29 + $0x1d0] sm:$0xff] }
 0xec8   : > { %3441 = vmatpush1.msra.mxu1 %v3336_v36  ;;  %v4066_v36 = vld [vmem:[%s6698_s29 + $0x150] sm:$0xff] }
 0xec9   : > { %v7120_v52 = vsub.f32 %v3260_v24, %v3275_v50  ;;  %3288 = vadd.xlane.f32.xlu0 %v3282_v51  ;;  %v3346_v24 = vld [vmem:[%s6692_s24 + $0x90] sm:$0xff]  ;;  %3442 = vmatprep.subr.mxu1 %v3333_v10  ;;  %s7783_s24 = scalar_lea.vmem [#allocation18], %s6660_s22  ;;  %v4081_v10 = vld [vmem:[%s6698_s29 + $0x1c8] sm:$0xff] }
 0xeca   : > { %3526 = vmatpush1.msra.mxu0 %v3346_v24  ;;  %3443 = vmatpush1.msra.mxu1 %v3332_v41  ;;  %v4783_v62 = vld [vmem:[%s7783_s24] ss:$0 sm:$0xff]  ;;  %v4051_v24 = vld [vmem:[%s6698_s29 + $0xd8] sm:$0xff]  ;;  %v4065_v41 = vld [vmem:[%s6698_s29 + $0x148] sm:$0xff] }
 0xecb   : > { %v3283_v53 = vmul.f32 %v7120_v52, %v7120_v52  ;;  %3527 = vmatprep.subr.mxu0 %v3343_v40  ;;  %3444 = vmatprep.subr.mxu1 %v3329_v43  ;;  %v4035_v40 = vld [vmem:[%s6698_s29 + $0x58] sm:$0xff]  ;;  %v4080_v43 = vld [vmem:[%s6698_s29 + $0x1c0] sm:$0xff] }
 0xecc   : > { %3528 = vmatpush1.msra.mxu0 %v3342_v27  ;;  %3445 = vmatpush1.msra.mxu1 %v3328_v45  ;;  %v4050_v27 = vld [vmem:[%s6698_s29 + $0xd0] sm:$0xff]  ;;  %v4064_v45 = vld [vmem:[%s6698_s29 + $0x140] sm:$0xff] }
 0xecd   : > { %3290 = vadd.xlane.f32.xlu1 %v3283_v53  ;;  %3529 = vmatprep.subr.mxu0 %v3339_v34  ;;  %v4034_v34 = vld [vmem:[%s6698_s29 + $0x50] sm:$0xff] }
 0xece   : > { %3530 = vmatpush1.msra.mxu0 %v3338_v9  ;;  %4943 = vmatprep.subr.mxu1 %v4055_v12  ;;  %v4049_v9 = vld [vmem:[%s6698_s29 + $0xc8] sm:$0xff]  ;;  %v4040_v12 = vld [vmem:[%s6698_s29 + $0x80] sm:$0xff] }
 0xecf   : > { %3531 = vmatprep.subr.mxu0 %v3335_v11  ;;  %v4033_v11 = vld [vmem:[%s6698_s29 + $0x48] sm:$0xff] }
 0xed0   : > { %3532 = vmatpush1.msra.mxu0 %v3334_v42  ;;  %v4048_v42 = vld [vmem:[%s6698_s29 + $0xc0] sm:$0xff] }
 0xed1   : > { %3533 = vmatprep.subr.mxu0 %v3331_v44  ;;  %v4032_v44 = vld [vmem:[%s6698_s29 + $0x40] sm:$0xff] }
 0xed2   : > { %3534 = vmatpush1.msra.mxu0 %v3330_v37  ;;  %v4047_v37 = vld [vmem:[%s6698_s29 + $0xb8] sm:$0xff] }
 0xed3   : > { %4987 = vmatprep.subr.mxu0 %v4087_v13  ;;  %v4072_v13 = vld [vmem:[%s6698_s29 + $0x180] sm:$0xff] }
 0xf4b   : > { %v3287_v49 = vpop.xlane.xlu1 %3286 }
 0xf4c   : > { %v3293_v31 = vmul.f32 0.0078125, %v3287_v49  ;;  %v4031_v49 = vld [vmem:[%s6698_s29 + $0x38] sm:$0xff] }
 0xf4d   : > { %v3285_v32 = vpop.xlane.xlu0 %3284 }
 0xf4e   : > { %v3297_v38 = vadd.f32 1e-12, %v3293_v31  ;;  %v3292_v50 = vmul.f32 0.0078125, %v3285_v32  ;;  %v4063_v31 = vld [vmem:[%s6698_s29 + $0x138] sm:$0xff]  ;;  %v4046_v32 = vld [vmem:[%s6698_s29 + $0xb0] sm:$0xff] }
 0xf50   : > { %5533 = vrsqrt.f32 %v3297_v38  ;;  %v3296_v51 = vadd.f32 1e-12, %v3292_v50  ;;  %v4078_v38 = vld [vmem:[%s6698_s29 + $0x1b0] sm:$0xff] }
 0xf51   : > { %v4030_v50 = vld [vmem:[%s6698_s29 + $0x30] sm:$0xff] }
 0xf52   : > { %5535 = vrsqrt.f32 %v3296_v51  ;;  %v3289_v53 = vpop.xlane.xlu0 %3288  ;;  %v4062_v51 = vld [vmem:[%s6698_s29 + $0x130] sm:$0xff] }
 0xf53   : > { %v3294_v58 = vmul.f32 0.0078125, %v3289_v53  ;;  %v4045_v53 = vld [vmem:[%s6698_s29 + $0xa8] sm:$0xff] }
 0xf55   : > { %v3298_v59 = vadd.f32 1e-12, %v3294_v58  ;;  %v4077_v58 = vld [vmem:[%s6698_s29 + $0x1a8] sm:$0xff] }
 0xf56   : > { %v3291_v60 = vpop.xlane.xlu1 %3290 }
 0xf57   : > { %5537 = vrsqrt.f32 %v3298_v59  ;;  %v3295_v54 = vmul.f32 0.0078125, %v3291_v60  ;;  %v4029_v59 = vld [vmem:[%s6698_s29 + $0x28] sm:$0xff] }
 0xf58   : > { %v4061_v60 = vld [vmem:[%s6698_s29 + $0x128] sm:$0xff] }
 0xf59   : > { %v3299_v55 = vadd.f32 1e-12, %v3295_v54  ;;  %v4044_v54 = vld [vmem:[%s6698_s29 + $0xa0] sm:$0xff] }
 0xf5b   : > { %5539 = vrsqrt.f32 %v3299_v55  ;;  %v4076_v55 = vld [vmem:[%s6698_s29 + $0x1a0] sm:$0xff] }
 0xf5d   : > { %v5534_v35 = vpop.eup %5533 }
 0xf5e   : > { %v3305_v57 = vmul.f32 %v5534_v35, %v7108_v46  ;;  %v4028_v35 = vld [vmem:[%s6698_s29 + $0x20] sm:$0xff] }
 0xf5f   : > { %v5536_v56 = vpop.eup %5535 }
 0xf60   : > { %v3304_v48 = vmul.f32 %v5536_v56, %v7110_v47  ;;  %v3315_v61 = vmul.f32 %v4783_v62, %v3305_v57  ;;  %v4060_v56 = vld [vmem:[%s6698_s29 + $0x120] sm:$0xff]  ;;  %v4075_v57 = vld [vmem:[%s6698_s29 + $0x198] sm:$0xff] }
 0xf62   : > { %v3314_v6 = vmul.f32 %v4783_v62, %v3304_v48  ;;  %v7187_v3 = vadd.f32 %v4784_v7, %v3315_v61  ;;  %v4043_v48 = vld [vmem:[%s6698_s29 + $0x98] sm:$0xff]  ;;  %v4026_v61 = vld [vmem:[%s6698_s29 + $0x10] sm:$0xff] }
 0xf64   : > { %v5538_v8 = vpop.eup %5537  ;;  %v7182_v63 = vadd.f32 %v4784_v7, %v3314_v6  ;;  %7786 = vst [vmem:[#allocation44_spill] sm:$0xff] %v7187_v3  ;;  %v4059_v6 = vld [vmem:[%s6698_s29 + $0x118] sm:$0xff] }
 0xf65   : > { %v3306_v2 = vmul.f32 %v5538_v8, %v7116_v33  ;;  %v4074_v8 = vld [vmem:[%s6698_s29 + $0x190] sm:$0xff] }
 0xf66   : > { %7785 = vst [vmem:[#allocation43_spill] sm:$0xff] %v7182_v63  ;;  %3479 = vmatmul.mubr.f32.vlgmr.msra.gmra.mxu1 %v7182_v63  ;;  %3568 = vmatmul.mubr.f32.vlgmr.msra.gmra.mxu0 %v7182_v63 }
 0xf67   : > { %3484 = vmatprep.mubr.f32.mxu1 %v6117_v28  ;;  %3573 = vmatprep.mubr.f32.mxu0 %v6117_v28  ;;  %v3316_v46 = vmul.f32 %v4783_v62, %v3306_v2  ;;  %v4058_v2 = vld [vmem:[%s6698_s29 + $0x110] sm:$0xff] }
 0xf68   : > { %v5540_v47 = vpop.eup %5539  ;;  %4944 = vmatpush3.msra.mxu1 %v4039_v14  ;;  %4988 = vmatpush3.msra.mxu0 %v4071_v15  ;;  %v4024_v14 = vld [vmem:[%s6698_s29] sm:$0xff] }
 0xf69   : > { %v3307_v4 = vmul.f32 %v5540_v47, %v7120_v52  ;;  %v7192_v33 = vadd.f32 %v4784_v7, %v3316_v46  ;;  %4945 = vmatprep.subr.mxu1 %v4054_v16  ;;  %4989 = vmatprep.subr.mxu0 %v4086_v1  ;;  %v4041_v47 = vld [vmem:[%s6698_s29 + $0x88] sm:$0xff]  ;;  %v4056_v15 = vld [vmem:[%s6698_s29 + $0x100] sm:$0xff]  ;;  %v3394_v16 = vlaneseq }
 0xf6a   : > { %3485 = vmatmul.mubr.f32.gmra.mxu1 %v7187_v3  ;;  %3574 = vmatmul.mubr.f32.gmra.mxu0 %v7187_v3  ;;  %v4073_v46 = vld [vmem:[%s6698_s29 + $0x188] sm:$0xff] }
 0xf6b   : > { %3490 = vmatprep.mubr.f32.mxu1 %v6117_v28  ;;  %3579 = vmatprep.mubr.f32.mxu0 %v6117_v28  ;;  %7787 = vst [vmem:[#allocation45_spill] sm:$0xff] %v7192_v33  ;;  %v3317_v5 = vmul.f32 %v4783_v62, %v3307_v4  ;;  %v4027_v62 = vld [vmem:[%s6698_s29 + $0x18] sm:$0xff]  ;;  %v4025_v4 = vld [vmem:[%s6698_s29 + $0x8] sm:$0xff]  ;;  %v3395_v1 = vshrl.u32 %v3394_v16, 7 }
 0xf6c   : > { %4946 = vmatpush3.msra.mxu1 %v4038_v17  ;;  %4990 = vmatpush3.msra.mxu0 %v4070_v0 }
 0xf6d   : > { %v7196_v52 = vadd.f32 %v4784_v7, %v3317_v5  ;;  %4947 = vmatprep.subr.mxu1 %v4053_v18  ;;  %4991 = vmatprep.subr.mxu0 %v4085_v19  ;;  %v4042_v7 = vld [vmem:[%s6698_s29 + $0x90] sm:$0xff]  ;;  %v4057_v5 = vld [vmem:[%s6698_s29 + $0x108] sm:$0xff]  ;;  %v3396_v17 = vsub.s32 0, %v3395_v1  ;;  %v3404_v0 = vsub.s32 2, %v3395_v1  ;;  %v3400_v19 = vsub.s32 1, %v3395_v1 }
 0xf6e   : > { %3491 = vmatmul.mubr.f32.gmra.mxu1 %v7192_v33  ;;  %3580 = vmatmul.mubr.f32.gmra.mxu0 %v7192_v33  ;;  %v3392_v18 = vld [vmem:[%s6726_s5] sm:$0xf] }
 0xf6f   : > { %3496 = vmatprep.mubr.f32.mxu1 %v6117_v28  ;;  %3585 = vmatprep.mubr.f32.mxu0 %v6117_v28  ;;  %7788 = vst [vmem:[#allocation46_spill] sm:$0xff] %v7196_v52  ;;  %v4079_v28 = vld [vmem:[%s6698_s29 + $0x1b8] sm:$0xff] }
 0xf70   : > { %4948 = vmatpush3.msra.mxu1 %v4037_v20  ;;  %4992 = vmatpush3.msra.mxu0 %v4069_v21  ;;  %v3408_v20 = vsub.s32 3, %v3395_v1  ;;  %v7265_v21 = vrot.slane %v3392_v18, %v3396_v17 }
 0xf71   : > { %4949 = vmatprep.subr.mxu1 %v4052_v25  ;;  %4993 = vmatprep.subr.mxu0 %v4084_v22  ;;  %v7267_v25 = vrot.slane %v3392_v18, %v3404_v0 }
 0xf72   : > { %3497 = vmatmul.mubr.f32.gmra.mxu1 %v7196_v52  ;;  %3586 = vmatmul.mubr.f32.gmra.mxu0 %v7196_v52 }
 0xf73   : > { %4950 = vmatpush3.msra.mxu1 %v4036_v23  ;;  %4994 = vmatpush3.msra.mxu0 %v4068_v29  ;;  %v7269_v29 = vrot.slane %v3392_v18, %v3400_v19 }
 0xf74   : > { %4951 = vmatprep.subr.mxu1 %v4051_v24  ;;  %4995 = vmatprep.subr.mxu0 %v4083_v39  ;;  %v7271_v24 = vrot.slane %v3392_v18, %v3408_v20 }
 0xf75   : > { %4952 = vmatpush3.msra.mxu1 %v4035_v40  ;;  %4996 = vmatpush3.msra.mxu0 %v4067_v26 }
 0xf76   : > { %4953 = vmatprep.subr.mxu1 %v4050_v27  ;;  %4997 = vmatprep.subr.mxu0 %v4082_v30 }
 0xf77   : > { %4954 = vmatpush3.msra.mxu1 %v4034_v34  ;;  %4998 = vmatpush3.msra.mxu0 %v4066_v36 }
 0xf78   : > { %4955 = vmatprep.subr.mxu1 %v4049_v9  ;;  %4999 = vmatprep.subr.mxu0 %v4081_v10 }
 0xf79   : > { %4956 = vmatpush3.msra.mxu1 %v4033_v11  ;;  %5000 = vmatpush3.msra.mxu0 %v4065_v41 }
 0xf7a   : > { %4957 = vmatprep.subr.mxu1 %v4048_v42  ;;  %5001 = vmatprep.subr.mxu0 %v4080_v43 }
 0xf7b   : > { %4958 = vmatpush3.msra.mxu1 %v4032_v44  ;;  %5002 = vmatpush3.msra.mxu0 %v4064_v45 }
 0xf7c   : > { %4959 = vmatprep.subr.mxu1 %v4047_v37  ;;  %5003 = vmatprep.subr.mxu0 %v4079_v28 }
 0xf7d   : > { %4960 = vmatpush3.msra.mxu1 %v4031_v49  ;;  %5004 = vmatpush3.msra.mxu0 %v4063_v31 }
 0xf7e   : > { %4961 = vmatprep.subr.mxu1 %v4046_v32  ;;  %5005 = vmatprep.subr.mxu0 %v4078_v38 }
 0xf7f   : > { %4962 = vmatpush3.msra.mxu1 %v4030_v50  ;;  %5006 = vmatpush3.msra.mxu0 %v4062_v51 }
 0xf80   : > { %4963 = vmatprep.subr.mxu1 %v4045_v53  ;;  %5007 = vmatprep.subr.mxu0 %v4077_v58 }
 0xf81   : > { %4964 = vmatpush3.msra.mxu1 %v4029_v59  ;;  %5008 = vmatpush3.msra.mxu0 %v4061_v60 }
 0xf82   : > { %4965 = vmatprep.subr.mxu1 %v4044_v54  ;;  %5009 = vmatprep.subr.mxu0 %v4076_v55 }
 0xf83   : > { %4966 = vmatpush3.msra.mxu1 %v4028_v35  ;;  %5010 = vmatpush3.msra.mxu0 %v4060_v56 }
 0xf84   : > { %4967 = vmatprep.subr.mxu1 %v4043_v48  ;;  %5011 = vmatprep.subr.mxu0 %v4075_v57 }
 0xf85   : > { %4968 = vmatpush3.msra.mxu1 %v4027_v62  ;;  %5012 = vmatpush3.msra.mxu0 %v4059_v6 }
 0xf86   : > { %4969 = vmatprep.subr.mxu1 %v4042_v7  ;;  %5013 = vmatprep.subr.mxu0 %v4074_v8 }
 0xf87   : > { %4970 = vmatpush3.msra.mxu1 %v4026_v61  ;;  %5014 = vmatpush3.msra.mxu0 %v4058_v2 }
 0xf88   : > { %4971 = vmatprep.subr.mxu1 %v4041_v47  ;;  %5015 = vmatprep.subr.mxu0 %v4073_v46 }
 0xf89   : > { %4972 = vmatpush3.msra.mxu1 %v4025_v4  ;;  %5016 = vmatpush3.msra.mxu0 %v4057_v5 }
 0xf8a   : > { %4973 = vmatprep.subr.mxu1 %v4040_v12  ;;  %5017 = vmatprep.subr.mxu0 %v4072_v13 }
 0xf8b   : > { %4974 = vmatpush3.msra.mxu1 %v4024_v14  ;;  %5018 = vmatpush3.msra.mxu0 %v4056_v15 }
0x1026   : > { %v3480_v22 = vpop.f32.mrf.mxu1  ;;  %v3569_v23 = vpop.f32.mrf.mxu0 }
0x1027   : > { %v3481_v39 = vadd.f32 %v3480_v22, %v7265_v21  ;;  %v3570_v40 = vadd.f32 %v3569_v23, %v7267_v25 }
0x1028   : > { %v3482_v26 = vpop.f32.mrf.mxu1  ;;  %v3571_v27 = vpop.f32.mrf.mxu0 }
0x1029   : > { %v7275_v30 = vmul.f32 0.70710677, %v3481_v39  ;;  %v7277_v34 = vmul.f32 0.70710677, %v3570_v40  ;;  %v3483_v36 = vadd.f32 %v3482_v26, %v7269_v29  ;;  %v3572_v9 = vadd.f32 %v3571_v27, %v7271_v24 }
0x102a   : > { %v3486_v45 = vpop.f32.mrf.mxu1  ;;  %v3575_v53 = vpop.f32.mrf.mxu0  ;;  %v7313_v19 = vmul.f32 0.5, %v3481_v39  ;;  %v7315_v20 = vmul.f32 0.5, %v3570_v40 }
0x102b   : > { %v3624_v10 = vand.u32 2147483647, %v7275_v30  ;;  %v3626_v11 = vand.u32 2147483647, %v7277_v34  ;;  %v7283_v41 = vmul.f32 0.70710677, %v3483_v36  ;;  %v3487_v51 = vadd.f32 %v3486_v45, %v7265_v21 }
0x102c   : > { %v7285_v42 = vmul.f32 0.70710677, %v3572_v9  ;;  %v3488_v58 = vpop.f32.mrf.mxu1  ;;  %v7293_v56 = vadd.f32 %v3575_v53, %v7267_v25  ;;  %v3577_v7 = vpop.f32.mrf.mxu0  ;;  %v7317_v23 = vmul.f32 0.5, %v3483_v36  ;;  %vm3944_vm4 = vcmp.ge.f32.partialorder %v7275_v30, 0.0 }
0x102d   : > { %v3640_v43 = vmul.f32 0.3275911, %v3624_v10  ;;  %v3642_v44 = vmul.f32 0.3275911, %v3626_v11  ;;  %v3848_v37 = vmul.f32 %v3624_v10, %v3624_v10  ;;  %v3625_v28 = vand.u32 2147483647, %v7283_v41 }
0x102e   : > { %v3850_v32 = vmul.f32 %v3626_v11, %v3626_v11  ;;  %v3627_v38 = vand.u32 2147483647, %v7285_v42  ;;  %v7290_v55 = vmul.f32 0.70710677, %v3487_v51  ;;  %v7296_v48 = vadd.f32 %v3488_v58, %v7269_v29  ;;  %v3492_v17 = vpop.f32.mrf.mxu1 }
0x102f   : > { %v3656_v49 = vadd.f32 1.0, %v3640_v43  ;;  %v3658_v31 = vadd.f32 1.0, %v3642_v44  ;;  %v3849_v50 = vmul.f32 %v3625_v28, %v3625_v28  ;;  %v3864_v59 = vsub.f32 0.0, %v3848_v37  ;;  %v3581_v44 = vpop.f32.mrf.mxu0 }
0x1030   : > { %v3866_v60 = vsub.f32 0.0, %v3850_v32  ;;  %v3851_v54 = vmul.f32 %v3627_v38, %v3627_v38  ;;  %v3641_v35 = vmul.f32 0.3275911, %v3625_v28  ;;  %v3643_v62 = vmul.f32 0.3275911, %v3627_v38  ;;  %v3494_v28 = vpop.f32.mrf.mxu1 }
0x1031   : > { %5541 = vrcp.f32 %v3656_v49  ;;  %v3865_v57 = vsub.f32 0.0, %v3849_v50  ;;  %v3628_v6 = vand.u32 2147483647, %v7290_v55  ;;  %v3880_v8 = vmul.f32 1.442695, %v3864_v59 }
0x1032   : > { %5543 = vrcp.f32 %v3658_v31  ;;  %v7300_v61 = vmul.f32 0.70710677, %v7293_v56  ;;  %v3884_v2 = vmul.f32 1.442695, %v3866_v60  ;;  %v3867_v47 = vsub.f32 0.0, %v3851_v54 }
0x1033   : > { %v7303_v46 = vmul.f32 0.70710677, %v7296_v48  ;;  %v3657_v4 = vadd.f32 1.0, %v3641_v35  ;;  %v3644_v5 = vmul.f32 0.3275911, %v3628_v6  ;;  %v7306_v12 = vadd.f32 %v3577_v7, %v7271_v24 }
0x1034   : > { %v3882_v13 = vmul.f32 1.442695, %v3865_v57  ;;  %v3659_v14 = vadd.f32 1.0, %v3643_v62  ;;  %5545 = vpow2.f32 %v3880_v8  ;;  %v3852_v15 = vmul.f32 %v3628_v6, %v3628_v6 }
0x1035   : > { %v3630_v16 = vand.u32 2147483647, %v7300_v61  ;;  %v7310_v1 = vmul.f32 0.70710677, %v7306_v12  ;;  %5547 = vpow2.f32 %v3884_v2  ;;  %v3886_v0 = vmul.f32 1.442695, %v3867_v47 }
0x1036   : > { %v3629_v18 = vand.u32 2147483647, %v7303_v46  ;;  %5549 = vrcp.f32 %v3657_v4  ;;  %v3660_v22 = vadd.f32 1.0, %v3644_v5  ;;  %v7321_v27 = vadd.f32 %v3492_v17, %v7265_v21  ;;  %v3583_v17 = vpop.f32.mrf.mxu0 }
0x1037   : > { %5551 = vpow2.f32 %v3882_v13  ;;  %v3631_v26 = vand.u32 2147483647, %v7310_v1  ;;  %v7325_v11 = vmul.f32 0.5, %v3572_v9  ;;  %v3868_v43 = vsub.f32 0.0, %v3852_v15 }
0x1038   : > { %5553 = vrcp.f32 %v3659_v14  ;;  %v3854_v39 = vmul.f32 %v3630_v16, %v3630_v16  ;;  %v3646_v36 = vmul.f32 0.3275911, %v3630_v16  ;;  %v3853_v37 = vmul.f32 %v3629_v18, %v3629_v18 }
0x1039   : > { %5555 = vpow2.f32 %v3886_v0  ;;  %v7331_v31 = vmul.f32 0.5, %v3487_v51  ;;  %v3645_v32 = vmul.f32 0.3275911, %v3629_v18  ;;  %v3855_v38 = vmul.f32 %v3631_v26, %v3631_v26 }
0x103a   : > { %5557 = vrcp.f32 %v3660_v22  ;;  %v7334_v50 = vmul.f32 0.70710677, %v7321_v27  ;;  %v7337_v53 = vadd.f32 %v3581_v44, %v7267_v25  ;;  %v3888_v59 = vmul.f32 1.442695, %v3868_v43 }
0x103b   : > { %v3870_v60 = vsub.f32 0.0, %v3854_v39  ;;  %v7340_v54 = vadd.f32 %v3494_v28, %v7269_v29  ;;  %v3662_v51 = vadd.f32 1.0, %v3646_v36  ;;  %v3869_v57 = vsub.f32 0.0, %v3853_v37 }
0x103c   : > { %7789 = vst [vmem:[#allocation47_spill] sm:$0xff] %v7337_v53  ;;  %v3632_v62 = vand.u32 2147483647, %v7334_v50  ;;  %v3661_v7 = vadd.f32 1.0, %v3645_v32  ;;  %v3647_v8 = vmul.f32 0.3275911, %v3631_v26  ;;  %5559 = vpow2.f32 %v3888_v59 }
0x103d   : > { %v7346_v2 = vmul.f32 0.70710677, %v7337_v53  ;;  %v3871_v4 = vsub.f32 0.0, %v3855_v38  ;;  %v7349_v13 = vmul.f32 0.70710677, %v7340_v54  ;;  %5561 = vrcp.f32 %v3662_v51 }
0x103e   : > { %v7323_v10 = vpop.eup %5541  ;;  %v3856_v5 = vmul.f32 %v3632_v62, %v3632_v62  ;;  %v3892_v15 = vmul.f32 1.442695, %v3870_v60  ;;  %v3890_v22 = vmul.f32 1.442695, %v3869_v57  ;;  %v3648_v26 = vmul.f32 0.3275911, %v3632_v62  ;;  %v3498_v60 = vpop.f32.mrf.mxu1 }
0x103f   : > { %v7327_v40 = vpop.eup %5543  ;;  %v3704_v45 = vmul.f32 1.0614054, %v7323_v10  ;;  %7790 = vst [vmem:[#allocation48_spill] sm:$0xff] %v7346_v2  ;;  %v3634_v16 = vand.u32 2147483647, %v7346_v2  ;;  %v3663_v44 = vadd.f32 1.0, %v3647_v8  ;;  %5563 = vrcp.f32 %v3661_v7 }
0x1040   : > { %v3706_v49 = vmul.f32 1.0614054, %v7327_v40  ;;  %v3633_v36 = vand.u32 2147483647, %v7349_v13  ;;  %v7358_v32 = vadd.f32 %v3583_v17, %v7271_v24  ;;  %5565 = vpow2.f32 %v3892_v15 }
0x1041   : > { %v3720_v9 = vadd.f32 -1.4531521, %v3704_v45  ;;  %v5546_v0 = vpop.eup %5545  ;;  %v3872_v45 = vsub.f32 0.0, %v3856_v5  ;;  %v3650_v59 = vmul.f32 0.3275911, %v3634_v16  ;;  %5567 = vpow2.f32 %v3890_v22 }
0x1042   : > { %v3722_v58 = vadd.f32 -1.4531521, %v3706_v49  ;;  %v5548_v43 = vpop.eup %5547  ;;  %v3894_v49 = vmul.f32 1.442695, %v3871_v4  ;;  %v3664_v57 = vadd.f32 1.0, %v3648_v26  ;;  %v3858_v62 = vmul.f32 %v3634_v16, %v3634_v16 }
0x1043   : > { %v3736_v35 = vmul.f32 %v7323_v10, %v3720_v9  ;;  %v7355_v37 = vpop.eup %5549  ;;  %5569 = vrcp.f32 %v3663_v44  ;;  %v3857_v4 = vmul.f32 %v3633_v36, %v3633_v36  ;;  %v7377_v15 = vadd.f32 %v3498_v60, %v7265_v21 }
0x1044   : > { %v3738_v6 = vmul.f32 %v7327_v40, %v3722_v58  ;;  %v7360_v9 = vpop.eup %5551  ;;  %v7363_v58 = vmul.f32 0.5, %v7293_v56  ;;  %5571 = vpow2.f32 %v3894_v49  ;;  %v3666_v17 = vadd.f32 1.0, %v3650_v59 }
0x1045   : > { %v3752_v47 = vadd.f32 1.4214138, %v3736_v35  ;;  %v7365_v35 = vpop.eup %5553  ;;  %7791 = vst [vmem:[#allocation49_spill] sm:$0xff] %v7377_v15  ;;  %5573 = vrcp.f32 %v3664_v57  ;;  %vm3946_vm5 = vcmp.ge.f32.partialorder %v7277_v34, 0.0  ;;  %v3873_v21 = vsub.f32 0.0, %v3857_v4 }
0x1046   : > { %v3754_v14 = vadd.f32 1.4214138, %v3738_v6  ;;  %v3587_v6 = vpop.f32.mrf.mxu0  ;;  %v7368_v7 = vpop.eup %5555  ;;  %vm3945_vm6 = vcmp.ge.f32.partialorder %v7283_v41, 0.0  ;;  %vm3947_vm7 = vcmp.ge.f32.partialorder %v7285_v42, 0.0  ;;  %vm3949_vm8 = vcmp.ge.f32.partialorder %v7303_v46, 0.0 }
0x1047   : > { %v3768_v18 = vmul.f32 %v7323_v10, %v3752_v47  ;;  %v3896_v47 = vmul.f32 1.442695, %v3872_v45  ;;  %v7371_v56 = vpop.eup %5557  ;;  %v7381_v22 = vadd.f32 %v3587_v6, %v7267_v25  ;;  %v3898_v4 = vmul.f32 1.442695, %v3873_v21 }
0x1048   : > { %v3770_v39 = vmul.f32 %v7327_v40, %v3754_v14  ;;  %v7374_v14 = vmul.f32 0.70710677, %v7358_v32  ;;  %vm3951_vm9 = vcmp.ge.f32.partialorder %v7310_v1, 0.0  ;;  %vm3948_vm10 = vcmp.ge.f32.partialorder %v7290_v55, 0.0 }
0x1049   : > { %v3784_v28 = vadd.f32 -0.28449672, %v3768_v18  ;;  %v3649_v18 = vmul.f32 0.3275911, %v3633_v36  ;;  %7792 = vst [vmem:[#allocation50_spill] sm:$0xff] %v7381_v22  ;;  %5575 = vpow2.f32 %v3896_v47  ;;  %vm3950_vm11 = vcmp.ge.f32.partialorder %v7300_v61, 0.0 }
0x104a   : > { %v3786_v38 = vadd.f32 -0.28449672, %v3770_v39  ;;  %v3874_v39 = vsub.f32 0.0, %v3858_v62  ;;  %v3635_v44 = vand.u32 2147483647, %v7374_v14  ;;  %5577 = vrcp.f32 %v3666_v17 }
0x104b   : > { %v3800_v51 = vmul.f32 %v7323_v10, %v3784_v28  ;;  %v7388_v28 = vmul.f32 0.70710677, %v7377_v15  ;;  %v7391_v25 = vmul.f32 0.70710677, %v7381_v22  ;;  %v3665_v59 = vadd.f32 1.0, %v3649_v18 }
0x104c   : > { %v3802_v8 = vmul.f32 %v7327_v40, %v3786_v38  ;;  %v3651_v36 = vmul.f32 0.3275911, %v3635_v44  ;;  %v3859_v38 = vmul.f32 %v3635_v44, %v3635_v44  ;;  %v3900_v62 = vmul.f32 1.442695, %v3874_v39 }
0x104d   : > { %v3816_v5 = vadd.f32 0.2548296, %v3800_v51  ;;  %7793 = vst [vmem:[#allocation51_spill] sm:$0xff] %v7388_v28  ;;  %7794 = vst [vmem:[#allocation52_spill] sm:$0xff] %v7391_v25  ;;  %v3636_v60 = vand.u32 2147483647, %v7388_v28  ;;  %v3500_v51 = vpop.f32.mrf.mxu1  ;;  %5579 = vrcp.f32 %v3665_v59 }
0x104e   : > { %v3818_v16 = vadd.f32 0.2548296, %v3802_v8  ;;  %v3875_v6 = vsub.f32 0.0, %v3859_v38  ;;  %v3638_v8 = vand.u32 2147483647, %v7391_v25  ;;  %v7400_v18 = vadd.f32 %v3500_v51, %v7269_v29 }
0x104f   : > { %v3832_v26 = vmul.f32 %v7323_v10, %v3816_v5  ;;  %v3652_v5 = vmul.f32 0.3275911, %v3636_v60  ;;  %v7405_v39 = vmul.f32 0.5, %v7296_v48  ;;  %5581 = vpow2.f32 %v3900_v62 }
0x1050   : > { %v3834_v45 = vmul.f32 %v7327_v40, %v3818_v16  ;;  %v7394_v40 = vpop.eup %5559  ;;  %v3860_v16 = vmul.f32 %v3636_v60, %v3636_v60  ;;  %v3654_v17 = vmul.f32 0.3275911, %v3638_v8  ;;  %7795 = vst [vmem:[#allocation53_spill] sm:$0xff] %v7400_v18  ;;  %v3589_v60 = vpop.f32.mrf.mxu0  ;;  %v7414_v29 = vmul.f32 0.5, %v7306_v12 }
0x1051   : > { %v3912_v49 = vmul.f32 %v5546_v0, %v3832_v26  ;;  %v7397_v47 = vpop.eup %5561  ;;  %v7417_v51 = vmul.f32 0.5, %v7340_v54  ;;  %5583 = vpow2.f32 %v3898_v4  ;;  %v7424_v62 = vmul.f32 0.70710677, %v7400_v18 }
0x1052   : > { %v3914_v10 = vmul.f32 %v5548_v43, %v3834_v45  ;;  %v3667_v43 = vadd.f32 1.0, %v3651_v36  ;;  %v7402_v44 = vpop.eup %5563  ;;  %v3876_v36 = vsub.f32 0.0, %v3860_v16  ;;  %v3670_v48 = vadd.f32 1.0, %v3654_v17 }
0x1053   : > { %v3928_v57 = vsub.f32 1.0, %v3912_v49  ;;  %v3902_v49 = vmul.f32 1.442695, %v3875_v6  ;;  %v7407_v38 = vpop.eup %5565  ;;  %7796 = vst [vmem:[#allocation54_spill] sm:$0xff] %v7424_v62  ;;  %v7429_v12 = vadd.f32 %v3589_v60, %v7271_v24  ;;  %v3705_v54 = vmul.f32 1.0614054, %v7355_v37 }
0x1054   : > { %v3930_v0 = vsub.f32 1.0, %v3914_v10  ;;  %v3668_v10 = vadd.f32 1.0, %v3652_v5  ;;  %v7411_v52 = vpop.eup %5567  ;;  %5585 = vrcp.f32 %v3667_v43  ;;  %v7433_v4 = vmul.f32 0.5, %v7358_v32 }
0x1055   : > { %v3960_v26 = vsub.f32 0.0, %v3928_v57  ;;  %v7419_v59 = vpop.eup %5569  ;;  %5587 = vpow2.f32 %v3902_v49  ;;  %7797 = vst [vmem:[#allocation55_spill] sm:$0xff] %v7429_v12  ;;  %v7435_v34 = vmul.f32 1.442695, %v3876_v36  ;;  %v3721_v43 = vadd.f32 -1.4531521, %v3705_v54 }
0x1056   : > { %v3962_v45 = vsub.f32 0.0, %v3930_v0  ;;  %v7426_v6 = vpop.eup %5571  ;;  %5589 = vrcp.f32 %v3668_v10  ;;  %v3707_v32 = vmul.f32 1.0614054, %v7365_v35  ;;  %v3709_v60 = vmul.f32 1.0614054, %v7402_v44 }
0x1057   : > { %v3976_v21 = vsel %vm3944_vm4, %v3928_v57, %v3960_v26  ;;  %v3862_v57 = vmul.f32 %v3638_v8, %v3638_v8  ;;  %v3637_v8 = vand.u32 2147483647, %v7424_v62  ;;  %5591 = vrcp.f32 %v3670_v48 }
0x1058   : > { %v3978_v30 = vsel %vm3946_vm5, %v3930_v0, %v3962_v45  ;;  %v3992_v5 = vadd.f32 1.0, %v3976_v21  ;;  %v7438_v0 = vpop.eup %5573  ;;  %v7441_v26 = vmul.f32 0.70710677, %v7429_v12  ;;  %v3737_v36 = vmul.f32 %v7355_v37, %v3721_v43 }
0x1059   : > { %v3994_v16 = vadd.f32 1.0, %v3978_v30  ;;  %v7443_v24 = vpop.eup %5575  ;;  %v3878_v17 = vsub.f32 0.0, %v3862_v57  ;;  %v3653_v45 = vmul.f32 0.3275911, %v3637_v8  ;;  %v3861_v49 = vmul.f32 %v3637_v8, %v3637_v8 }
0x105a   : > { %7798 = vst [vmem:[#allocation56_spill] sm:$0xff] %v7441_v26  ;;  %v7447_v21 = vmul.f32 %v3992_v5, %v7313_v19  ;;  %v3639_v10 = vand.u32 2147483647, %v7441_v26  ;;  %v7452_v48 = vpop.eup %5577  ;;  %v3723_v33 = vadd.f32 -1.4531521, %v3707_v32  ;;  %vm3953_vm12 = vcmp.ge.f32.partialorder %v7349_v13, 0.0 }
0x105b   : > { %v3669_v30 = vadd.f32 1.0, %v3653_v45  ;;  %v3877_v54 = vsub.f32 0.0, %v3861_v49  ;;  %v3711_v57 = vmul.f32 1.0614054, %v7419_v59  ;;  %v3753_v63 = vadd.f32 1.4214138, %v3737_v36  ;;  %v7463_v32 = vpop.eup %5579 }
0x105c   : > { %v3655_v3 = vmul.f32 0.3275911, %v3639_v10  ;;  %v3863_v8 = vmul.f32 %v3639_v10, %v3639_v10  ;;  %v3725_v22 = vadd.f32 -1.4531521, %v3709_v60  ;;  %v7456_v19 = vmul.f32 %v3994_v16, %v7315_v20  ;;  %v7467_v16 = vpop.eup %5581 }
0x105d   : > { %v3906_v5 = vmul.f32 1.442695, %v3877_v54  ;;  %v3739_v25 = vmul.f32 %v7365_v35, %v3723_v33  ;;  %v3727_v43 = vadd.f32 -1.4531521, %v3711_v57  ;;  %v7459_v15 = vmul.f32 1.442695, %v3878_v17 }
0x105e   : > { %v3879_v28 = vsub.f32 0.0, %v3863_v8  ;;  %v3769_v45 = vmul.f32 %v7355_v37, %v3753_v63  ;;  %v3741_v49 = vmul.f32 %v7402_v44, %v3725_v22  ;;  %5593 = vrcp.f32 %v3669_v30  ;;  %v7469_v54 = vpop.eup %5583 }
0x105f   : > { %v3755_v10 = vadd.f32 1.4214138, %v3739_v25  ;;  %v3743_v36 = vmul.f32 %v7419_v59, %v3727_v43  ;;  %v3708_v20 = vmul.f32 1.0614054, %v7371_v56  ;;  %5595 = vpow2.f32 %v3906_v5 }
0x1060   : > { %v3671_v33 = vadd.f32 1.0, %v3655_v3  ;;  %v3785_v60 = vadd.f32 -0.28449672, %v3769_v45  ;;  %v3757_v17 = vadd.f32 1.4214138, %v3741_v49  ;;  %vm3955_vm13 = vcmp.ge.f32.partialorder %v7374_v14, 0.0 }
0x1061   : > { %v3771_v63 = vmul.f32 %v7365_v35, %v3755_v10  ;;  %v3759_v57 = vadd.f32 1.4214138, %v3743_v36  ;;  %v3724_v22 = vadd.f32 -1.4531521, %v3708_v20  ;;  %v3710_v8 = vmul.f32 1.0614054, %v7397_v47  ;;  %v7473_v30 = vpop.eup %5585 }
0x1062   : > { %v7475_v25 = vmul.f32 1.442695, %v3879_v28  ;;  %v3801_v43 = vmul.f32 %v7355_v37, %v3785_v60  ;;  %v3773_v12 = vmul.f32 %v7402_v44, %v3757_v17  ;;  %v3713_v3 = vmul.f32 1.0614054, %v7463_v32  ;;  %v7480_v5 = vpop.eup %5587 }
0x1063   : > { %v3787_v45 = vadd.f32 -0.28449672, %v3771_v63  ;;  %v3775_v49 = vmul.f32 %v7419_v59, %v3759_v57  ;;  %v3740_v10 = vmul.f32 %v7371_v56, %v3724_v22  ;;  %v3726_v36 = vadd.f32 -1.4531521, %v3710_v8  ;;  %v7484_v20 = vpop.eup %5589 }
0x1064   : > { %5597 = vrcp.f32 %v3671_v33  ;;  %v3817_v26 = vadd.f32 0.2548296, %v3801_v43  ;;  %v3789_v28 = vadd.f32 -0.28449672, %v3773_v12  ;;  %v3729_v62 = vadd.f32 -1.4531521, %v3713_v3  ;;  %v7486_v18 = vpop.eup %5591 }
0x1065   : > { %v3803_v60 = vmul.f32 %v7365_v35, %v3787_v45  ;;  %v3791_v17 = vadd.f32 -0.28449672, %v3775_v49  ;;  %v3756_v2 = vadd.f32 1.4214138, %v3740_v10  ;;  %v3742_v63 = vmul.f32 %v7397_v47, %v3726_v36 }
0x1066   : > { %v3833_v57 = vmul.f32 %v7355_v37, %v3817_v26  ;;  %v3805_v22 = vmul.f32 %v7402_v44, %v3789_v28  ;;  %v3745_v8 = vmul.f32 %v7463_v32, %v3729_v62  ;;  %v3715_v33 = vmul.f32 1.0614054, %v7473_v30 }
0x1067   : > { %v3819_v12 = vadd.f32 0.2548296, %v3803_v60  ;;  %v3807_v43 = vmul.f32 %v7419_v59, %v3791_v17  ;;  %v3772_v3 = vmul.f32 %v7371_v56, %v3756_v2  ;;  %v3758_v53 = vadd.f32 1.4214138, %v3742_v63 }
0x1068   : > { %v3913_v45 = vmul.f32 %v7360_v9, %v3833_v57  ;;  %v3821_v49 = vadd.f32 0.2548296, %v3805_v22  ;;  %v3761_v10 = vadd.f32 1.4214138, %v3745_v8  ;;  %v3731_v36 = vadd.f32 -1.4531521, %v3715_v33 }
0x1069   : > { %v3835_v37 = vmul.f32 %v7365_v35, %v3819_v12  ;;  %v3823_v62 = vadd.f32 0.2548296, %v3807_v43  ;;  %v3788_v26 = vadd.f32 -0.28449672, %v3772_v3  ;;  %v3774_v28 = vmul.f32 %v7397_v47, %v3758_v53 }
0x106a   : > { %v3929_v60 = vsub.f32 1.0, %v3913_v45  ;;  %v3837_v2 = vmul.f32 %v7402_v44, %v3821_v49  ;;  %v3777_v17 = vmul.f32 %v7463_v32, %v3761_v10  ;;  %v3747_v9 = vmul.f32 %v7473_v30, %v3731_v36 }
0x106b   : > { %v3915_v63 = vmul.f32 %v7368_v7, %v3835_v37  ;;  %v3839_v57 = vmul.f32 %v7419_v59, %v3823_v62  ;;  %v3804_v22 = vmul.f32 %v7371_v56, %v3788_v26  ;;  %v3790_v35 = vadd.f32 -0.28449672, %v3774_v28  ;;  %v7509_v8 = vpop.eup %5593 }
0x106c   : > { %v3961_v33 = vsub.f32 0.0, %v3929_v60  ;;  %v3917_v53 = vmul.f32 %v7411_v52, %v3837_v2  ;;  %v3793_v12 = vadd.f32 -0.28449672, %v3777_v17  ;;  %v3763_v43 = vadd.f32 1.4214138, %v3747_v9  ;;  %v7512_v3 = vpop.eup %5595 }
0x106d   : > { %v3931_v44 = vsub.f32 1.0, %v3915_v63  ;;  %v3919_v45 = vmul.f32 %v7426_v6, %v3839_v57  ;;  %v3820_v49 = vadd.f32 0.2548296, %v3804_v22  ;;  %v3806_v7 = vmul.f32 %v7397_v47, %v3790_v35 }
0x106e   : > { %v3977_v59 = vsel %vm3945_vm6, %v3929_v60, %v3961_v33  ;;  %v3933_v10 = vsub.f32 1.0, %v3917_v53  ;;  %v3809_v36 = vmul.f32 %v7463_v32, %v3793_v12  ;;  %v3779_v52 = vmul.f32 %v7473_v30, %v3763_v43 }
0x106f   : > { %v3993_v37 = vadd.f32 1.0, %v3977_v59  ;;  %v3963_v62 = vsub.f32 0.0, %v3931_v44  ;;  %v3935_v26 = vsub.f32 1.0, %v3919_v45  ;;  %v3836_v28 = vmul.f32 %v7371_v56, %v3820_v49 }
0x1070   : > { %5599 = vpow2.f32 %v7475_v25  ;;  %v3965_v6 = vsub.f32 0.0, %v3933_v10  ;;  %v3822_v2 = vadd.f32 0.2548296, %v3806_v7  ;;  %v3825_v17 = vadd.f32 0.2548296, %v3809_v36 }
0x1071   : > { %v7523_v9 = vpop.eup %5597  ;;  %v4009_v41 = vmul.f32 %v3993_v37, %v7317_v23  ;;  %v3979_v60 = vsel %vm3947_vm7, %v3931_v44, %v3963_v62  ;;  %v3967_v63 = vsub.f32 0.0, %v3935_v26  ;;  %v3916_v57 = vmul.f32 %v7394_v40, %v3836_v28 }
0x1072   : > { %v3995_v56 = vadd.f32 1.0, %v3979_v60  ;;  %v3981_v25 = vsel %vm3949_vm8, %v3933_v10, %v3965_v6  ;;  %v3838_v22 = vmul.f32 %v7397_v47, %v3822_v2  ;;  %v3841_v35 = vmul.f32 %v7463_v32, %v3825_v17 }
0x1073   : > { %4159 = vmatprep.mubr.f32.mxu1 %v4009_v41  ;;  %v3997_v33 = vadd.f32 1.0, %v3981_v25  ;;  %v3983_v53 = vsel %vm3951_vm9, %v3935_v26, %v3967_v63  ;;  %v3932_v23 = vsub.f32 1.0, %v3916_v57  ;;  %v3795_v12 = vadd.f32 -0.28449672, %v3779_v52 }
0x1074   : > { %v4011_v42 = vmul.f32 %v3995_v56, %v7325_v11  ;;  %4160 = vmatmul.mubr.f32.vlgmr.msra.gmra.mxu1 %v7447_v21  ;;  %v3999_v40 = vadd.f32 1.0, %v3983_v53  ;;  %v3918_v43 = vmul.f32 %v7407_v38, %v3838_v22  ;;  %v3921_v46 = vmul.f32 %v7469_v54, %v3841_v35 }
0x1075   : > { %v4013_v47 = vmul.f32 %v3997_v33, %v7405_v39  ;;  %v3964_v44 = vsub.f32 0.0, %v3932_v23  ;;  %v3811_v32 = vmul.f32 %v7473_v30, %v3795_v12  ;;  %v3712_v45 = vmul.f32 1.0614054, %v7438_v0 }
0x1076   : > { %4244 = vmatprep.mubr.f32.mxu0 %v4011_v42  ;;  %v4015_v1 = vmul.f32 %v3999_v40, %v7414_v29  ;;  %v3934_v49 = vsub.f32 1.0, %v3918_v43  ;;  %v3937_v7 = vsub.f32 1.0, %v3921_v46  ;;  %v3714_v11 = vmul.f32 1.0614054, %v7452_v48 }
0x1077   : > { %4245 = vmatmul.mubr.f32.vlgmr.msra.gmra.mxu0 %v7456_v19  ;;  %4164 = vmatprep.mubr.f32.mxu1 %v4013_v47  ;;  %v3980_v38 = vsel %vm3948_vm10, %v3932_v23, %v3964_v44  ;;  %v3827_v21 = vadd.f32 0.2548296, %v3811_v32  ;;  %v3728_v39 = vadd.f32 -1.4531521, %v3712_v45  ;;  %v3717_v54 = vmul.f32 1.0614054, %v7509_v8 }
0x1078   : > { %4249 = vmatprep.mubr.f32.mxu0 %v4015_v1  ;;  %v3996_v59 = vadd.f32 1.0, %v3980_v38  ;;  %v3966_v10 = vsub.f32 0.0, %v3934_v49  ;;  %v3969_v36 = vsub.f32 0.0, %v3937_v7  ;;  %v3730_v52 = vadd.f32 -1.4531521, %v3714_v11 }
0x1079   : > { %v3843_v29 = vmul.f32 %v7473_v30, %v3827_v21  ;;  %v3744_v37 = vmul.f32 %v7438_v0, %v3728_v39  ;;  %v3733_v62 = vadd.f32 -1.4531521, %v3717_v54  ;;  %v3719_v19 = vmul.f32 1.0614054, %v7523_v9 }
0x107a   : > { %v4012_v26 = vmul.f32 %v3996_v59, %v7331_v31  ;;  %v3982_v55 = vsel %vm3950_vm11, %v3934_v49, %v3966_v10  ;;  %v3985_v28 = vsel %vm3953_vm12, %v3937_v7, %v3969_v36  ;;  %v3746_v6 = vmul.f32 %v7452_v48, %v3730_v52 }
0x107b   : > { %v3998_v2 = vadd.f32 1.0, %v3982_v55  ;;  %v4001_v17 = vadd.f32 1.0, %v3985_v28  ;;  %v3923_v41 = vmul.f32 %v7480_v5, %v3843_v29  ;;  %v3760_v30 = vadd.f32 1.4214138, %v3744_v37 }
0x107c   : > { %4165 = vmatmul.mubr.f32.gmra.mxu1 %v4012_v26  ;;  %v3762_v60 = vadd.f32 1.4214138, %v3746_v6  ;;  %v3749_v63 = vmul.f32 %v7509_v8, %v3733_v62  ;;  %v3735_v57 = vadd.f32 -1.4531521, %v3719_v19  ;;  %v3716_v31 = vmul.f32 1.0614054, %v7484_v20 }
0x107d   : > { %v7562_v56 = vpop.eup %5599  ;;  %v4014_v61 = vmul.f32 %v3998_v2, %v7363_v58  ;;  %v4017_v13 = vmul.f32 %v4001_v17, %v7417_v51  ;;  %v3939_v25 = vsub.f32 1.0, %v3923_v41  ;;  %v3776_v22 = vmul.f32 %v7438_v0, %v3760_v30  ;;  %v7799_v17 = vld [vmem:[#allocation47_spill] sm:$0xff] }
0x107e   : > { %v3778_v35 = vmul.f32 %v7452_v48, %v3762_v60  ;;  %v3765_v5 = vadd.f32 1.4214138, %v3749_v63  ;;  %v3751_v33 = vmul.f32 %v7523_v9, %v3735_v57  ;;  %v3732_v53 = vadd.f32 -1.4531521, %v3716_v31  ;;  %v7800_v60 = vld [vmem:[#allocation48_spill] sm:$0xff]  ;;  %v7801_v31 = vld [vmem:[#allocation53_spill] sm:$0xff] }
0x107f   : > { %4250 = vmatmul.mubr.f32.gmra.mxu0 %v4014_v61  ;;  %4169 = vmatprep.mubr.f32.mxu1 %v4017_v13  ;;  %v3971_v23 = vsub.f32 0.0, %v3939_v25  ;;  %v3792_v12 = vadd.f32 -0.28449672, %v3776_v22  ;;  %v3718_v42 = vmul.f32 1.0614054, %v7486_v18  ;;  %5601 = vpow2.f32 %v7435_v34 }
0x1080   : > { %v3794_v58 = vadd.f32 -0.28449672, %v3778_v35  ;;  %v3781_v51 = vmul.f32 %v7509_v8, %v3765_v5  ;;  %v3767_v40 = vadd.f32 1.4214138, %v3751_v33  ;;  %v3748_v43 = vmul.f32 %v7484_v20, %v3732_v53  ;;  %v7802_v33 = vld [vmem:[#allocation54_spill] sm:$0xff] }
0x1081   : > { %v3987_v46 = vsel %vm3955_vm13, %v3939_v25, %v3971_v23  ;;  %v3808_v47 = vmul.f32 %v7438_v0, %v3792_v12  ;;  %v3734_v44 = vadd.f32 -1.4531521, %v3718_v42  ;;  %5603 = vpow2.f32 %v7459_v15 }
0x1082   : > { %v4003_v32 = vadd.f32 1.0, %v3987_v46  ;;  %v3810_v14 = vmul.f32 %v7452_v48, %v3794_v58  ;;  %v3797_v45 = vadd.f32 -0.28449672, %v3781_v51  ;;  %v3783_v1 = vmul.f32 %v7523_v9, %v3767_v40  ;;  %v7803_v58 = vld [vmem:[#allocation56_spill] sm:$0xff] }
0x1083   : > { %v3824_v49 = vadd.f32 0.2548296, %v3808_v47  ;;  %v3764_v7 = vadd.f32 1.4214138, %v3748_v43  ;;  %v3750_v11 = vmul.f32 %v7486_v18, %v3734_v44  ;;  %vm3952_vm14 = vcmp.ge.f32.partialorder %v7334_v50, 0.0  ;;  %v7804_v44 = vld [vmem:[#allocation55_spill] sm:$0xff] }
0x1084   : > { %v4019_v38 = vmul.f32 %v4003_v32, %v7433_v4  ;;  %v3826_v21 = vadd.f32 0.2548296, %v3810_v14  ;;  %v3813_v34 = vmul.f32 %v7509_v8, %v3797_v45  ;;  %v3799_v39 = vadd.f32 -0.28449672, %v3783_v1 }
0x1085   : > { %v3840_v54 = vmul.f32 %v7438_v0, %v3824_v49  ;;  %v3780_v59 = vmul.f32 %v7484_v20, %v3764_v7  ;;  %v3766_v10 = vadd.f32 1.4214138, %v3750_v11  ;;  %v3600_v0 = vmul.f32 0.5, %v7321_v27 }
0x1086   : > { %4254 = vmatprep.mubr.f32.mxu0 %v4019_v38  ;;  %v3842_v36 = vmul.f32 %v7452_v48, %v3826_v21  ;;  %v3829_v52 = vadd.f32 0.2548296, %v3813_v34  ;;  %v3815_v15 = vmul.f32 %v7523_v9, %v3799_v39  ;;  %v3602_v41 = vmul.f32 0.5, %v7799_v17  ;;  %v7806_v34 = vld [vmem:[#allocation49_spill] sm:$0xff]  ;;  %v7810_v17 = vld [vmem:[#allocation43_spill] sm:$0xff] }
0x1087   : > { %v3920_v29 = vmul.f32 %v7443_v24, %v3840_v54  ;;  %v3796_v37 = vadd.f32 -0.28449672, %v3780_v59  ;;  %v3782_v4 = vmul.f32 %v7486_v18, %v3766_v10  ;;  %vm3954_vm15 = vcmp.ge.f32.partialorder %v7800_v60, 0.0  ;;  %v7807_v54 = vld [vmem:[#allocation52_spill] sm:$0xff] }
0x1088   : > { %v3922_v62 = vmul.f32 %v7467_v16, %v3842_v36  ;;  %v3845_v19 = vmul.f32 %v7509_v8, %v3829_v52  ;;  %v3831_v26 = vadd.f32 0.2548296, %v3815_v15  ;;  %v3605_v61 = vmul.f32 0.5, %v7801_v31  ;;  %v7808_v36 = vld [vmem:[#allocation50_spill] sm:$0xff] }
0x1089   : > { %v3936_v55 = vsub.f32 1.0, %v3920_v29  ;;  %v3812_v28 = vmul.f32 %v7484_v20, %v3796_v37  ;;  %v3798_v6 = vadd.f32 -0.28449672, %v3782_v4  ;;  %vm3957_vm0 = vcmp.ge.f32.partialorder %v7802_v33, 0.0  ;;  %v7812_v33 = vld [vmem:[#allocation45_spill] sm:$0xff] }
0x108a   : > { %v3938_v48 = vsub.f32 1.0, %v3922_v62  ;;  %v3925_v2 = vmul.f32 %v7512_v3, %v3845_v19  ;;  %v3847_v24 = vmul.f32 %v7523_v9, %v3831_v26  ;;  %vm3959_vm1 = vcmp.ge.f32.partialorder %v7803_v58, 0.0  ;;  %v4785_v62 = vld [vmem:[%s1073_s30] ss:$0 sm:$0xff]  ;;  %s7814_s30 = scalar_lea.vmem [#allocation24], %s6660_s22 }
0x108b   : > { %v3968_v30 = vsub.f32 0.0, %v3936_v55  ;;  %v3828_v16 = vadd.f32 0.2548296, %v3812_v28  ;;  %v3814_v8 = vmul.f32 %v7486_v18, %v3798_v6  ;;  %v3607_v32 = vmul.f32 0.5, %v7804_v44 }
0x108c   : > { %v3970_v27 = vsub.f32 0.0, %v3938_v48  ;;  %v3941_v63 = vsub.f32 1.0, %v3925_v2  ;;  %v3927_v57 = vmul.f32 %v7562_v56, %v3847_v24  ;;  %v5602_v25 = vpop.eup %5601  ;;  %v3604_v39 = vmul.f32 0.5, %v7806_v34 }
0x108d   : > { %v3984_v50 = vsel %vm3952_vm14, %v3936_v55, %v3968_v30  ;;  %v3844_v13 = vmul.f32 %v7484_v20, %v3828_v16  ;;  %v3830_v3 = vadd.f32 0.2548296, %v3814_v8  ;;  %vm3958_vm3 = vcmp.ge.f32.partialorder %v7807_v54, 0.0 }
0x108e   : > { %v4000_v9 = vadd.f32 1.0, %v3984_v50  ;;  %v3986_v22 = vsel %vm3954_vm15, %v3938_v48, %v3970_v27  ;;  %v3973_v35 = vsub.f32 0.0, %v3941_v63  ;;  %v3943_v5 = vsub.f32 1.0, %v3927_v57  ;;  %v5604_v42 = vpop.eup %5603  ;;  %v7811_v57 = vld [vmem:[#allocation44_spill] sm:$0xff] }
0x108f   : > { %v4002_v53 = vadd.f32 1.0, %v3986_v22  ;;  %v3924_v23 = vmul.f32 %v5602_v25, %v3844_v13  ;;  %v3846_v12 = vmul.f32 %v7486_v18, %v3830_v3  ;;  %v7805_v18 = vld [vmem:[#allocation51_spill] sm:$0xff]  ;;  %v3606_v52 = vmul.f32 0.5, %v7808_v36 }
0x1090   : > { %v4016_v56 = vmul.f32 %v4000_v9, %v3600_v0  ;;  %v3989_v51 = vsel %vm3957_vm0, %v3941_v63, %v3973_v35  ;;  %v3975_v40 = vsub.f32 0.0, %v3943_v5  ;;  %vm3956_vm2 = vcmp.ge.f32.partialorder %v7805_v18, 0.0 }
0x1091   : > { %v4018_v43 = vmul.f32 %v4002_v53, %v3602_v41  ;;  %v4005_v20 = vadd.f32 1.0, %v3989_v51  ;;  %v3940_v46 = vsub.f32 1.0, %v3924_v23  ;;  %v3926_v47 = vmul.f32 %v5604_v42, %v3846_v12 }
0x1092   : > { %4170 = vmatmul.mubr.f32.gmra.mxu1 %v4016_v56  ;;  %v3991_v14 = vsel %vm3959_vm1, %v3943_v5, %v3975_v40 }
0x1093   : > { %4255 = vmatmul.mubr.f32.gmra.mxu0 %v4018_v43  ;;  %v4021_v45 = vmul.f32 %v4005_v20, %v3605_v61  ;;  %v4007_v1 = vadd.f32 1.0, %v3991_v14  ;;  %v3972_v49 = vsub.f32 0.0, %v3940_v46  ;;  %v3942_v7 = vsub.f32 1.0, %v3926_v47  ;;  %v7813_v43 = vld [vmem:[#allocation46_spill] sm:$0xff] }
0x1095   : > { %4174 = vmatprep.mubr.f32.mxu1 %v4021_v45  ;;  %v4023_v11 = vmul.f32 %v4007_v1, %v3607_v32  ;;  %v3988_v38 = vsel %vm3956_vm2, %v3940_v46, %v3972_v49  ;;  %v3974_v21 = vsub.f32 0.0, %v3942_v7 }
0x1096   : > { %v4004_v59 = vadd.f32 1.0, %v3988_v38 }
0x1097   : > { %4259 = vmatprep.mubr.f32.mxu0 %v4023_v11  ;;  %v3990_v10 = vsel %vm3958_vm3, %v3942_v7, %v3974_v21 }
0x1098   : > { %v4020_v15 = vmul.f32 %v4004_v59, %v3604_v39  ;;  %v4006_v29 = vadd.f32 1.0, %v3990_v10 }
0x109a   : > { %4175 = vmatmul.mubr.f32.gmra.mxu1 %v4020_v15  ;;  %v4022_v37 = vmul.f32 %v4006_v29, %v3606_v52 }
0x109c   : > { %4260 = vmatmul.mubr.f32.gmra.mxu0 %v4022_v37 }
0x1134   : > { %v4975_v4 = vpop.f32.mrf.mxu1 }
0x1136   : > { %v4976_v19 = vpop.f32.mrf.mxu1 }
0x1137   : > { %v5019_v26 = vpop.f32.mrf.mxu0  ;;  %v4977_v0 = vadd.f32 %v4976_v19, %v4975_v4  ;;  %v4786_v4 = vld [vmem:[%s7814_s30] ss:$0 sm:$0xff] }
0x1138   : > { %v4787_v19 = vld [vmem:[%s1076_s10] ss:$0 sm:$0xff]  ;;  %s7816_s10 = sld [smem:[#allocation38_spill]] }
0x1139   : > { %v4162_v55 = vadd.f32 %v4977_v0, %v4785_v62  ;;  %v5020_v28 = vpop.f32.mrf.mxu0 }
0x113a   : > { %v5021_v6 = vadd.f32 %v5020_v28, %v5019_v26 }
0x113c   : > { %v4247_v48 = vadd.f32 %v5021_v6, %v4162_v55  ;;  %v4978_v2 = vpop.f32.mrf.mxu1 }
0x113e   : > { %v4979_v24 = vpop.f32.mrf.mxu1  ;;  %v4265_v41 = vadd.f32 %v4247_v48, %v7810_v17  ;;  %p4788_p6 = scmp.lt.s32.totalorder %s7816_s10, 2 }
0x113f   : > { %v5022_v30 = vpop.f32.mrf.mxu0  ;;  %v4980_v16 = vadd.f32 %v4979_v24, %v4978_v2 }
0x1140   : > { %4271 = vadd.xlane.f32.xlu0 %v4265_v41 }
0x1141   : > { %v4167_v8 = vadd.f32 %v4980_v16, %v4785_v62  ;;  %v5023_v60 = vpop.f32.mrf.mxu0 }
0x1142   : > { %v5024_v27 = vadd.f32 %v5023_v60, %v5022_v30 }
0x1144   : > { %v4252_v63 = vadd.f32 %v5024_v27, %v4167_v8 }
0x1146   : > { %v4266_v31 = vadd.f32 %v4252_v63, %v7811_v57 }
0x1148   : > { %4273 = vadd.xlane.f32.xlu1 %v4266_v31 }
0x1152   : > { %v4981_v61 = vpop.f32.mrf.mxu1 }
0x1153   : > { %v5025_v50 = vpop.f32.mrf.mxu0 }
0x1154   : > { %v4982_v13 = vpop.f32.mrf.mxu1 }
0x1155   : > { %v4983_v3 = vadd.f32 %v4982_v13, %v4981_v61  ;;  %v5026_v25 = vpop.f32.mrf.mxu0 }
0x1156   : > { %v5027_v22 = vadd.f32 %v5026_v25, %v5025_v50 }
0x1157   : > { %v4172_v9 = vadd.f32 %v4983_v3, %v4785_v62 }
0x1159   : > { %v4257_v35 = vadd.f32 %v5027_v22, %v4172_v9 }
0x115a   : > { %v4984_v5 = vpop.f32.mrf.mxu1 }
0x115b   : > { %v4267_v53 = vadd.f32 %v4257_v35, %v7812_v33 }
0x115c   : > { %v5028_v23 = vpop.f32.mrf.mxu0  ;;  %v4985_v12 = vpop.f32.mrf.mxu1 }
0x115d   : > { %v4986_v42 = vadd.f32 %v4985_v12, %v4984_v5  ;;  %4275 = vadd.xlane.f32.xlu0 %v4267_v53 }
0x115e   : > { %v5029_v58 = vpop.f32.mrf.mxu0 }
0x115f   : > { %v4177_v56 = vadd.f32 %v4986_v42, %v4785_v62  ;;  %v5030_v51 = vadd.f32 %v5029_v58, %v5028_v23 }
0x1161   : > { %v4262_v40 = vadd.f32 %v5030_v51, %v4177_v56 }
0x1163   : > { %v4268_v20 = vadd.f32 %v4262_v40, %v7813_v43 }
0x1165   : > { %4277 = vadd.xlane.f32.xlu1 %v4268_v20 }
0x11c9   : > { %v4272_v46 = vpop.xlane.xlu0 %4271 }
0x11ca   : > { %v4279_v47 = vmul.f32 0.0078125, %v4272_v46 }
0x11cc   : > { %v4283_v44 = vsub.f32 %v4265_v41, %v4279_v47 }
0x11ce   : > { %v4287_v32 = vmul.f32 %v4283_v44, %v4283_v44 }
0x11d0   : > { %4291 = vadd.xlane.f32.xlu0 %v4287_v32 }
0x11d1   : > { %v4274_v14 = vpop.xlane.xlu1 %4273 }
0x11d2   : > { %v4280_v45 = vmul.f32 0.0078125, %v4274_v14 }
0x11d4   : > { %v4284_v1 = vsub.f32 %v4266_v31, %v4280_v45 }
0x11d6   : > { %v4288_v49 = vmul.f32 %v4284_v1, %v4284_v1 }
0x11d8   : > { %4293 = vadd.xlane.f32.xlu1 %v4288_v49 }
0x11e6   : > { %v4276_v7 = vpop.xlane.xlu0 %4275 }
0x11e7   : > { %v4281_v18 = vmul.f32 0.0078125, %v4276_v7 }
0x11e9   : > { %v4285_v11 = vsub.f32 %v4267_v53, %v4281_v18 }
0x11eb   : > { %v4289_v38 = vmul.f32 %v4285_v11, %v4285_v11 }
0x11ed   : > { %4295 = vadd.xlane.f32.xlu0 %v4289_v38 }
0x11ee   : > { %v4278_v21 = vpop.xlane.xlu1 %4277 }
0x11ef   : > { %v4282_v34 = vmul.f32 0.0078125, %v4278_v21 }
0x11f1   : > { %v4286_v39 = vsub.f32 %v4268_v20, %v4282_v34 }
0x11f3   : > { %v4290_v54 = vmul.f32 %v4286_v39, %v4286_v39 }
0x11f5   : > { %4297 = vadd.xlane.f32.xlu1 %v4290_v54 }
0x1259   : > { %v4292_v59 = vpop.xlane.xlu0 %4291 }
0x125a   : > { %v4299_v10 = vmul.f32 0.0078125, %v4292_v59 }
0x125c   : > { %v4303_v36 = vadd.f32 1e-12, %v4299_v10 }
0x125e   : > { %5605 = vrsqrt.f32 %v4303_v36 }
0x1261   : > { %v4294_v52 = vpop.xlane.xlu1 %4293 }
0x1262   : > { %v4300_v15 = vmul.f32 0.0078125, %v4294_v52 }
0x1264   : > { %v4304_v29 = vadd.f32 1e-12, %v4300_v15 }
0x1266   : > { %5607 = vrsqrt.f32 %v4304_v29 }
0x126b   : > { %v5606_v37 = vpop.eup %5605 }
0x126c   : > { %v4311_v62 = vmul.f32 %v5606_v37, %v4283_v44 }
0x126e   : > { %v4321_v26 = vmul.f32 %v4786_v4, %v4311_v62 }
0x1270   : > { %v4331_v0 = vadd.f32 %v4787_v19, %v4321_v26 }
0x1272   : > { %4335 = vst [vmem:[#allocation2 + $0x10] sm:$0xff] %v4331_v0 }
0x1273   : > { %v5608_v55 = vpop.eup %5607 }
0x1274   : > { %v4312_v28 = vmul.f32 %v5608_v55, %v4284_v1 }
0x1276   : > { %v4322_v6 = vmul.f32 %v4786_v4, %v4312_v28  ;;  %v4296_v48 = vpop.xlane.xlu0 %4295 }
0x1277   : > { %v4301_v2 = vmul.f32 0.0078125, %v4296_v48 }
0x1278   : > { %v4332_v24 = vadd.f32 %v4787_v19, %v4322_v6 }
0x1279   : > { %v4305_v17 = vadd.f32 1e-12, %v4301_v2 }
0x127a   : > { %4336 = vst [vmem:[#allocation2] sm:$0xff] %v4332_v24 }
0x127b   : > { %5609 = vrsqrt.f32 %v4305_v17 }
0x127e   : > { %v4298_v41 = vpop.xlane.xlu1 %4297 }
0x127f   : > { %v4302_v30 = vmul.f32 0.0078125, %v4298_v41 }
0x1281   : > { %v4306_v16 = vadd.f32 1e-12, %v4302_v30 }
0x1283   : > { %5611 = vrsqrt.f32 %v4306_v16 }
0x1288   : > { %v5610_v8 = vpop.eup %5609 }
0x1289   : > { %v4313_v60 = vmul.f32 %v5610_v8, %v4285_v11 }
0x128b   : > { %v4323_v27 = vmul.f32 %v4786_v4, %v4313_v60 }
0x128d   : > { %v4333_v63 = vadd.f32 %v4787_v19, %v4323_v27 }
0x128f   : > { %4337 = vst [vmem:[#allocation2 + $0x18] sm:$0xff] %v4333_v63 }
0x1290   : > { %v5612_v57 = vpop.eup %5611 }
0x1291   : > { %v4314_v31 = vmul.f32 %v5612_v57, %v4286_v39 }
0x1293   : > { %v4324_v61 = vmul.f32 %v4786_v4, %v4314_v31  ;;  %4342 = sbr.rel (%p4788_p6) target bundleno = 4766 (0x129e), region = 160 }
0x1295   : > { %v4334_v50 = vadd.f32 %v4787_v19, %v4324_v61 }
0x1297   : > { %4338 = vst [vmem:[#allocation2 + $0x8] sm:$0xff] %v4334_v50 }
0x1298   : > { %v4343_v13 = vld [vmem:[#allocation26] sm:$0x3]  ;;  %v4346_v3 = vrot.slane %v4333_v63, 7  ;;  %vm4347_vm4 = vcmask 1041409  }
0x129a   : > { %v4348_v25 = vsel %vm4347_vm4, %v4346_v3, %v4331_v0 }
0x129b   : > { %v4350_v9 = vadd.f32 %v4348_v25, %v4343_v13 }
0x129d   : > { %4351 = vst [vmem:[#allocation26] sm:$0x3] %v4350_v9 }
0x129e PF: > { %s7817_s22 = sld [smem:[#allocation38_spill]]  ;;  %s6118_s18 = smov [#allocation26]  }
0x129f   : > { %s4359_s2 = sshll.u32 %s6118_s18, 4  ;;  %s4360_s2 = int_to_ptr.vmem [resolvable:$true] %s4359_s2 }
0x12a0   : > { %s6003_s1 = scalar_lea.vmem %s4360_s2, 32  ;;  %p6010_p10 = scmp.lt.s32.totalorder %s4360_s2, %s4360_s2 }
0x12a1   : > { %p6004_p4 = scmp.ne.s32.totalorder %s4360_s2, %s6003_s1  ;;  %p6011_p13 = scmp.lt.s32.totalorder %s6003_s1, %s6003_s1 }
0x12a3   : > { %p6012_p1 = por %p6011_p13, %p6010_p10 }
0x12a4   : > { %p5384_p7 = scmp.eq.s32.totalorder %s7817_s22, 3 }
0x12a6   : > { %p6005_p9 = pnand %p6004_p4, %p5384_p7 }
0x12a8   : > { %p6006_p8 = pneg %p6005_p9 }
0x12aa   : > { %p6013_p5 = pnand %p6012_p1, %p6006_p8 }
0x12ac   : > { %6016 = shalt.err (!%p6013_p5)
}
0x12ad   : > { %s7818_s3 = sld [smem:[#allocation74_spill]] }
0x12b3   : > { %5330 = dma.vmem_to_hbm [thread:$0]  (%p5384_p7), %s4360_s2, 32, %s7818_s3, [#allocation5]  }
0x12b4   : > { %6076 = dma.done.wait (%p5384_p7), [#allocation5], 32  }
0x12b5   : > { %6078 = vsyncadd (%p5384_p7), [#allocation5], 4294967264 }
0x12b6 PF: > { %s7819_s21 = sld [smem:[#allocation39_spill]] }
0x12b7   : > { %s7820_s0 = sld [smem:[#allocation36_spill]] }
0x12b8   : > { %s7821_s30 = sld [smem:[#allocation37_spill]] }
0x12b9   : > { %s7822_s20 = sld [smem:[#allocation40_spill]] }
0x12bc   : > { %p47_p12 = scmp.ge.s32.totalorder %s7819_s21, 6  }
0x12be   :  { %49 = sbr.rel (!%p47_p12) target bundleno = 35 (0x23), region = 289 }
0x12c3   :  { %4372 = vsyncpa [#allocation4], 1 }
0x12c4   :  { %4374 = vsyncpa [#allocation4 + $0x1], 1 }
0x12c5   :  { %4375 = vsyncpa [#allocation7], 1 }
0x12c6   :  { %4376 = vsyncpa [#allocation10], 1 }
0x12c7   :  { %4378 = vsyncpa [#allocation10 + $0x1], 1 }
0x12c8   :  { %4379 = vsyncpa [#allocation13], 1 }
0x12c9   :  { %4381 = vsyncpa [#allocation13 + $0x1], 1 }
0x12ca   :  { %4382 = vsyncpa [#allocation16], 1 }
0x12cb   :  { %4384 = vsyncpa [#allocation16 + $0x1], 1 }
0x12cc   :  { %4385 = vsyncpa [#allocation19], 1 }
0x12cd   :  { %4387 = vsyncpa [#allocation19 + $0x1], 1 }
0x12ce   :  { %4388 = vsyncpa [#allocation22], 1 }
0x12cf   :  { %4390 = vsyncpa [#allocation22 + $0x1], 1 }
0x12d0   :  { %4391 = vsyncpa [#allocation25], 1 }
0x12d1   :  { %4393 = vsyncpa [#allocation25 + $0x1], 1 }
0x12d2   :  { %4394 = vsyncpa [#allocation5], 1 }
0x12d3   :  { %4396 = vsyncpa [#allocation5 + $0x1], 1 }

</bundles_post_ra>
